<compile_context>
chip_gen: v7x
topology: tpu7x:2x2x1
jax: 0.10.0
libtpu: 0.0.40
codegen_flags: <defaults>
</compile_context>

<pallas_src>
import jax
import jax.numpy as jnp
from jax.experimental import pallas as pl
from jax.experimental.pallas import tpu as pltpu

IN_DIM = 28 * 28       # 784 logical input features
H_DIM = 200            # logical hidden width
OUT_DIM = 10           # logical output classes

H_PAD = 256            # hidden width padded to lane-dense multiple of 128
OUT_PAD = 128          # output padded to one full lane tile
NEG_BIG = -1e30        # bias for padded output lanes -> exp() underflows to 0

MAX_TB = 512           # max batch tile (review: sweep 256-1024; 512 default)


def mlp_kernel(x_ref, w1_ref, b1_ref, w2_ref, b2_ref, w3_ref, b3_ref, o_ref):
    # x tile arrives as f32; cast to bf16 on the VPU (hidden under the MXU)
    # so the wrapper never pays a separate HBM cast pass.
    x = x_ref[...].astype(jnp.bfloat16)

    # fc1 + relu (bias/relu in f32)
    h1 = jnp.dot(x, w1_ref[...], preferred_element_type=jnp.float32) + b1_ref[...]
    h1 = jnp.maximum(h1, 0.0)

    # fc2 + relu
    h2 = jnp.dot(h1.astype(jnp.bfloat16), w2_ref[...],
                 preferred_element_type=jnp.float32) + b2_ref[...]
    h2 = jnp.maximum(h2, 0.0)

    # fc3 (padded output lanes carry bias = -1e30 so they vanish in softmax)
    logits = jnp.dot(h2.astype(jnp.bfloat16), w3_ref[...],
                     preferred_element_type=jnp.float32) + b3_ref[...]

    # log_softmax over last (lane) axis, f32
    m = jnp.max(logits, axis=-1, keepdims=True)
    shifted = logits - m
    lse = jnp.log(jnp.sum(jnp.exp(shifted), axis=-1, keepdims=True))
    o_ref[...] = (shifted - lse).astype(o_ref.dtype)


def _round_up(n, m):
    return ((n + m - 1) // m) * m


def _select_batch_tile(B, max_tb=MAX_TB):
    """Pick (tb, Bp).  Prefer: no batch padding (tb divides round_up(B, 8)),
    >= 2 grid steps (v7x has 2 TensorCores sharded via the 'parallel' axis),
    and the largest tile <= max_tb (amortize per-step overhead and fill the
    256-row MXU on v6e/v7x)."""
    Bp = _round_up(B, 8)
    hi = min(max_tb, Bp)
    for need_two_steps in (True, False):
        for tb in range(hi, 7, -8):          # multiples of 8 only
            if Bp % tb:
                continue
            if need_two_steps and Bp // tb < 2:
                continue
            return tb, Bp
    return hi, _round_up(B, hi)              # unreachable fallback


def mlp_forward(x, params, *, max_tb=MAX_TB):
    """x: (B, 784) f32. params: padded bf16 weights (in,out) + f32 biases (1,out)."""
    B = x.shape[0]
    tb, Bp = _select_batch_tile(B, max_tb)
    if Bp != B:
        # Only hit when no multiple-of-8 tile divides the batch (ragged tail).
        x = jnp.pad(x, ((0, Bp - B), (0, 0)))

    compiler_kwargs = dict(dimension_semantics=("parallel",))
    if tb >= 1024:
        # v5e default scoped VMEM is 16 MiB; leave headroom for big tiles.
        compiler_kwargs["vmem_limit_bytes"] = 48 * 1024 * 1024

    out = pl.pallas_call(
        mlp_kernel,
        out_shape=jax.ShapeDtypeStruct((Bp, OUT_PAD), jnp.float32),
        grid_spec=pl.GridSpec(
            grid=(Bp // tb,),
            in_specs=[
                pl.BlockSpec((tb, IN_DIM), lambda i: (i, 0)),      # x tile (f32)
                pl.BlockSpec((IN_DIM, H_PAD), lambda i: (0, 0)),   # w1 (resident)
                pl.BlockSpec((1, H_PAD), lambda i: (0, 0)),        # b1
                pl.BlockSpec((H_PAD, H_PAD), lambda i: (0, 0)),    # w2
                pl.BlockSpec((1, H_PAD), lambda i: (0, 0)),        # b2
                pl.BlockSpec((H_PAD, OUT_PAD), lambda i: (0, 0)),  # w3
                pl.BlockSpec((1, OUT_PAD), lambda i: (0, 0)),      # b3
            ],
            out_specs=pl.BlockSpec((tb, OUT_PAD), lambda i: (i, 0)),
        ),
        compiler_params=pltpu.CompilerParams(**compiler_kwargs),
    )(x, params["w1"], params["b1"], params["w2"], params["b2"],
      params["w3"], params["b3"])

    return out[:B, :OUT_DIM]


def init_params(key):
    """nn.Linear-style U(-1/sqrt(fan_in), 1/sqrt(fan_in)) init, then pad to
    lane-dense shapes. Weights stored (in, out) in bf16; biases (1, out) in f32.
    Padded output lanes get bias -1e30 so log_softmax ignores them."""
    ks = jax.random.split(key, 6)

    def lin(kw, kb, fan_in, fan_out):
        bound = 1.0 / jnp.sqrt(fan_in)
        w = jax.random.uniform(kw, (fan_in, fan_out), jnp.float32, -bound, bound)
        b = jax.random.uniform(kb, (1, fan_out), jnp.float32, -bound, bound)
        return w, b

    w1, b1 = lin(ks[0], ks[1], IN_DIM, H_DIM)
    w2, b2 = lin(ks[2], ks[3], H_DIM, H_DIM)
    w3, b3 = lin(ks[4], ks[5], H_DIM, OUT_DIM)

    w1p = jnp.zeros((IN_DIM, H_PAD), jnp.float32).at[:, :H_DIM].set(w1)
    b1p = jnp.zeros((1, H_PAD), jnp.float32).at[:, :H_DIM].set(b1)
    w2p = jnp.zeros((H_PAD, H_PAD), jnp.float32).at[:H_DIM, :H_DIM].set(w2)
    b2p = jnp.zeros((1, H_PAD), jnp.float32).at[:, :H_DIM].set(b2)
    w3p = jnp.zeros((H_PAD, OUT_PAD), jnp.float32).at[:H_DIM, :OUT_DIM].set(w3)
    b3p = jnp.full((1, OUT_PAD), NEG_BIG, jnp.float32).at[:, :OUT_DIM].set(b3)

    return {"w1": w1p.astype(jnp.bfloat16), "b1": b1p,
            "w2": w2p.astype(jnp.bfloat16), "b2": b2p,
            "w3": w3p.astype(jnp.bfloat16), "b3": b3p}


def reference_forward(x, p):
    """Pure-JAX reference with the same bf16-operand / f32-accumulate math."""
    xb = x.astype(jnp.bfloat16)
    h1 = jnp.maximum(
        jnp.dot(xb, p["w1"], preferred_element_type=jnp.float32) + p["b1"], 0.0)
    h2 = jnp.maximum(
        jnp.dot(h1.astype(jnp.bfloat16), p["w2"],
                preferred_element_type=jnp.float32) + p["b2"], 0.0)
    logits = jnp.dot(h2.astype(jnp.bfloat16), p["w3"],
                     preferred_element_type=jnp.float32) + p["b3"]
    return jax.nn.log_softmax(logits, axis=-1)[:, :OUT_DIM]


if __name__ == "__main__":
    key = jax.random.PRNGKey(0)
    k_x, k_p = jax.random.split(key)

    # B=1024 -> tile selection picks tb=512 with 2 grid steps: exercises the
    # large-tile path, pipelining, and the v7x dual-TC "parallel" axis.
    B = 1024
    x = jax.random.normal(k_x, (B, IN_DIM), jnp.float32)
    params = init_params(k_p)

    out = mlp_forward(x, params)
    out = jax.block_until_ready(out)

    ref = reference_forward(x, params)
    assert out.shape == (B, OUT_DIM)
    assert bool(jnp.all(jnp.isfinite(out))), "non-finite output"
    assert jnp.allclose(out, ref, atol=5e-3, rtol=5e-3), "mismatch vs reference"

    print("KERNEL_OK")
</pallas_src>

<mosaic_0001>
module attributes {stable_mosaic.version = 11 : i64} {
  func.func @mlp_kernel(%arg0: i32, %arg1: memref<512x784xf32, #tpu.memory_space<vmem>>, %arg2: memref<784x256xbf16, #tpu.memory_space<vmem>>, %arg3: memref<1x256xf32, #tpu.memory_space<vmem>>, %arg4: memref<256x256xbf16, #tpu.memory_space<vmem>>, %arg5: memref<1x256xf32, #tpu.memory_space<vmem>>, %arg6: memref<256x128xbf16, #tpu.memory_space<vmem>>, %arg7: memref<1x128xf32, #tpu.memory_space<vmem>>, %arg8: memref<512x128xf32, #tpu.memory_space<vmem>>) attributes {dimension_semantics = [#tpu.dimension_semantics<parallel>], iteration_bounds = array<i64: 2>, scalar_prefetch = 0 : i64, scratch_operands = 0 : i64, tpu.core_type = #tpu.core_type<tc>, window_params = [{transform_indices = @transform_0, window_bounds = array<i64: 512, 784>}, {pipeline_mode = #tpu.pipeline_mode<synchronous>, transform_indices = @transform_1, window_bounds = array<i64: 784, 256>}, {pipeline_mode = #tpu.pipeline_mode<synchronous>, transform_indices = @transform_2, window_bounds = array<i64: 1, 256>}, {pipeline_mode = #tpu.pipeline_mode<synchronous>, transform_indices = @transform_3, window_bounds = array<i64: 256, 256>}, {pipeline_mode = #tpu.pipeline_mode<synchronous>, transform_indices = @transform_4, window_bounds = array<i64: 1, 256>}, {pipeline_mode = #tpu.pipeline_mode<synchronous>, transform_indices = @transform_5, window_bounds = array<i64: 256, 128>}, {pipeline_mode = #tpu.pipeline_mode<synchronous>, transform_indices = @transform_6, window_bounds = array<i64: 1, 128>}, {transform_indices = @transform_7, window_bounds = array<i64: 512, 128>}]} {
    %c0 = arith.constant 0 : index
    %c0_0 = arith.constant 0 : index
    %0 = vector.load %arg1[%c0, %c0_0] : memref<512x784xf32, #tpu.memory_space<vmem>>, vector<512x784xf32>
    %1 = arith.truncf %0 : vector<512x784xf32> to vector<512x784xbf16>
    %c0_1 = arith.constant 0 : index
    %c0_2 = arith.constant 0 : index
    %2 = vector.load %arg2[%c0_1, %c0_2] : memref<784x256xbf16, #tpu.memory_space<vmem>>, vector<784x256xbf16>
    %cst = arith.constant dense<0.000000e+00> : vector<512x256xf32>
    %3 = tpu.matmul %1, %2, %cst {dimension_numbers = #tpu.dot_dimension_numbers<[1], [0], [0], [1], [0, 0, 1, 1], [], []>} : vector<512x784xbf16>, vector<784x256xbf16>, vector<512x256xf32> -> vector<512x256xf32>
    %c0_3 = arith.constant 0 : index
    %c0_4 = arith.constant 0 : index
    %4 = vector.load %arg3[%c0_3, %c0_4] : memref<1x256xf32, #tpu.memory_space<vmem>>, vector<1x256xf32>
    %5 = vector.broadcast %4 : vector<1x256xf32> to vector<512x256xf32>
    %6 = arith.addf %3, %5 : vector<512x256xf32>
    %cst_5 = arith.constant 0.000000e+00 : f32
    %7 = vector.broadcast %cst_5 : f32 to vector<512x256xf32>
    %8 = arith.maximumf %6, %7 : vector<512x256xf32>
    %9 = arith.truncf %8 : vector<512x256xf32> to vector<512x256xbf16>
    %c0_6 = arith.constant 0 : index
    %c0_7 = arith.constant 0 : index
    %10 = vector.load %arg4[%c0_6, %c0_7] : memref<256x256xbf16, #tpu.memory_space<vmem>>, vector<256x256xbf16>
    %cst_8 = arith.constant dense<0.000000e+00> : vector<512x256xf32>
    %11 = tpu.matmul %9, %10, %cst_8 {dimension_numbers = #tpu.dot_dimension_numbers<[1], [0], [0], [1], [0, 0, 1, 1], [], []>} : vector<512x256xbf16>, vector<256x256xbf16>, vector<512x256xf32> -> vector<512x256xf32>
    %c0_9 = arith.constant 0 : index
    %c0_10 = arith.constant 0 : index
    %12 = vector.load %arg5[%c0_9, %c0_10] : memref<1x256xf32, #tpu.memory_space<vmem>>, vector<1x256xf32>
    %13 = vector.broadcast %12 : vector<1x256xf32> to vector<512x256xf32>
    %14 = arith.addf %11, %13 : vector<512x256xf32>
    %cst_11 = arith.constant 0.000000e+00 : f32
    %15 = vector.broadcast %cst_11 : f32 to vector<512x256xf32>
    %16 = arith.maximumf %14, %15 : vector<512x256xf32>
    %17 = arith.truncf %16 : vector<512x256xf32> to vector<512x256xbf16>
    %c0_12 = arith.constant 0 : index
    %c0_13 = arith.constant 0 : index
    %18 = vector.load %arg6[%c0_12, %c0_13] : memref<256x128xbf16, #tpu.memory_space<vmem>>, vector<256x128xbf16>
    %cst_14 = arith.constant dense<0.000000e+00> : vector<512x128xf32>
    %19 = tpu.matmul %17, %18, %cst_14 {dimension_numbers = #tpu.dot_dimension_numbers<[1], [0], [0], [1], [0, 0, 1, 1], [], []>} : vector<512x256xbf16>, vector<256x128xbf16>, vector<512x128xf32> -> vector<512x128xf32>
    %c0_15 = arith.constant 0 : index
    %c0_16 = arith.constant 0 : index
    %20 = vector.load %arg7[%c0_15, %c0_16] : memref<1x128xf32, #tpu.memory_space<vmem>>, vector<1x128xf32>
    %21 = vector.broadcast %20 : vector<1x128xf32> to vector<512x128xf32>
    %22 = arith.addf %19, %21 : vector<512x128xf32>
    %cst_17 = arith.constant dense<0xFF800000> : vector<512xf32>
    %23 = vector.multi_reduction <maximumf>, %22, %cst_17 [1] : vector<512x128xf32> to vector<512xf32>
    %24 = vector.shape_cast %23 : vector<512xf32> to vector<512x1xf32>
    %25 = vector.broadcast %24 : vector<512x1xf32> to vector<512x128xf32>
    %26 = arith.subf %22, %25 : vector<512x128xf32>
    %27 = math.exp %26 : vector<512x128xf32>
    %cst_18 = arith.constant dense<0.000000e+00> : vector<512xf32>
    %28 = vector.multi_reduction <add>, %27, %cst_18 [1] : vector<512x128xf32> to vector<512xf32>
    %29 = vector.shape_cast %28 : vector<512xf32> to vector<512x1xf32>
    %30 = math.log %29 : vector<512x1xf32>
    %31 = vector.broadcast %30 : vector<512x1xf32> to vector<512x128xf32>
    %32 = arith.subf %26, %31 : vector<512x128xf32>
    %c0_19 = arith.constant 0 : index
    %c0_20 = arith.constant 0 : index
    %33 = vector.load %arg8[%c0_19, %c0_20] : memref<512x128xf32, #tpu.memory_space<vmem>>, vector<512x128xf32>
    tpu.vector_store %arg8[%c0_19, %c0_20], %32 {strides = array<i32>} : memref<512x128xf32, #tpu.memory_space<vmem>>, vector<512x128xf32>,
    return
  }
  func.func @transform_0(%arg0: i32) -> (i32, i32) {
    %c0_i32 = arith.constant 0 : i32
    %c0_i32_0 = arith.constant 0 : i32
    return %arg0, %c0_i32 : i32, i32
  }
  func.func @transform_1(%arg0: i32) -> (i32, i32) {
    %c0_i32 = arith.constant 0 : i32
    %c0_i32_0 = arith.constant 0 : i32
    %c0_i32_1 = arith.constant 0 : i32
    return %c0_i32, %c0_i32_0 : i32, i32
  }
  func.func @transform_2(%arg0: i32) -> (i32, i32) {
    %c0_i32 = arith.constant 0 : i32
    %c0_i32_0 = arith.constant 0 : i32
    %c0_i32_1 = arith.constant 0 : i32
    return %c0_i32, %c0_i32_0 : i32, i32
  }
  func.func @transform_3(%arg0: i32) -> (i32, i32) {
    %c0_i32 = arith.constant 0 : i32
    %c0_i32_0 = arith.constant 0 : i32
    %c0_i32_1 = arith.constant 0 : i32
    return %c0_i32, %c0_i32_0 : i32, i32
  }
  func.func @transform_4(%arg0: i32) -> (i32, i32) {
    %c0_i32 = arith.constant 0 : i32
    %c0_i32_0 = arith.constant 0 : i32
    %c0_i32_1 = arith.constant 0 : i32
    return %c0_i32, %c0_i32_0 : i32, i32
  }
  func.func @transform_5(%arg0: i32) -> (i32, i32) {
    %c0_i32 = arith.constant 0 : i32
    %c0_i32_0 = arith.constant 0 : i32
    %c0_i32_1 = arith.constant 0 : i32
    return %c0_i32, %c0_i32_0 : i32, i32
  }
  func.func @transform_6(%arg0: i32) -> (i32, i32) {
    %c0_i32 = arith.constant 0 : i32
    %c0_i32_0 = arith.constant 0 : i32
    %c0_i32_1 = arith.constant 0 : i32
    return %c0_i32, %c0_i32_0 : i32, i32
  }
  func.func @transform_7(%arg0: i32) -> (i32, i32) {
    %c0_i32 = arith.constant 0 : i32
    %c0_i32_0 = arith.constant 0 : i32
    return %arg0, %c0_i32 : i32, i32
  }
}

</mosaic_0001>

<bundles_post_ra>
// kernel: tpu_custom_call.1
= control target key start
LH: loop header
LB: loop body
LE: loop exit
PB: predicated region body
PF: predicated region fallthrough
CT: control target
= control target key end

     0   :  { %12 = vsyncpa [#allocation3], 0  ;;  %s9019_s0 = inlined_call_operand.vmem [shape: f32[1024,784], index: 0, kind: input, shape index: {}]   ;;  %s9020_s1 = inlined_call_operand.vmem [shape: bf16[784,256], index: 1, kind: input, shape index: {}]   ;;  %s9021_s2 = inlined_call_operand.vmem [shape: f32[1,256], index: 2, kind: input, shape index: {}]   ;;  %s9022_s3 = inlined_call_operand.vmem [shape: bf16[256,256], index: 3, kind: input, shape index: {}]   ;;  %s9023_s4 = inlined_call_operand.vmem [shape: f32[1,256], index: 4, kind: input, shape index: {}]   ;;  %s9024_s5 = inlined_call_operand.vmem [shape: bf16[256,128], index: 5, kind: input, shape index: {}]   ;;  %s9025_s6 = inlined_call_operand.vmem [shape: f32[1,128], index: 6, kind: input, shape index: {}]   ;;  %s9026_s7 = inlined_call_operand.hbm [shape: f32[1024,128], index: 7, kind: output, shape index: {}]  }
   0x1   :  { %14 = vsyncpa [#allocation3 + $0x1], 0  ;;  %s6532_s24 = smov 0   ;;  %s6534_s25 = smov 0  }
   0x2   :  { %s6536_s26 = smov 0   ;;  %s6538_s27 = smov 0  }
   0x3 LB: > { %s6553_s28 = sadd.s32 4294967295, %s6486_s27   ;;  %s5210_s29 = sadd.s32 4294967294, %s6486_s27   ;;  %s6486_s27 = sphi %s6538_s27, %s9167_s27   ;;  %s6482_s26 = sphi %s6536_s26, %s9166_s26   ;;  %s6478_s25 = sphi %s6534_s25, %s9165_s25   ;;  %s6474_s24 = sphi %s6532_s24, %s9164_s24  }
   0x4   : > { %s6557_s30 = sadd.s32 1, %s6486_s27   ;;  %s179_s8 = sadd.s32 1, %s6482_s26 }
   0x5   : > { %s176_s9 = ssub.s32 %s6486_s27, %s6557_s30  ;;  %p189_p0 = scmp.ne.s32.totalorder %s6482_s26, %s6478_s25 }
   0x6   : > { %p177_p1 = scmp.eq.s32.totalorder %s176_s9, 0  ;;  %p190_p2 = scmp.eq.s32.totalorder %s6553_s28, 1 }
   0x7   : > { %p195_p3 = scmp.ne.s32.totalorder %s6478_s25, %s6474_s24  ;;  %p196_p4 = scmp.eq.s32.totalorder %s5210_s29, 1 }
   0x8   : > { %s6568_s10 = scalar_select %p177_p1, %s6482_s26, %s179_s8  }
   0x9   : > { %p6570_p5 = por %p190_p2, %p189_p0  ;;  %p6574_p6 = por %p196_p4, %p195_p3 }
   0xa   : > { %p5213_p7 = scmp.ge.s32.totalorder %s6486_s27, 1  ;;  %p242_p8 = scmp.lt.s32.totalorder %s6486_s27, 3 }
   0xc   : > { %p243_p9 = pnand %p5213_p7, %p242_p8 }
   0xe   : > { %246 = sbr.rel (%p243_p9) target bundleno = 1869 (0x74d), region = 48 }
  0x15   : > { %v5957_v0 = vld [vmem:[%s9020_s1 + $0x104] ss:$8 sps:$4 sm:$0xff]   ;;  %v5959_v1 = vld [vmem:[%s9020_s1 + $0x100] ss:$8 sps:$4 sm:$0xff]   ;;  %v5960_v2 = vld [vmem:[%s9020_s1 + $0x114] ss:$8 sps:$4 sm:$0xff]  }
  0x16   : > { %2006 = vmatprep.subr.bf16.mxu0 %v5957_v0  ;;  %v5962_v3 = vld [vmem:[%s9020_s1 + $0x110] ss:$8 sps:$4 sm:$0xff]   ;;  %s5215_s21 = sshll.u32 %s6553_s28, 6  ;;  %v5963_v4 = vld [vmem:[%s9020_s1 + $0x124] ss:$8 sps:$4 sm:$0xff]   ;;  %vm1556_vm0 = vcmask 130048  }
  0x17   : > { %2007 = vmatpush1.bf16.msra.mxu0 %v5959_v1  ;;  %p276_p10 = scmp.lt.s32.totalorder %s5215_s21, 127  ;;  %v5965_v5 = vld [vmem:[%s9020_s1 + $0x120] ss:$8 sps:$4 sm:$0xff]   ;;  %v5966_v6 = vld [vmem:[%s9020_s1 + $0x134] ss:$8 sps:$4 sm:$0xff]   ;;  %s5401_s16 = sshll.u32 %s6553_s28, 13 }
  0x18   : > { %2008 = vmatprep.subr.bf16.mxu0 %v5960_v2  ;;  %v5968_v7 = vld [vmem:[%s9020_s1 + $0x130] ss:$8 sps:$4 sm:$0xff]   ;;  %v5969_v8 = vld [vmem:[%s9020_s1 + $0x144] ss:$8 sps:$4 sm:$0xff]   ;;  %v5971_v9 = vld [vmem:[%s9020_s1 + $0x140] ss:$8 sps:$4 sm:$0xff]   ;;  %s8969_s19 = scalar_lea.hbm %s9026_s7, %s5401_s16 }
  0x19   : > { %s9169_s21 = smov (!%p276_p10, %s5215_s21), 127  ;;  %v5972_v10 = vld [vmem:[%s9020_s1 + $0x154] ss:$8 sps:$4 sm:$0xff]   ;;  %v5974_v11 = vld [vmem:[%s9020_s1 + $0x150] ss:$8 sps:$4 sm:$0xff]   ;;  %s6489_s22 = smov [#allocation2]  }
  0x1a   : > { %s5914_s18 = smul.u32 56, %s9169_s21  ;;  %v5975_v12 = vld [vmem:[%s9020_s1 + $0x164] ss:$8 sps:$4 sm:$0xff]   ;;  %v5977_v16 = vld [vmem:[%s9020_s1 + $0x160] ss:$8 sps:$4 sm:$0xff]   ;;  %s272_s21 = sand.u32 1, %s6478_s25  }
  0x1b   : > { %2009 = vmatpush1.bf16.msra.mxu0 %v5962_v3  ;;  %v5978_v17 = vld [vmem:[%s9020_s1 + $0x174] ss:$8 sps:$4 sm:$0xff]   ;;  %v5980_v18 = vld [vmem:[%s9020_s1 + $0x170] ss:$8 sps:$4 sm:$0xff]   ;;  %v5981_v19 = vld [vmem:[%s9020_s1 + $0x184] ss:$8 sps:$4 sm:$0xff]  }
  0x1c   : > { %2010 = vmatprep.subr.bf16.mxu0 %v5963_v4  ;;  %s6617_s9 = scalar_lea.vmem %s9019_s0, %s5914_s18  ;;  %v5983_v20 = vld [vmem:[%s9020_s1 + $0x180] ss:$8 sps:$4 sm:$0xff]   ;;  %v5984_v21 = vld [vmem:[%s9020_s1 + $0x194] ss:$8 sps:$4 sm:$0xff]   ;;  %v5986_v22 = vld [vmem:[%s9020_s1 + $0x190] ss:$8 sps:$4 sm:$0xff]  }
  0x1d   : > { %v287_v13 = vld [vmem:[%s6617_s9 + $0x18] sm:$0xff]  ;;  %v294_v14 = vld [vmem:[%s6617_s9 + $0x50] sm:$0xff]  ;;  %v5987_v23 = vld [vmem:[%s9020_s1 + $0x1a4] ss:$8 sps:$4 sm:$0xff]   ;;  %s5214_s14 = sshll.u32 %s272_s21, 9  ;;  %s8978_s28 = scalar_lea.sflag [#allocation3], %s272_s21 }
  0x1e   : > { %v735_v15 = vpack.c.bf16 %v294_v14, %v287_v13  ;;  %v5989_v24 = vld [vmem:[%s9020_s1 + $0x1a0] ss:$8 sps:$4 sm:$0xff]   ;;  %v5990_v25 = vld [vmem:[%s9020_s1 + $0x1b4] ss:$8 sps:$4 sm:$0xff]   ;;  %v5992_v26 = vld [vmem:[%s9020_s1 + $0x1b0] ss:$8 sps:$4 sm:$0xff]  }
  0x1f   : > { %2011 = vmatpush1.bf16.msra.mxu0 %v5965_v5  ;;  %v5993_v27 = vld [vmem:[%s9020_s1 + $0x1c4] ss:$8 sps:$4 sm:$0xff]   ;;  %v5995_v28 = vld [vmem:[%s9020_s1 + $0x1c0] ss:$8 sps:$4 sm:$0xff]   ;;  %v5996_v29 = vld [vmem:[%s9020_s1 + $0x1d4] ss:$8 sps:$4 sm:$0xff]  }
  0x20   : > { %2012 = vmatprep.subr.bf16.mxu0 %v5966_v6  ;;  %2038 = vmatprep.mubr.bf16.mxu0 %v735_v15  ;;  %v5998_v30 = vld [vmem:[%s9020_s1 + $0x1d0] ss:$8 sps:$4 sm:$0xff]   ;;  %v5999_v31 = vld [vmem:[%s9020_s1 + $0x1e4] ss:$8 sps:$4 sm:$0xff]   ;;  %v6001_v32 = vld [vmem:[%s9020_s1 + $0x1e0] ss:$8 sps:$4 sm:$0xff]  }
  0x21   : > { %v6002_v33 = vld [vmem:[%s9020_s1 + $0x1f4] ss:$8 sps:$4 sm:$0xff]   ;;  %v6004_v34 = vld [vmem:[%s9020_s1 + $0x1f0] ss:$8 sps:$4 sm:$0xff]   ;;  %v293_v36 = vld [vmem:[%s6617_s9 + $0x48] sm:$0xff]  ;;  %s8754_s15 = scalar_lea.vmem [#allocation2], %s5214_s14 }
  0x22   : > { %v286_v35 = vld [vmem:[%s6617_s9 + $0x10] sm:$0xff]  ;;  %v6007_v37 = vld [vmem:[%s9020_s1 + $0x204] ss:$8 sps:$4 sm:$0xff]   ;;  %v6005_v40 = vld [vmem:[%s9020_s1 + $0x200] ss:$8 sps:$4 sm:$0xff]   ;;  %s5148_s17 = sshll.u32 %s8754_s15, 4  ;;  %s8971_s17 = int_to_ptr.vmem [resolvable:$true] %s5148_s17 }
  0x23   : > { %2013 = vmatpush1.bf16.msra.mxu0 %v5968_v7  ;;  %v301_v38 = vld [vmem:[%s6617_s9 + $0x88] sm:$0xff]  ;;  %v308_v39 = vld [vmem:[%s6617_s9 + $0xc0] sm:$0xff]  ;;  %v734_v41 = vpack.c.bf16 %v293_v36, %v286_v35  ;;  %v6010_v42 = vld [vmem:[%s9020_s1 + $0x214] ss:$8 sps:$4 sm:$0xff]   ;;  %s6424_s20 = scalar_lea.vmem %s8971_s17, 8192  ;;  %s6428_s23 = sshll.u32 %s6489_s22, 4  ;;  %s6429_s23 = int_to_ptr.vmem [resolvable:$false] %s6428_s23 }
  0x24   : > { %2014 = vmatprep.subr.bf16.mxu0 %v5969_v8  ;;  %v742_v43 = vpack.c.bf16 %v308_v39, %v301_v38  ;;  %v300_v44 = vld [vmem:[%s6617_s9 + $0x80] sm:$0xff]  ;;  %v307_v45 = vld [vmem:[%s6617_s9 + $0xb8] sm:$0xff]  ;;  %v322_v47 = vld [vmem:[%s6617_s9 + $0x130] sm:$0xff]  ;;  %p6425_p11 = scmp.ne.s32.totalorder %s8971_s17, %s6424_s20  ;;  %s6430_s29 = scalar_lea.vmem %s6429_s23, 16384 }
  0x25   : > { %v315_v46 = vld [vmem:[%s6617_s9 + $0xf8] sm:$0xff]  ;;  %v6013_v49 = vld [vmem:[%s9020_s1 + $0x224] ss:$8 sps:$4 sm:$0xff]   ;;  %v6011_v50 = vld [vmem:[%s9020_s1 + $0x220] ss:$8 sps:$4 sm:$0xff]   ;;  %v741_v51 = vpack.c.bf16 %v307_v45, %v300_v44  ;;  %p6431_p0 = scmp.lt.s32.totalorder %s8971_s17, %s6429_s23  ;;  %p6432_p1 = scmp.lt.s32.totalorder %s6430_s29, %s6424_s20 }
  0x26   : > { %v6008_v48 = vld [vmem:[%s9020_s1 + $0x210] ss:$8 sps:$4 sm:$0xff]   ;;  %v6016_v52 = vld [vmem:[%s9020_s1 + $0x234] ss:$8 sps:$4 sm:$0xff]   ;;  %v749_v53 = vpack.c.bf16 %v322_v47, %v315_v46  ;;  %v321_v55 = vld [vmem:[%s6617_s9 + $0x128] sm:$0xff]  ;;  %p6426_p12 = pnand %p6425_p11, %p6570_p5 }
  0x27   : > { %2015 = vmatpush1.bf16.msra.mxu0 %v5971_v9  ;;  %v314_v54 = vld [vmem:[%s6617_s9 + $0xf0] sm:$0xff]  ;;  %v329_v56 = vld [vmem:[%s6617_s9 + $0x168] sm:$0xff]  ;;  %v336_v57 = vld [vmem:[%s6617_s9 + $0x1a0] sm:$0xff]  ;;  %p6433_p2 = por %p6432_p1, %p6431_p0 }
  0x28   : > { %2016 = vmatprep.subr.bf16.mxu0 %v5972_v10  ;;  %v6014_v58 = vld [vmem:[%s9020_s1 + $0x230] ss:$8 sps:$4 sm:$0xff]   ;;  %v6019_v59 = vld [vmem:[%s9020_s1 + $0x244] ss:$8 sps:$4 sm:$0xff]   ;;  %v6017_v60 = vld [vmem:[%s9020_s1 + $0x240] ss:$8 sps:$4 sm:$0xff]   ;;  %v748_v61 = vpack.c.bf16 %v321_v55, %v314_v54  ;;  %v756_v63 = vpack.c.bf16 %v336_v57, %v329_v56  ;;  %p6427_p13 = pneg %p6426_p12 }
  0x29   : > { %v6022_v62 = vld [vmem:[%s9020_s1 + $0x254] ss:$8 sps:$4 sm:$0xff]   ;;  %v328_v0 = vld [vmem:[%s6617_s9 + $0x160] sm:$0xff]  ;;  %v6020_v4 = vld [vmem:[%s9020_s1 + $0x250] ss:$8 sps:$4 sm:$0xff]  }
  0x2a   : > { %v335_v1 = vld [vmem:[%s6617_s9 + $0x198] sm:$0xff]  ;;  %v350_v3 = vld [vmem:[%s6617_s9 + $0x210] sm:$0xff]  ;;  %v6025_v5 = vld [vmem:[%s9020_s1 + $0x264] ss:$8 sps:$4 sm:$0xff]   ;;  %p6434_p3 = pnand %p6433_p2, %p6427_p13 }
  0x2b   : > { %2017 = vmatpush1.bf16.msra.mxu0 %v5974_v11  ;;  %v343_v2 = vld [vmem:[%s6617_s9 + $0x1d8] sm:$0xff]  ;;  %v6023_v6 = vld [vmem:[%s9020_s1 + $0x260] ss:$8 sps:$4 sm:$0xff]   ;;  %v755_v7 = vpack.c.bf16 %v335_v1, %v328_v0  ;;  %v342_v10 = vld [vmem:[%s6617_s9 + $0x1d0] sm:$0xff] }
  0x2c   : > { %2018 = vmatprep.subr.bf16.mxu0 %v5975_v12  ;;  %v6028_v8 = vld [vmem:[%s9020_s1 + $0x274] ss:$8 sps:$4 sm:$0xff]   ;;  %v763_v9 = vpack.c.bf16 %v350_v3, %v343_v2  ;;  %v349_v11 = vld [vmem:[%s6617_s9 + $0x208] sm:$0xff]  ;;  %v364_v13 = vld [vmem:[%s6617_s9 + $0x280] sm:$0xff] }
  0x2d   : > { %v357_v12 = vld [vmem:[%s6617_s9 + $0x248] sm:$0xff]  ;;  %v6026_v14 = vld [vmem:[%s9020_s1 + $0x270] ss:$8 sps:$4 sm:$0xff]   ;;  %v6040_v36 = vld [vmem:[%s9020_s1 + $0x2b4] ss:$8 sps:$4 sm:$0xff]  }
  0x2e   : > { %v6031_v15 = vld [vmem:[%s9020_s1 + $0x284] ss:$8 sps:$4 sm:$0xff]   ;;  %v6038_v35 = vld [vmem:[%s9020_s1 + $0x2b0] ss:$8 sps:$4 sm:$0xff]   ;;  %v6046_v0 = vld [vmem:[%s9020_s1 + $0x2d4] ss:$8 sps:$4 sm:$0xff]  }
  0x2f   : > { %2019 = vmatpush1.bf16.msra.mxu0 %v5977_v16  ;;  %v6029_v16 = vld [vmem:[%s9020_s1 + $0x280] ss:$8 sps:$4 sm:$0xff]   ;;  %v391_v38 = vld [vmem:[%s6617_s9 + $0x358] sm:$0xff]  ;;  %v434_v54 = vld [vmem:[%s6617_s9 + $0x4b0] sm:$0xff] }
  0x30   : > { %2020 = vmatprep.subr.bf16.mxu0 %v5978_v17  ;;  %v762_v17 = vpack.c.bf16 %v349_v11, %v342_v10  ;;  %v399_v39 = vld [vmem:[%s6617_s9 + $0x398] sm:$0xff]  ;;  %v405_v44 = vld [vmem:[%s6617_s9 + $0x3c8] sm:$0xff]  ;;  %v420_v46 = vld [vmem:[%s6617_s9 + $0x440] sm:$0xff] }
  0x31   : > { %v413_v45 = vld [vmem:[%s6617_s9 + $0x408] sm:$0xff]  ;;  %v426_v57 = vld [vmem:[%s6617_s9 + $0x470] sm:$0xff]  ;;  %v440_v1 = vld [vmem:[%s6617_s9 + $0x4e0] sm:$0xff] }
  0x32   : > { %v447_v2 = vld [vmem:[%s6617_s9 + $0x518] sm:$0xff]  ;;  %v476_v10 = vld [vmem:[%s6617_s9 + $0x600] sm:$0xff] }
  0x33   : > { %2021 = vmatpush1.bf16.msra.mxu0 %v5980_v18  ;;  %v6034_v18 = vld [vmem:[%s9020_s1 + $0x294] ss:$8 sps:$4 sm:$0xff]  }
  0x34   : > { %2022 = vmatprep.subr.bf16.mxu0 %v5981_v19  ;;  %v770_v19 = vpack.c.bf16 %v364_v13, %v357_v12  ;;  %v455_v3 = vld [vmem:[%s6617_s9 + $0x558] sm:$0xff]  ;;  %v6047_v13 = vld [vmem:[%s9020_s1 + $0x2e0] ss:$8 sps:$4 sm:$0xff]  }
  0x37   : > { %2023 = vmatpush1.bf16.msra.mxu0 %v5983_v20  ;;  %v356_v20 = vld [vmem:[%s6617_s9 + $0x240] sm:$0xff] }
  0x38   : > { %2024 = vmatprep.subr.bf16.mxu0 %v5984_v21  ;;  %v363_v21 = vld [vmem:[%s6617_s9 + $0x278] sm:$0xff] }
  0x3b   : > { %2025 = vmatpush1.bf16.msra.mxu0 %v5986_v22  ;;  %v371_v22 = vld [vmem:[%s6617_s9 + $0x2b8] sm:$0xff] }
  0x3c   : > { %2026 = vmatprep.subr.bf16.mxu0 %v5987_v23  ;;  %v378_v23 = vld [vmem:[%s6617_s9 + $0x2f0] sm:$0xff] }
  0x3f   : > { %2027 = vmatpush1.bf16.msra.mxu0 %v5989_v24  ;;  %v6032_v24 = vld [vmem:[%s9020_s1 + $0x290] ss:$8 sps:$4 sm:$0xff]  }
  0x40   : > { %2028 = vmatprep.subr.bf16.mxu0 %v5990_v25  ;;  %v6037_v25 = vld [vmem:[%s9020_s1 + $0x2a4] ss:$8 sps:$4 sm:$0xff]  }
  0x43   : > { %2029 = vmatpush1.bf16.msra.mxu0 %v5992_v26  ;;  %v769_v26 = vpack.c.bf16 %v363_v21, %v356_v20  ;;  %v482_v21 = vld [vmem:[%s6617_s9 + $0x630] sm:$0xff] }
  0x44   : > { %2030 = vmatprep.subr.bf16.mxu0 %v5993_v27  ;;  %v777_v27 = vpack.c.bf16 %v378_v23, %v371_v22  ;;  %v489_v22 = vld [vmem:[%s6617_s9 + $0x668] sm:$0xff] }
  0x45   : > { %v497_v23 = vld [vmem:[%s6617_s9 + $0x6a8] sm:$0xff] }
  0x47   : > { %2031 = vmatpush1.bf16.msra.mxu0 %v5995_v28  ;;  %v6035_v28 = vld [vmem:[%s9020_s1 + $0x2a0] ss:$8 sps:$4 sm:$0xff]  }
  0x48   : > { %2032 = vmatprep.subr.bf16.mxu0 %v5996_v29  ;;  %v370_v29 = vld [vmem:[%s6617_s9 + $0x2b0] sm:$0xff] }
  0x4b   : > { %2033 = vmatpush1.bf16.msra.mxu0 %v5998_v30  ;;  %v377_v30 = vld [vmem:[%s6617_s9 + $0x2e8] sm:$0xff] }
  0x4c   : > { %2034 = vmatprep.subr.bf16.mxu0 %v5999_v31  ;;  %v385_v31 = vld [vmem:[%s6617_s9 + $0x328] sm:$0xff] }
  0x4f   : > { %2035 = vmatpush1.bf16.msra.mxu0 %v6001_v32  ;;  %v392_v32 = vld [vmem:[%s6617_s9 + $0x360] sm:$0xff] }
  0x50   : > { %2036 = vmatprep.subr.bf16.mxu0 %v6002_v33  ;;  %v776_v33 = vpack.c.bf16 %v377_v30, %v370_v29  ;;  %v496_v29 = vld [vmem:[%s6617_s9 + $0x6a0] sm:$0xff]  ;;  %v503_v30 = vld [vmem:[%s6617_s9 + $0x6d8] sm:$0xff] }
  0x53   : > { %2037 = vmatpush1.bf16.msra.mxu0 %v6004_v34  ;;  %v784_v34 = vpack.c.bf16 %v392_v32, %v385_v31  ;;  %v511_v31 = vld [vmem:[%s6617_s9 + $0x718] sm:$0xff]  ;;  %v518_v32 = vld [vmem:[%s6617_s9 + $0x750] sm:$0xff] }
  0x54   : > { %2359 = vmatprep.subr.bf16.mxu0 %v6007_v37  ;;  %v384_v37 = vld [vmem:[%s6617_s9 + $0x320] sm:$0xff] }
  0x56   : > { %2039 = vmatmul.mubr.bf16.vlgmr.msra.gmra.mrb[0].mxu0 %v734_v41  ;;  %v783_v41 = vpack.c.bf16 %v391_v38, %v384_v37  ;;  %v525_v37 = vld [vmem:[%s6617_s9 + $0x788] sm:$0xff]  ;;  %v532_v38 = vld [vmem:[%s6617_s9 + $0x7c0] sm:$0xff] }
  0x57   : > { %2360 = vmatpush1.bf16.msra.mxu0 %v6005_v40  ;;  %2048 = vmatprep.mubr.bf16.mxu0 %v742_v43  ;;  %v406_v40 = vld [vmem:[%s6617_s9 + $0x3d0] sm:$0xff] }
  0x58   : > { %2361 = vmatprep.subr.bf16.mxu0 %v6010_v42  ;;  %v791_v42 = vpack.c.bf16 %v406_v40, %v399_v39  ;;  %v398_v43 = vld [vmem:[%s6617_s9 + $0x390] sm:$0xff]  ;;  %v854_v40 = vpack.c.bf16 %v532_v38, %v525_v37  ;;  %v664_v38 = vld [vmem:[%s6617_s9 + $0xbe0] sm:$0xff] }
  0x59   : > { %v790_v47 = vpack.c.bf16 %v405_v44, %v398_v43  ;;  %v531_v43 = vld [vmem:[%s6617_s9 + $0x7b8] sm:$0xff] }
  0x5a   : > { %v539_v44 = vld [vmem:[%s6617_s9 + $0x7f8] sm:$0xff] }
  0x5b   : > { %2362 = vmatpush1.bf16.msra.mxu0 %v6008_v48  ;;  %v798_v48 = vpack.c.bf16 %v420_v46, %v413_v45  ;;  %v546_v45 = vld [vmem:[%s6617_s9 + $0x830] sm:$0xff] }
  0x5c   : > { %2363 = vmatprep.subr.bf16.mxu0 %v6013_v49  ;;  %v6041_v49 = vld [vmem:[%s9020_s1 + $0x2c0] ss:$8 sps:$4 sm:$0xff]  }
  0x5e   : > { %2049 = vmatmul.mubr.bf16.gmra.mrb[4].mxu0 %v741_v51  ;;  %v412_v51 = vld [vmem:[%s6617_s9 + $0x400] sm:$0xff] }
  0x5f   : > { %2058 = vmatprep.mubr.bf16.mxu0 %v749_v53  ;;  %2364 = vmatpush1.bf16.msra.mxu0 %v6011_v50  ;;  %v6043_v50 = vld [vmem:[%s9020_s1 + $0x2c4] ss:$8 sps:$4 sm:$0xff]   ;;  %v427_v53 = vld [vmem:[%s6617_s9 + $0x478] sm:$0xff] }
  0x60   : > { %2365 = vmatprep.subr.bf16.mxu0 %v6016_v52  ;;  %v419_v52 = vld [vmem:[%s6617_s9 + $0x438] sm:$0xff]  ;;  %v805_v56 = vpack.c.bf16 %v434_v54, %v427_v53  ;;  %v552_v54 = vld [vmem:[%s6617_s9 + $0x860] sm:$0xff] }
  0x61   : > { %v797_v55 = vpack.c.bf16 %v419_v52, %v412_v51  ;;  %v560_v51 = vld [vmem:[%s6617_s9 + $0x8a0] sm:$0xff] }
  0x63   : > { %2366 = vmatpush1.bf16.msra.mxu0 %v6014_v58  ;;  %v433_v58 = vld [vmem:[%s6617_s9 + $0x4a8] sm:$0xff] }
  0x64   : > { %2367 = vmatprep.subr.bf16.mxu0 %v6019_v59  ;;  %v441_v59 = vld [vmem:[%s6617_s9 + $0x4e8] sm:$0xff] }
  0x66   : > { %2059 = vmatmul.mubr.bf16.gmra.mrb[8].mxu0 %v748_v61  ;;  %v804_v61 = vpack.c.bf16 %v433_v58, %v426_v57  ;;  %v574_v57 = vld [vmem:[%s6617_s9 + $0x910] sm:$0xff] }
  0x67   : > { %2068 = vmatprep.mubr.bf16.mxu0 %v756_v63  ;;  %2368 = vmatpush1.bf16.msra.mxu0 %v6017_v60  ;;  %v448_v60 = vld [vmem:[%s6617_s9 + $0x520] sm:$0xff]  ;;  %v6044_v63 = vld [vmem:[%s9020_s1 + $0x2d0] ss:$8 sps:$4 sm:$0xff]  }
  0x68   : > { %2369 = vmatprep.subr.bf16.mxu0 %v6022_v62  ;;  %v812_v62 = vpack.c.bf16 %v448_v60, %v441_v59  ;;  %v566_v60 = vld [vmem:[%s6617_s9 + $0x8d0] sm:$0xff] }
  0x6b   : > { %2370 = vmatpush1.bf16.msra.mxu0 %v6020_v4  ;;  %v462_v4 = vld [vmem:[%s6617_s9 + $0x590] sm:$0xff] }
  0x6c   : > { %2371 = vmatprep.subr.bf16.mxu0 %v6025_v5  ;;  %v811_v5 = vpack.c.bf16 %v447_v2, %v440_v1  ;;  %v580_v2 = vld [vmem:[%s6617_s9 + $0x940] sm:$0xff] }
  0x6e   : > { %2069 = vmatmul.mubr.bf16.gmra.mrb[12].mxu0 %v755_v7  ;;  %v454_v7 = vld [vmem:[%s6617_s9 + $0x550] sm:$0xff] }
  0x6f   : > { %2078 = vmatprep.mubr.bf16.mxu0 %v763_v9  ;;  %2372 = vmatpush1.bf16.msra.mxu0 %v6023_v6  ;;  %v819_v6 = vpack.c.bf16 %v462_v4, %v455_v3  ;;  %v469_v9 = vld [vmem:[%s6617_s9 + $0x5c8] sm:$0xff]  ;;  %v587_v3 = vld [vmem:[%s6617_s9 + $0x978] sm:$0xff] }
  0x70   : > { %2373 = vmatprep.subr.bf16.mxu0 %v6028_v8  ;;  %v461_v8 = vld [vmem:[%s6617_s9 + $0x588] sm:$0xff]  ;;  %v826_v12 = vpack.c.bf16 %v476_v10, %v469_v9  ;;  %v595_v4 = vld [vmem:[%s6617_s9 + $0x9b8] sm:$0xff] }
  0x71   : > { %v818_v11 = vpack.c.bf16 %v461_v8, %v454_v7  ;;  %v594_v8 = vld [vmem:[%s6617_s9 + $0x9b0] sm:$0xff]  ;;  %v601_v9 = vld [vmem:[%s6617_s9 + $0x9e8] sm:$0xff] }
  0x72   : > { %v609_v10 = vld [vmem:[%s6617_s9 + $0xa28] sm:$0xff] }
  0x73   : > { %2374 = vmatpush1.bf16.msra.mxu0 %v6026_v14  ;;  %v6049_v14 = vld [vmem:[%s9020_s1 + $0x2e4] ss:$8 sps:$4 sm:$0xff]  }
  0x74   : > { %2375 = vmatprep.subr.bf16.mxu0 %v6031_v15  ;;  %v468_v15 = vld [vmem:[%s6617_s9 + $0x5c0] sm:$0xff] }
  0x76   : > { %2079 = vmatmul.mubr.bf16.gmra.mrb[16].mxu0 %v762_v17  ;;  %v483_v17 = vld [vmem:[%s6617_s9 + $0x638] sm:$0xff] }
  0x77   : > { %2088 = vmatprep.mubr.bf16.mxu0 %v770_v19  ;;  %2376 = vmatpush1.bf16.msra.mxu0 %v6029_v16  ;;  %v475_v16 = vld [vmem:[%s6617_s9 + $0x5f8] sm:$0xff] }
  0x78   : > { %2377 = vmatprep.subr.bf16.mxu0 %v6034_v18  ;;  %v490_v18 = vld [vmem:[%s6617_s9 + $0x670] sm:$0xff]  ;;  %v825_v19 = vpack.c.bf16 %v475_v16, %v468_v15  ;;  %v615_v15 = vld [vmem:[%s6617_s9 + $0xa58] sm:$0xff] }
  0x79   : > { %v833_v20 = vpack.c.bf16 %v490_v18, %v483_v17  ;;  %v623_v16 = vld [vmem:[%s6617_s9 + $0xa98] sm:$0xff]  ;;  %v630_v17 = vld [vmem:[%s6617_s9 + $0xad0] sm:$0xff] }
  0x7b   : > { %2378 = vmatpush1.bf16.msra.mxu0 %v6032_v24  ;;  %v504_v24 = vld [vmem:[%s6617_s9 + $0x6e0] sm:$0xff] }
  0x7c   : > { %2379 = vmatprep.subr.bf16.mxu0 %v6037_v25  ;;  %v832_v25 = vpack.c.bf16 %v489_v22, %v482_v21  ;;  %v629_v21 = vld [vmem:[%s6617_s9 + $0xac8] sm:$0xff] }
  0x7d   : > { %v637_v22 = vld [vmem:[%s6617_s9 + $0xb08] sm:$0xff] }
  0x7e   : > { %2089 = vmatmul.mubr.bf16.gmra.mrb[20].mxu0 %v769_v26  ;;  %v840_v26 = vpack.c.bf16 %v504_v24, %v497_v23  ;;  %v644_v23 = vld [vmem:[%s6617_s9 + $0xb40] sm:$0xff] }
  0x7f   : > { %2098 = vmatprep.mubr.bf16.mxu0 %v777_v27  ;;  %2380 = vmatpush1.bf16.msra.mxu0 %v6035_v28  ;;  %v6050_v27 = vld [vmem:[%s9020_s1 + $0x2f0] ss:$8 sps:$4 sm:$0xff]   ;;  %v6052_v28 = vld [vmem:[%s9020_s1 + $0x2f4] ss:$8 sps:$4 sm:$0xff]  }
  0x80   : > { %2381 = vmatprep.subr.bf16.mxu0 %v6040_v36  ;;  %v517_v36 = vld [vmem:[%s6617_s9 + $0x748] sm:$0xff] }
  0x83   : > { %2382 = vmatpush1.bf16.msra.mxu0 %v6038_v35  ;;  %v510_v35 = vld [vmem:[%s6617_s9 + $0x710] sm:$0xff] }
  0x84   : > { %2383 = vmatprep.subr.bf16.mxu0 %v6043_v50  ;;  %v846_v39 = vpack.c.bf16 %v517_v36, %v510_v35  ;;  %v553_v50 = vld [vmem:[%s6617_s9 + $0x868] sm:$0xff]  ;;  %v672_v35 = vld [vmem:[%s6617_s9 + $0xc20] sm:$0xff] }
  0x85   : > { %v868_v53 = vpack.c.bf16 %v560_v51, %v553_v50  ;;  %v692_v50 = vld [vmem:[%s6617_s9 + $0xcc0] sm:$0xff]  ;;  %v699_v51 = vld [vmem:[%s6617_s9 + $0xcf8] sm:$0xff] }
  0x86   : > { %2099 = vmatmul.mubr.bf16.gmra.mrb[24].mxu0 %v776_v33  ;;  %v839_v33 = vpack.c.bf16 %v503_v30, %v496_v29  ;;  %v658_v29 = vld [vmem:[%s6617_s9 + $0xbb0] sm:$0xff] }
  0x87   : > { %2108 = vmatprep.mubr.bf16.mxu0 %v784_v34  ;;  %2384 = vmatpush1.bf16.msra.mxu0 %v6041_v49  ;;  %v847_v34 = vpack.c.bf16 %v518_v32, %v511_v31  ;;  %v545_v49 = vld [vmem:[%s6617_s9 + $0x828] sm:$0xff]  ;;  %v650_v32 = vld [vmem:[%s6617_s9 + $0xb70] sm:$0xff] }
  0x88   : > { %2385 = vmatprep.subr.bf16.mxu0 %v6046_v0 }
  0x8b   : > { %2386 = vmatpush1.bf16.msra.mxu0 %v6044_v63  ;;  %v588_v63 = vld [vmem:[%s6617_s9 + $0x980] sm:$0xff] }
  0x8c   : > { %2387 = vmatprep.subr.bf16.mxu0 %v6049_v14  ;;  %v608_v14 = vld [vmem:[%s6617_s9 + $0xa20] sm:$0xff] }
  0x8d   : > { %v895_v18 = vpack.c.bf16 %v615_v15, %v608_v14  ;;  %v324_v14 = vld [vmem:[%s6617_s9 + $0x140] sm:$0xff] }
  0x8e   : > { %2109 = vmatmul.mubr.bf16.gmra.mrb[28].mxu0 %v783_v41  ;;  %v6055_v41 = vld [vmem:[%s9020_s1 + $0x304] ss:$8 sps:$4 sm:$0xff]  }
  0x8f   : > { %2118 = vmatprep.mubr.bf16.mxu0 %v791_v42  ;;  %2388 = vmatpush1.bf16.msra.mxu0 %v6047_v13  ;;  %v524_v42 = vld [vmem:[%s6617_s9 + $0x780] sm:$0xff] }
  0x90   : > { %2389 = vmatprep.subr.bf16.mxu0 %v6052_v28  ;;  %v853_v46 = vpack.c.bf16 %v531_v43, %v524_v42  ;;  %v651_v28 = vld [vmem:[%s6617_s9 + $0xb78] sm:$0xff] }
  0x91   : > { %v917_v31 = vpack.c.bf16 %v658_v29, %v651_v28  ;;  %v6056_v29 = vld [vmem:[%s9020_s1 + $0x4] ss:$8 sps:$4 sm:$0xff]  }
  0x92   : > { %1653 = vmatprep.subr.bf16.mxu1 %v6056_v29  ;;  %v6095_v29 = vld [vmem:[%s9020_s1 + $0xd4] ss:$8 sps:$4 sm:$0xff]  }
  0x93   : > { %2390 = vmatpush1.bf16.msra.mxu0 %v6050_v27  ;;  %v643_v27 = vld [vmem:[%s6617_s9 + $0xb38] sm:$0xff] }
  0x94   : > { %2712 = vmatprep.subr.bf16.mxu0 %v6055_v41  ;;  %v686_v41 = vld [vmem:[%s6617_s9 + $0xc90] sm:$0xff] }
  0x96   : > { %2119 = vmatmul.mubr.bf16.gmra.mrb[32].mxu0 %v790_v47  ;;  %v861_v47 = vpack.c.bf16 %v546_v45, %v539_v44  ;;  %v678_v44 = vld [vmem:[%s6617_s9 + $0xc50] sm:$0xff]  ;;  %v685_v45 = vld [vmem:[%s6617_s9 + $0xc88] sm:$0xff] }
  0x97   : > { %2128 = vmatprep.mubr.bf16.mxu0 %v798_v48  ;;  %v538_v48 = vld [vmem:[%s6617_s9 + $0x7f0] sm:$0xff] }
  0x98   : > { %v860_v52 = vpack.c.bf16 %v545_v49, %v538_v48  ;;  %v930_v48 = vpack.c.bf16 %v685_v45, %v678_v44  ;;  %v373_v44 = vld [vmem:[%s6617_s9 + $0x2c8] sm:$0xff]  ;;  %v380_v45 = vld [vmem:[%s6617_s9 + $0x300] sm:$0xff] }
  0x9e   : > { %2129 = vmatmul.mubr.bf16.gmra.mrb[36].mxu0 %v797_v55  ;;  %v559_v55 = vld [vmem:[%s6617_s9 + $0x898] sm:$0xff] }
  0x9f   : > { %2138 = vmatprep.mubr.bf16.mxu0 %v805_v56  ;;  %v567_v56 = vld [vmem:[%s6617_s9 + $0x8d8] sm:$0xff]  ;;  %v867_v58 = vpack.c.bf16 %v559_v55, %v552_v54  ;;  %v937_v54 = vpack.c.bf16 %v699_v51, %v692_v50  ;;  %v6070_v50 = vld [vmem:[%s9020_s1 + $0x40] ss:$8 sps:$4 sm:$0xff]  }
  0xa0   : > { %v875_v59 = vpack.c.bf16 %v574_v57, %v567_v56  ;;  %v706_v56 = vld [vmem:[%s6617_s9 + $0xd30] sm:$0xff]  ;;  %v713_v57 = vld [vmem:[%s6617_s9 + $0xd68] sm:$0xff]  ;;  %v372_v51 = vld [vmem:[%s6617_s9 + $0x2c0] sm:$0xff] }
  0xa6   : > { %2139 = vmatmul.mubr.bf16.gmra.mrb[40].mxu0 %v804_v61  ;;  %v573_v61 = vld [vmem:[%s6617_s9 + $0x908] sm:$0xff] }
  0xa7   : > { %2148 = vmatprep.mubr.bf16.mxu0 %v812_v62  ;;  %v581_v62 = vld [vmem:[%s6617_s9 + $0x948] sm:$0xff]  ;;  %v874_v0 = vpack.c.bf16 %v573_v61, %v566_v60  ;;  %v944_v60 = vpack.c.bf16 %v713_v57, %v706_v56 }
  0xa8   : > { %v882_v1 = vpack.c.bf16 %v588_v63, %v581_v62  ;;  %v720_v62 = vld [vmem:[%s6617_s9 + $0xda0] sm:$0xff]  ;;  %v727_v63 = vld [vmem:[%s6617_s9 + $0xdd8] sm:$0xff] }
  0xae   : > { %2149 = vmatmul.mubr.bf16.gmra.mrb[44].mxu0 %v811_v5  ;;  %v602_v5 = vld [vmem:[%s6617_s9 + $0x9f0] sm:$0xff] }
  0xaf   : > { %2158 = vmatprep.mubr.bf16.mxu0 %v819_v6  ;;  %v881_v6 = vpack.c.bf16 %v587_v3, %v580_v2  ;;  %v889_v7 = vpack.c.bf16 %v602_v5, %v595_v4  ;;  %v951_v2 = vpack.c.bf16 %v727_v63, %v720_v62  ;;  %v288_v4 = vld [vmem:[%s6617_s9 + $0x20] sm:$0xff]  ;;  %v295_v5 = vld [vmem:[%s6617_s9 + $0x58] sm:$0xff]  ;;  %v393_v62 = vld [vmem:[%s6617_s9 + $0x368] sm:$0xff] }
  0xb0   : > { %v6077_v63 = vld [vmem:[%s9020_s1 + $0x74] ss:$8 sps:$4 sm:$0xff]  }
  0xb6   : > { %2159 = vmatmul.mubr.bf16.gmra.mrb[48].mxu0 %v818_v11  ;;  %v616_v11 = vld [vmem:[%s6617_s9 + $0xa60] sm:$0xff] }
  0xb7   : > { %2168 = vmatprep.mubr.bf16.mxu0 %v826_v12  ;;  %v888_v12 = vpack.c.bf16 %v601_v9, %v594_v8  ;;  %v896_v13 = vpack.c.bf16 %v616_v11, %v609_v10  ;;  %v736_v8 = vpack.c.bf16 %v295_v5, %v288_v4  ;;  %v6053_v9 = vld [vmem:[%s9020_s1 + $0x300] ss:$8 sps:$4 sm:$0xff]   ;;  %v302_v11 = vld [vmem:[%s6617_s9 + $0x90] sm:$0xff]  ;;  %v6080_v5 = vld [vmem:[%s9020_s1 + $0x84] ss:$8 sps:$4 sm:$0xff]  }
  0xb8   : > { %v6079_v4 = vld [vmem:[%s9020_s1 + $0x70] ss:$8 sps:$4 sm:$0xff]  }
  0xbe   : > { %2169 = vmatmul.mubr.bf16.gmra.mrb[52].mxu0 %v825_v19  ;;  %v903_v19 = vpack.c.bf16 %v630_v17, %v623_v16  ;;  %v316_v17 = vld [vmem:[%s6617_s9 + $0x100] sm:$0xff] }
  0xbf   : > { %2178 = vmatprep.mubr.bf16.mxu0 %v833_v20  ;;  %v622_v20 = vld [vmem:[%s6617_s9 + $0xa90] sm:$0xff] }
  0xc0   : > { %v902_v24 = vpack.c.bf16 %v629_v21, %v622_v20  ;;  %v338_v20 = vld [vmem:[%s6617_s9 + $0x1b0] sm:$0xff] }
  0xc6   : > { %2179 = vmatmul.mubr.bf16.gmra.mrb[56].mxu0 %v832_v25  ;;  %v910_v25 = vpack.c.bf16 %v644_v23, %v637_v22  ;;  %v330_v23 = vld [vmem:[%s6617_s9 + $0x170] sm:$0xff] }
  0xc7   : > { %2188 = vmatprep.mubr.bf16.mxu0 %v840_v26  ;;  %v636_v26 = vld [vmem:[%s6617_s9 + $0xb00] sm:$0xff] }
  0xc8   : > { %v909_v30 = vpack.c.bf16 %v643_v27, %v636_v26  ;;  %v352_v26 = vld [vmem:[%s6617_s9 + $0x220] sm:$0xff] }
  0xce   : > { %2189 = vmatmul.mubr.bf16.gmra.mrb[60].mxu0 %v839_v33  ;;  %v657_v33 = vld [vmem:[%s6617_s9 + $0xba8] sm:$0xff] }
  0xcf   : > { %2198 = vmatprep.mubr.bf16.mxu0 %v847_v34  ;;  %v665_v34 = vld [vmem:[%s6617_s9 + $0xbe8] sm:$0xff]  ;;  %v916_v36 = vpack.c.bf16 %v657_v33, %v650_v32  ;;  %v351_v32 = vld [vmem:[%s6617_s9 + $0x218] sm:$0xff] }
  0xd0   : > { %v924_v37 = vpack.c.bf16 %v672_v35, %v665_v34  ;;  %v6059_v33 = vld [vmem:[%s9020_s1 + $0x14] ss:$8 sps:$4 sm:$0xff]  }
  0xd1   : > { %v359_v34 = vld [vmem:[%s6617_s9 + $0x258] sm:$0xff]  ;;  %v366_v35 = vld [vmem:[%s6617_s9 + $0x290] sm:$0xff] }
  0xd6   : > { %2199 = vmatmul.mubr.bf16.gmra.mrb[64].mxu0 %v846_v39  ;;  %v671_v39 = vld [vmem:[%s6617_s9 + $0xc18] sm:$0xff] }
  0xd7   : > { %2208 = vmatprep.mubr.bf16.mxu0 %v854_v40  ;;  %v679_v40 = vld [vmem:[%s6617_s9 + $0xc58] sm:$0xff]  ;;  %v923_v42 = vpack.c.bf16 %v671_v39, %v664_v38  ;;  %v6062_v39 = vld [vmem:[%s9020_s1 + $0x24] ss:$8 sps:$4 sm:$0xff]  }
  0xd8   : > { %v931_v43 = vpack.c.bf16 %v686_v41, %v679_v40  ;;  %v6061_v38 = vld [vmem:[%s9020_s1 + $0x10] ss:$8 sps:$4 sm:$0xff]   ;;  %v6064_v40 = vld [vmem:[%s9020_s1 + $0x20] ss:$8 sps:$4 sm:$0xff]  }
  0xd9   : > { %v358_v41 = vld [vmem:[%s6617_s9 + $0x250] sm:$0xff] }
  0xde   : > { %2209 = vmatmul.mubr.bf16.gmra.mrb[68].mxu0 %v853_v46  ;;  %v693_v46 = vld [vmem:[%s6617_s9 + $0xcc8] sm:$0xff] }
  0xdf   : > { %2218 = vmatprep.mubr.bf16.mxu0 %v861_v47  ;;  %v700_v47 = vld [vmem:[%s6617_s9 + $0xd00] sm:$0xff] }
  0xe0   : > { %v938_v49 = vpack.c.bf16 %v700_v47, %v693_v46  ;;  %v779_v47 = vpack.c.bf16 %v380_v45, %v373_v44  ;;  %v6103_v44 = vld [vmem:[%s9020_s1 + $0xf0] ss:$8 sps:$4 sm:$0xff]   ;;  %v285_v45 = vld [vmem:[%s6617_s9 + $0x8] sm:$0xff] }
  0xe6   : > { %2219 = vmatmul.mubr.bf16.gmra.mrb[72].mxu0 %v860_v52  ;;  %v707_v52 = vld [vmem:[%s6617_s9 + $0xd38] sm:$0xff] }
  0xe7   : > { %2228 = vmatprep.mubr.bf16.mxu0 %v868_v53  ;;  %v714_v53 = vld [vmem:[%s6617_s9 + $0xd70] sm:$0xff] }
  0xe8   : > { %v945_v55 = vpack.c.bf16 %v714_v53, %v707_v52  ;;  %v379_v52 = vld [vmem:[%s6617_s9 + $0x2f8] sm:$0xff] }
  0xe9   : > { %v6071_v53 = vld [vmem:[%s9020_s1 + $0x54] ss:$8 sps:$4 sm:$0xff]   ;;  %v778_v56 = vpack.c.bf16 %v379_v52, %v372_v51  ;;  %v456_v51 = vld [vmem:[%s6617_s9 + $0x560] sm:$0xff] }
  0xea   : > { %v463_v52 = vld [vmem:[%s6617_s9 + $0x598] sm:$0xff] }
  0xee   : > { %2229 = vmatmul.mubr.bf16.gmra.mrb[76].mxu0 %v867_v58  ;;  %v721_v58 = vld [vmem:[%s6617_s9 + $0xda8] sm:$0xff] }
  0xef   : > { %2238 = vmatprep.mubr.bf16.mxu0 %v875_v59  ;;  %v728_v59 = vld [vmem:[%s6617_s9 + $0xde0] sm:$0xff] }
  0xf0   : > { %v952_v61 = vpack.c.bf16 %v728_v59, %v721_v58  ;;  %v6073_v58 = vld [vmem:[%s9020_s1 + $0x50] ss:$8 sps:$4 sm:$0xff]   ;;  %v6074_v59 = vld [vmem:[%s9020_s1 + $0x64] ss:$8 sps:$4 sm:$0xff]  }
  0xf6   : > { %2239 = vmatmul.mubr.bf16.gmra.mrb[80].mxu0 %v874_v0  ;;  %v289_v0 = vld [vmem:[%s6617_s9 + $0x28] sm:$0xff] }
  0xf7   : > { %2248 = vmatprep.mubr.bf16.mxu0 %v882_v1  ;;  %v296_v1 = vld [vmem:[%s6617_s9 + $0x60] sm:$0xff] }
  0xf8   : > { %v737_v3 = vpack.c.bf16 %v296_v1, %v289_v0  ;;  %v401_v0 = vld [vmem:[%s6617_s9 + $0x3a8] sm:$0xff]  ;;  %v408_v1 = vld [vmem:[%s6617_s9 + $0x3e0] sm:$0xff] }
  0xfe   : > { %2249 = vmatmul.mubr.bf16.gmra.mrb[84].mxu0 %v881_v6  ;;  %v303_v6 = vld [vmem:[%s6617_s9 + $0x98] sm:$0xff] }
  0xff   : > { %2258 = vmatprep.mubr.bf16.mxu0 %v889_v7  ;;  %v310_v7 = vld [vmem:[%s6617_s9 + $0xd0] sm:$0xff] }
 0x100   : > { %v744_v10 = vpack.c.bf16 %v310_v7, %v303_v6  ;;  %v6082_v6 = vld [vmem:[%s9020_s1 + $0x80] ss:$8 sps:$4 sm:$0xff]  }
 0x101   : > { %v400_v7 = vld [vmem:[%s6617_s9 + $0x3a0] sm:$0xff] }
 0x106   : > { %2259 = vmatmul.mubr.bf16.gmra.mrb[88].mxu0 %v888_v12  ;;  %v309_v12 = vld [vmem:[%s6617_s9 + $0xc8] sm:$0xff] }
 0x107   : > { %2268 = vmatprep.mubr.bf16.mxu0 %v896_v13  ;;  %v317_v13 = vld [vmem:[%s6617_s9 + $0x108] sm:$0xff]  ;;  %v743_v15 = vpack.c.bf16 %v309_v12, %v302_v11  ;;  %v422_v11 = vld [vmem:[%s6617_s9 + $0x450] sm:$0xff] }
 0x108   : > { %v751_v16 = vpack.c.bf16 %v324_v14, %v317_v13  ;;  %v6085_v14 = vld [vmem:[%s9020_s1 + $0x90] ss:$8 sps:$4 sm:$0xff]  }
 0x10e   : > { %2269 = vmatmul.mubr.bf16.gmra.mrb[92].mxu0 %v895_v18  ;;  %v323_v18 = vld [vmem:[%s6617_s9 + $0x138] sm:$0xff] }
 0x10f   : > { %2278 = vmatprep.mubr.bf16.mxu0 %v903_v19  ;;  %v331_v19 = vld [vmem:[%s6617_s9 + $0x178] sm:$0xff]  ;;  %v750_v21 = vpack.c.bf16 %v323_v18, %v316_v17  ;;  %v414_v17 = vld [vmem:[%s6617_s9 + $0x410] sm:$0xff]  ;;  %v421_v18 = vld [vmem:[%s6617_s9 + $0x448] sm:$0xff] }
 0x110   : > { %v758_v22 = vpack.c.bf16 %v338_v20, %v331_v19  ;;  %v6089_v19 = vld [vmem:[%s9020_s1 + $0xb4] ss:$8 sps:$4 sm:$0xff]   ;;  %v429_v20 = vld [vmem:[%s6617_s9 + $0x488] sm:$0xff] }
 0x116   : > { %2279 = vmatmul.mubr.bf16.gmra.mrb[96].mxu0 %v902_v24  ;;  %v337_v24 = vld [vmem:[%s6617_s9 + $0x1a8] sm:$0xff] }
 0x117   : > { %2288 = vmatprep.mubr.bf16.mxu0 %v910_v25  ;;  %v345_v25 = vld [vmem:[%s6617_s9 + $0x1e8] sm:$0xff]  ;;  %v757_v27 = vpack.c.bf16 %v337_v24, %v330_v23  ;;  %v6091_v24 = vld [vmem:[%s9020_s1 + $0xb0] ss:$8 sps:$4 sm:$0xff]  }
 0x118   : > { %v765_v28 = vpack.c.bf16 %v352_v26, %v345_v25  ;;  %v6092_v25 = vld [vmem:[%s9020_s1 + $0xc4] ss:$8 sps:$4 sm:$0xff]   ;;  %v6094_v26 = vld [vmem:[%s9020_s1 + $0xc0] ss:$8 sps:$4 sm:$0xff]  }
 0x11e   : > { %2289 = vmatmul.mubr.bf16.gmra.mrb[100].mxu0 %v909_v30  ;;  %v6058_v30 = vld [vmem:[%s9020_s1] ss:$8 sps:$4 sm:$0xff]  }
 0x11f   : > { %2298 = vmatprep.mubr.bf16.mxu0 %v917_v31  ;;  %v344_v31 = vld [vmem:[%s6617_s9 + $0x1e0] sm:$0xff]  ;;  %1654 = vmatpush1.bf16.msra.mxu1 %v6058_v30  ;;  %v443_v30 = vld [vmem:[%s6617_s9 + $0x4f8] sm:$0xff] }
 0x120   : > { %1655 = vmatprep.subr.bf16.mxu1 %v6059_v33 }
 0x123   : > { %1656 = vmatpush1.bf16.msra.mxu1 %v6061_v38  ;;  %v449_v38 = vld [vmem:[%s6617_s9 + $0x528] sm:$0xff] }
 0x124   : > { %1657 = vmatprep.subr.bf16.mxu1 %v6062_v39  ;;  %v6101_v39 = vld [vmem:[%s9020_s1 + $0xf4] ss:$8 sps:$4 sm:$0xff]  }
 0x126   : > { %2299 = vmatmul.mubr.bf16.gmra.mrb[104].mxu0 %v916_v36  ;;  %v764_v36 = vpack.c.bf16 %v351_v32, %v344_v31  ;;  %v450_v31 = vld [vmem:[%s6617_s9 + $0x530] sm:$0xff] }
 0x127   : > { %2308 = vmatprep.mubr.bf16.mxu0 %v924_v37  ;;  %v772_v37 = vpack.c.bf16 %v366_v35, %v359_v34  ;;  %1658 = vmatpush1.bf16.msra.mxu1 %v6064_v40  ;;  %v814_v33 = vpack.c.bf16 %v450_v31, %v443_v30  ;;  %v6097_v34 = vld [vmem:[%s9020_s1 + $0xd0] ss:$8 sps:$4 sm:$0xff]   ;;  %v6098_v35 = vld [vmem:[%s9020_s1 + $0xe4] ss:$8 sps:$4 sm:$0xff]  }
 0x128   : > { %v457_v40 = vld [vmem:[%s6617_s9 + $0x568] sm:$0xff]  ;;  %v520_v30 = vld [vmem:[%s6617_s9 + $0x760] sm:$0xff] }
 0x12e   : > { %2309 = vmatmul.mubr.bf16.gmra.mrb[108].mxu0 %v923_v42  ;;  %v365_v42 = vld [vmem:[%s6617_s9 + $0x288] sm:$0xff] }
 0x12f   : > { %2318 = vmatprep.mubr.bf16.mxu0 %v931_v43  ;;  %v6065_v43 = vld [vmem:[%s9020_s1 + $0x34] ss:$8 sps:$4 sm:$0xff]   ;;  %v771_v46 = vpack.c.bf16 %v365_v42, %v358_v41  ;;  %v464_v41 = vld [vmem:[%s6617_s9 + $0x5a0] sm:$0xff] }
 0x130   : > { %1659 = vmatprep.subr.bf16.mxu1 %v6065_v43  ;;  %v821_v43 = vpack.c.bf16 %v464_v41, %v457_v40  ;;  %v519_v40 = vld [vmem:[%s6617_s9 + $0x758] sm:$0xff] }
 0x136   : > { %2319 = vmatmul.mubr.bf16.gmra.mrb[112].mxu0 %v930_v48  ;;  %v6067_v48 = vld [vmem:[%s9020_s1 + $0x30] ss:$8 sps:$4 sm:$0xff]  }
 0x137   : > { %2328 = vmatprep.mubr.bf16.mxu0 %v938_v49  ;;  %1660 = vmatpush1.bf16.msra.mxu1 %v6067_v48  ;;  %v6068_v49 = vld [vmem:[%s9020_s1 + $0x44] ss:$8 sps:$4 sm:$0xff]  }
 0x138   : > { %1661 = vmatprep.subr.bf16.mxu1 %v6068_v49  ;;  %v284_v48 = vld [vmem:[%s6617_s9] sm:$0xff]  ;;  %v291_v49 = vld [vmem:[%s6617_s9 + $0x38] sm:$0xff] }
 0x13b   : > { %1662 = vmatpush1.bf16.msra.mxu1 %v6070_v50  ;;  %v6104_v50 = vld [vmem:[%s9022_s3] ss:$8 sps:$4 sm:$0xff]  }
 0x13c   : > { %1663 = vmatprep.subr.bf16.mxu1 %v6071_v53  ;;  %v732_v53 = vpack.c.bf16 %v291_v49, %v284_v48  ;;  %v362_v48 = vld [vmem:[%s6617_s9 + $0x270] sm:$0xff] }
 0x13e   : > { %2329 = vmatmul.mubr.bf16.gmra.mrb[116].mxu0 %v937_v54  ;;  %v387_v54 = vld [vmem:[%s6617_s9 + $0x338] sm:$0xff] }
 0x13f   : > { %2338 = vmatprep.mubr.bf16.mxu0 %v945_v55  ;;  %v394_v55 = vld [vmem:[%s6617_s9 + $0x370] sm:$0xff]  ;;  %1664 = vmatpush1.bf16.msra.mxu1 %v6073_v58 }
 0x140   : > { %v786_v57 = vpack.c.bf16 %v394_v55, %v387_v54  ;;  %1665 = vmatprep.subr.bf16.mxu1 %v6074_v59  ;;  %v6106_v54 = vld [vmem:[%s9022_s3 + $0x4] ss:$8 sps:$4 sm:$0xff]   ;;  %v471_v55 = vld [vmem:[%s6617_s9 + $0x5d8] sm:$0xff] }
 0x141   : > { %v299_v59 = vld [vmem:[%s6617_s9 + $0x78] sm:$0xff] }
 0x146   : > { %2339 = vmatmul.mubr.bf16.gmra.mrb[120].mxu0 %v944_v60  ;;  %v6076_v60 = vld [vmem:[%s9020_s1 + $0x60] ss:$8 sps:$4 sm:$0xff]  }
 0x147   : > { %2348 = vmatprep.mubr.bf16.mxu0 %v952_v61  ;;  %v386_v61 = vld [vmem:[%s6617_s9 + $0x330] sm:$0xff]  ;;  %1666 = vmatpush1.bf16.msra.mxu1 %v6076_v60 }
 0x148   : > { %1667 = vmatprep.subr.bf16.mxu1 %v6077_v63  ;;  %v306_v60 = vld [vmem:[%s6617_s9 + $0xb0] sm:$0xff]  ;;  %v305_v63 = vld [vmem:[%s6617_s9 + $0xa8] sm:$0xff] }
 0x14b   : > { %1668 = vmatpush1.bf16.msra.mxu1 %v6079_v4  ;;  %v492_v4 = vld [vmem:[%s6617_s9 + $0x680] sm:$0xff] }
 0x14c   : > { %1669 = vmatprep.subr.bf16.mxu1 %v6080_v5 }
 0x14e   : > { %2349 = vmatmul.mubr.bf16.gmra.mrb[124].mxu0 %v951_v2  ;;  %v785_v2 = vpack.c.bf16 %v393_v62, %v386_v61  ;;  %v740_v61 = vpack.c.bf16 %v306_v60, %v299_v59  ;;  %v298_v62 = vld [vmem:[%s6617_s9 + $0x70] sm:$0xff]  ;;  %v369_v59 = vld [vmem:[%s6617_s9 + $0x2a8] sm:$0xff]  ;;  %v376_v60 = vld [vmem:[%s6617_s9 + $0x2e0] sm:$0xff] }
 0x14f   : > { %2391 = vmatprep.mubr.bf16.mxu0 %v737_v3  ;;  %v793_v3 = vpack.c.bf16 %v408_v1, %v401_v0  ;;  %1670 = vmatpush1.bf16.msra.mxu1 %v6082_v6  ;;  %v470_v0 = vld [vmem:[%s6617_s9 + $0x5d0] sm:$0xff]  ;;  %v477_v1 = vld [vmem:[%s6617_s9 + $0x608] sm:$0xff] }
 0x150   : > { %v827_v5 = vpack.c.bf16 %v477_v1, %v470_v0  ;;  %v6113_v0 = vld [vmem:[%s9022_s3 + $0x30] ss:$8 sps:$4 sm:$0xff]   ;;  %v540_v1 = vld [vmem:[%s6617_s9 + $0x800] sm:$0xff] }
 0x156   : > { %2392 = vmatmul.mubr.bf16.vlgmr.msra.gmra.mrb[0].mxu0 %v736_v8  ;;  %v407_v8 = vld [vmem:[%s6617_s9 + $0x3d8] sm:$0xff] }
 0x157   : > { %2713 = vmatpush1.bf16.msra.mxu0 %v6053_v9  ;;  %2401 = vmatprep.mubr.bf16.mxu0 %v744_v10  ;;  %v6083_v9 = vld [vmem:[%s9020_s1 + $0x94] ss:$8 sps:$4 sm:$0xff]   ;;  %v792_v12 = vpack.c.bf16 %v407_v8, %v400_v7  ;;  %v313_v7 = vld [vmem:[%s6617_s9 + $0xe8] sm:$0xff]  ;;  %v320_v8 = vld [vmem:[%s6617_s9 + $0x120] sm:$0xff] }
 0x158   : > { %v415_v10 = vld [vmem:[%s6617_s9 + $0x418] sm:$0xff]  ;;  %1671 = vmatprep.subr.bf16.mxu1 %v6083_v9  ;;  %v747_v9 = vpack.c.bf16 %v320_v8, %v313_v7 }
 0x159   : > { %v800_v13 = vpack.c.bf16 %v422_v11, %v415_v10  ;;  %1672 = vmatpush1.bf16.msra.mxu1 %v6085_v14  ;;  %v312_v10 = vld [vmem:[%s6617_s9 + $0xe0] sm:$0xff]  ;;  %v319_v11 = vld [vmem:[%s6617_s9 + $0x118] sm:$0xff] }
 0x15a   : > { %v491_v14 = vld [vmem:[%s6617_s9 + $0x678] sm:$0xff] }
 0x15e   : > { %2402 = vmatmul.mubr.bf16.gmra.mrb[4].mxu0 %v743_v15  ;;  %v6086_v15 = vld [vmem:[%s9020_s1 + $0xa4] ss:$8 sps:$4 sm:$0xff]  }
 0x15f   : > { %2411 = vmatprep.mubr.bf16.mxu0 %v751_v16  ;;  %v6088_v16 = vld [vmem:[%s9020_s1 + $0xa0] ss:$8 sps:$4 sm:$0xff]   ;;  %1673 = vmatprep.subr.bf16.mxu1 %v6086_v15  ;;  %v746_v15 = vpack.c.bf16 %v319_v11, %v312_v10  ;;  %v390_v10 = vld [vmem:[%s6617_s9 + $0x350] sm:$0xff] }
 0x160   : > { %1674 = vmatpush1.bf16.msra.mxu1 %v6088_v16  ;;  %v6109_v16 = vld [vmem:[%s9022_s3 + $0x14] ss:$8 sps:$4 sm:$0xff]  }
 0x161   : > { %1675 = vmatprep.subr.bf16.mxu1 %v6089_v19 }
 0x164   : > { %1676 = vmatpush1.bf16.msra.mxu1 %v6091_v24  ;;  %v326_v24 = vld [vmem:[%s6617_s9 + $0x150] sm:$0xff] }
 0x165   : > { %1677 = vmatprep.subr.bf16.mxu1 %v6092_v25  ;;  %v333_v25 = vld [vmem:[%s6617_s9 + $0x188] sm:$0xff] }
 0x166   : > { %2412 = vmatmul.mubr.bf16.gmra.mrb[8].mxu0 %v750_v21  ;;  %v436_v21 = vld [vmem:[%s6617_s9 + $0x4c0] sm:$0xff] }
 0x167   : > { %2421 = vmatprep.mubr.bf16.mxu0 %v758_v22  ;;  %v799_v22 = vpack.c.bf16 %v421_v18, %v414_v17  ;;  %v807_v23 = vpack.c.bf16 %v436_v21, %v429_v20  ;;  %v499_v17 = vld [vmem:[%s6617_s9 + $0x6b8] sm:$0xff]  ;;  %v506_v18 = vld [vmem:[%s6617_s9 + $0x6f0] sm:$0xff] }
 0x168   : > { %1678 = vmatpush1.bf16.msra.mxu1 %v6094_v26  ;;  %v842_v20 = vpack.c.bf16 %v506_v18, %v499_v17  ;;  %v327_v21 = vld [vmem:[%s6617_s9 + $0x158] sm:$0xff]  ;;  %v498_v26 = vld [vmem:[%s6617_s9 + $0x6b0] sm:$0xff]  ;;  %v569_v17 = vld [vmem:[%s6617_s9 + $0x8e8] sm:$0xff] }
 0x169   : > { %1679 = vmatprep.subr.bf16.mxu1 %v6095_v29  ;;  %v513_v29 = vld [vmem:[%s6617_s9 + $0x728] sm:$0xff]  ;;  %v576_v18 = vld [vmem:[%s6617_s9 + $0x920] sm:$0xff] }
 0x16c   : > { %1680 = vmatpush1.bf16.msra.mxu1 %v6097_v34  ;;  %v348_v34 = vld [vmem:[%s6617_s9 + $0x200] sm:$0xff] }
 0x16d   : > { %1681 = vmatprep.subr.bf16.mxu1 %v6098_v35 }
 0x16e   : > { %2422 = vmatmul.mubr.bf16.gmra.mrb[12].mxu0 %v757_v27  ;;  %v428_v27 = vld [vmem:[%s6617_s9 + $0x480] sm:$0xff] }
 0x16f   : > { %2431 = vmatprep.mubr.bf16.mxu0 %v765_v28  ;;  %v435_v28 = vld [vmem:[%s6617_s9 + $0x4b8] sm:$0xff] }
 0x170   : > { %v806_v32 = vpack.c.bf16 %v435_v28, %v428_v27  ;;  %v505_v27 = vld [vmem:[%s6617_s9 + $0x6e8] sm:$0xff]  ;;  %v753_v28 = vpack.c.bf16 %v333_v25, %v326_v24  ;;  %v396_v24 = vld [vmem:[%s6617_s9 + $0x380] sm:$0xff]  ;;  %v403_v25 = vld [vmem:[%s6617_s9 + $0x3b8] sm:$0xff] }
 0x171   : > { %v841_v31 = vpack.c.bf16 %v505_v27, %v498_v26  ;;  %v6116_v26 = vld [vmem:[%s9022_s3 + $0x40] ss:$8 sps:$4 sm:$0xff]  }
 0x172   : > { %v568_v27 = vld [vmem:[%s6617_s9 + $0x8e0] sm:$0xff] }
 0x176   : > { %2432 = vmatmul.mubr.bf16.gmra.mrb[16].mxu0 %v764_v36  ;;  %v6100_v36 = vld [vmem:[%s9020_s1 + $0xe0] ss:$8 sps:$4 sm:$0xff]  }
 0x177   : > { %2441 = vmatprep.mubr.bf16.mxu0 %v772_v37  ;;  %v442_v37 = vld [vmem:[%s6617_s9 + $0x4f0] sm:$0xff]  ;;  %1682 = vmatpush1.bf16.msra.mxu1 %v6100_v36  ;;  %v340_v36 = vld [vmem:[%s6617_s9 + $0x1c0] sm:$0xff] }
 0x178   : > { %v813_v42 = vpack.c.bf16 %v449_v38, %v442_v37  ;;  %1683 = vmatprep.subr.bf16.mxu1 %v6101_v39  ;;  %v347_v37 = vld [vmem:[%s6617_s9 + $0x1f8] sm:$0xff]  ;;  %v6110_v38 = vld [vmem:[%s9022_s3 + $0x20] ss:$8 sps:$4 sm:$0xff]  }
 0x179   : > { %v512_v39 = vld [vmem:[%s6617_s9 + $0x720] sm:$0xff]  ;;  %v760_v41 = vpack.c.bf16 %v347_v37, %v340_v36  ;;  %v418_v36 = vld [vmem:[%s6617_s9 + $0x430] sm:$0xff] }
 0x17b   : > { %1684 = vmatpush1.bf16.msra.mxu1 %v6103_v44  ;;  %v534_v44 = vld [vmem:[%s6617_s9 + $0x7d0] sm:$0xff] }
 0x17c   : > { %3461 = vmatprep.subr.bf16.mxu1 %v6106_v54 }
 0x17e   : > { %2442 = vmatmul.mubr.bf16.gmra.mrb[20].mxu0 %v771_v46  ;;  %v292_v46 = vld [vmem:[%s6617_s9 + $0x40] sm:$0xff] }
 0x17f   : > { %2451 = vmatprep.mubr.bf16.mxu0 %v779_v47  ;;  %v733_v47 = vpack.c.bf16 %v292_v46, %v285_v45  ;;  %v848_v45 = vpack.c.bf16 %v519_v40, %v512_v39  ;;  %v417_v39 = vld [vmem:[%s6617_s9 + $0x428] sm:$0xff]  ;;  %v582_v40 = vld [vmem:[%s6617_s9 + $0x950] sm:$0xff] }
 0x181   : > { %1685 = vmatprep.mubr.bf16.mxu1 %v733_v47  ;;  %v355_v47 = vld [vmem:[%s6617_s9 + $0x238] sm:$0xff] }
 0x182   : > { %1686 = vmatmul.mubr.bf16.vlgmr.msra.gmra.mrb[0].mxu1 %v732_v53  ;;  %v768_v49 = vpack.c.bf16 %v362_v48, %v355_v47  ;;  %v533_v53 = vld [vmem:[%s6617_s9 + $0x7c8] sm:$0xff]  ;;  %v432_v48 = vld [vmem:[%s6617_s9 + $0x4a0] sm:$0xff] }
 0x183   : > { %3462 = vmatpush1.bf16.msra.mxu1 %v6104_v50  ;;  %1695 = vmatprep.mubr.bf16.mxu1 %v740_v61  ;;  %v354_v50 = vld [vmem:[%s6617_s9 + $0x230] sm:$0xff]  ;;  %v775_v61 = vpack.c.bf16 %v376_v60, %v369_v59  ;;  %v425_v47 = vld [vmem:[%s6617_s9 + $0x468] sm:$0xff] }
 0x184   : > { %3463 = vmatprep.subr.bf16.mxu1 %v6109_v16 }
 0x186   : > { %2452 = vmatmul.mubr.bf16.gmra.mrb[24].mxu0 %v778_v56  ;;  %v478_v56 = vld [vmem:[%s6617_s9 + $0x610] sm:$0xff] }
 0x187   : > { %2461 = vmatprep.mubr.bf16.mxu0 %v786_v57  ;;  %v820_v57 = vpack.c.bf16 %v463_v52, %v456_v51  ;;  %v828_v58 = vpack.c.bf16 %v478_v56, %v471_v55  ;;  %v361_v51 = vld [vmem:[%s6617_s9 + $0x268] sm:$0xff]  ;;  %v526_v52 = vld [vmem:[%s6617_s9 + $0x790] sm:$0xff]  ;;  %v548_v56 = vld [vmem:[%s6617_s9 + $0x840] sm:$0xff] }
 0x188   : > { %v767_v54 = vpack.c.bf16 %v361_v51, %v354_v50  ;;  %v541_v55 = vld [vmem:[%s6617_s9 + $0x808] sm:$0xff]  ;;  %v424_v50 = vld [vmem:[%s6617_s9 + $0x460] sm:$0xff]  ;;  %v431_v51 = vld [vmem:[%s6617_s9 + $0x498] sm:$0xff] }
 0x18e   : > { %2462 = vmatmul.mubr.bf16.gmra.mrb[28].mxu0 %v785_v2  ;;  %v739_v2 = vpack.c.bf16 %v305_v63, %v298_v62  ;;  %v368_v62 = vld [vmem:[%s6617_s9 + $0x2a0] sm:$0xff]  ;;  %v375_v63 = vld [vmem:[%s6617_s9 + $0x2d8] sm:$0xff] }
 0x18f   : > { %2471 = vmatprep.mubr.bf16.mxu0 %v793_v3  ;;  %v485_v3 = vld [vmem:[%s6617_s9 + $0x648] sm:$0xff] }
 0x190   : > { %1696 = vmatmul.mubr.bf16.gmra.mrb[4].mxu1 %v739_v2  ;;  %v835_v6 = vpack.c.bf16 %v492_v4, %v485_v3  ;;  %v547_v2 = vld [vmem:[%s6617_s9 + $0x838] sm:$0xff]  ;;  %v774_v3 = vpack.c.bf16 %v375_v63, %v368_v62  ;;  %v446_v62 = vld [vmem:[%s6617_s9 + $0x510] sm:$0xff] }
 0x191   : > { %1705 = vmatprep.mubr.bf16.mxu1 %v747_v9  ;;  %v6115_v4 = vld [vmem:[%s9022_s3 + $0x34] ss:$8 sps:$4 sm:$0xff]   ;;  %v862_v7 = vpack.c.bf16 %v547_v2, %v540_v1  ;;  %v445_v1 = vld [vmem:[%s6617_s9 + $0x508] sm:$0xff] }
 0x192   : > { %v383_v9 = vld [vmem:[%s6617_s9 + $0x318] sm:$0xff]  ;;  %v610_v2 = vld [vmem:[%s6617_s9 + $0xa30] sm:$0xff] }
 0x193   : > { %v782_v11 = vpack.c.bf16 %v390_v10, %v383_v9  ;;  %v453_v9 = vld [vmem:[%s6617_s9 + $0x548] sm:$0xff]  ;;  %v460_v10 = vld [vmem:[%s6617_s9 + $0x580] sm:$0xff] }
 0x196   : > { %2472 = vmatmul.mubr.bf16.gmra.mrb[32].mxu0 %v792_v12  ;;  %v6107_v12 = vld [vmem:[%s9022_s3 + $0x10] ss:$8 sps:$4 sm:$0xff]  }
 0x197   : > { %2481 = vmatprep.mubr.bf16.mxu0 %v800_v13  ;;  %v484_v13 = vld [vmem:[%s6617_s9 + $0x640] sm:$0xff]  ;;  %3464 = vmatpush1.bf16.msra.mxu1 %v6107_v12  ;;  %v382_v12 = vld [vmem:[%s6617_s9 + $0x310] sm:$0xff] }
 0x198   : > { %1706 = vmatmul.mubr.bf16.gmra.mrb[8].mxu1 %v746_v15  ;;  %v834_v19 = vpack.c.bf16 %v491_v14, %v484_v13  ;;  %v389_v13 = vld [vmem:[%s6617_s9 + $0x348] sm:$0xff]  ;;  %v554_v14 = vld [vmem:[%s6617_s9 + $0x870] sm:$0xff] }
 0x199   : > { %v561_v15 = vld [vmem:[%s6617_s9 + $0x8a8] sm:$0xff]  ;;  %v781_v16 = vpack.c.bf16 %v389_v13, %v382_v12  ;;  %v452_v12 = vld [vmem:[%s6617_s9 + $0x540] sm:$0xff]  ;;  %v459_v13 = vld [vmem:[%s6617_s9 + $0x578] sm:$0xff] }
 0x19e   : > { %2482 = vmatmul.mubr.bf16.gmra.mrb[36].mxu0 %v799_v22  ;;  %v334_v22 = vld [vmem:[%s6617_s9 + $0x190] sm:$0xff] }
 0x19f   : > { %2491 = vmatprep.mubr.bf16.mxu0 %v807_v23  ;;  %v754_v23 = vpack.c.bf16 %v334_v22, %v327_v21  ;;  %v397_v21 = vld [vmem:[%s6617_s9 + $0x388] sm:$0xff]  ;;  %v404_v22 = vld [vmem:[%s6617_s9 + $0x3c0] sm:$0xff] }
 0x1a1   : > { %1715 = vmatprep.mubr.bf16.mxu1 %v754_v23  ;;  %v789_v23 = vpack.c.bf16 %v404_v22, %v397_v21 }
 0x1a2   : > { %1716 = vmatmul.mubr.bf16.gmra.mrb[12].mxu1 %v753_v28  ;;  %v575_v28 = vld [vmem:[%s6617_s9 + $0x918] sm:$0xff] }
 0x1a6   : > { %2492 = vmatmul.mubr.bf16.gmra.mrb[40].mxu0 %v806_v32  ;;  %v849_v32 = vpack.c.bf16 %v520_v30, %v513_v29  ;;  %v788_v29 = vpack.c.bf16 %v403_v25, %v396_v24  ;;  %v6118_v30 = vld [vmem:[%s9022_s3 + $0x44] ss:$8 sps:$4 sm:$0xff]   ;;  %v474_v24 = vld [vmem:[%s6617_s9 + $0x5f0] sm:$0xff] }
 0x1a7   : > { %2501 = vmatprep.mubr.bf16.mxu0 %v814_v33  ;;  %v341_v33 = vld [vmem:[%s6617_s9 + $0x1c8] sm:$0xff] }
 0x1a8   : > { %v761_v35 = vpack.c.bf16 %v348_v34, %v341_v33  ;;  %v876_v33 = vpack.c.bf16 %v575_v28, %v568_v27  ;;  %v473_v27 = vld [vmem:[%s6617_s9 + $0x5e8] sm:$0xff]  ;;  %v638_v28 = vld [vmem:[%s6617_s9 + $0xb10] sm:$0xff] }
 0x1aa   : > { %1725 = vmatprep.mubr.bf16.mxu1 %v761_v35  ;;  %v411_v35 = vld [vmem:[%s6617_s9 + $0x3f8] sm:$0xff] }
 0x1ab   : > { %1726 = vmatmul.mubr.bf16.gmra.mrb[16].mxu1 %v760_v41  ;;  %v796_v37 = vpack.c.bf16 %v418_v36, %v411_v35  ;;  %v589_v41 = vld [vmem:[%s6617_s9 + $0x988] sm:$0xff]  ;;  %v488_v36 = vld [vmem:[%s6617_s9 + $0x660] sm:$0xff] }
 0x1ac   : > { %1735 = vmatprep.mubr.bf16.mxu1 %v768_v49  ;;  %v803_v49 = vpack.c.bf16 %v432_v48, %v425_v47  ;;  %v481_v35 = vld [vmem:[%s6617_s9 + $0x628] sm:$0xff] }
 0x1ae   : > { %2502 = vmatmul.mubr.bf16.gmra.mrb[44].mxu0 %v813_v42  ;;  %v6112_v42 = vld [vmem:[%s9022_s3 + $0x24] ss:$8 sps:$4 sm:$0xff]  }
 0x1af   : > { %2511 = vmatprep.mubr.bf16.mxu0 %v821_v43  ;;  %v527_v43 = vld [vmem:[%s6617_s9 + $0x798] sm:$0xff]  ;;  %3465 = vmatprep.subr.bf16.mxu1 %v6112_v42 }
 0x1b0   : > { %3466 = vmatpush1.bf16.msra.mxu1 %v6110_v38  ;;  %v856_v46 = vpack.c.bf16 %v534_v44, %v527_v43  ;;  %v410_v38 = vld [vmem:[%s6617_s9 + $0x3f0] sm:$0xff]  ;;  %v597_v43 = vld [vmem:[%s6617_s9 + $0x9c8] sm:$0xff]  ;;  %v604_v44 = vld [vmem:[%s6617_s9 + $0xa00] sm:$0xff] }
 0x1b1   : > { %3467 = vmatprep.subr.bf16.mxu1 %v6115_v4  ;;  %v795_v42 = vpack.c.bf16 %v417_v39, %v410_v38  ;;  %v480_v38 = vld [vmem:[%s6617_s9 + $0x620] sm:$0xff]  ;;  %v487_v39 = vld [vmem:[%s6617_s9 + $0x658] sm:$0xff] }
 0x1b3   : > { %1736 = vmatmul.mubr.bf16.gmra.mrb[20].mxu1 %v767_v54  ;;  %v603_v54 = vld [vmem:[%s6617_s9 + $0x9f8] sm:$0xff] }
 0x1b4   : > { %1745 = vmatprep.mubr.bf16.mxu1 %v775_v61  ;;  %3468 = vmatpush1.bf16.msra.mxu1 %v6113_v0  ;;  %v439_v61 = vld [vmem:[%s6617_s9 + $0x4d8] sm:$0xff]  ;;  %v438_v0 = vld [vmem:[%s6617_s9 + $0x4d0] sm:$0xff] }
 0x1b5   : > { %3469 = vmatprep.subr.bf16.mxu1 %v6118_v30  ;;  %v810_v63 = vpack.c.bf16 %v446_v62, %v439_v61  ;;  %v809_v4 = vpack.c.bf16 %v445_v1, %v438_v0  ;;  %v509_v61 = vld [vmem:[%s6617_s9 + $0x708] sm:$0xff]  ;;  %v516_v62 = vld [vmem:[%s6617_s9 + $0x740] sm:$0xff]  ;;  %v515_v1 = vld [vmem:[%s6617_s9 + $0x738] sm:$0xff] }
 0x1b6   : > { %2512 = vmatmul.mubr.bf16.gmra.mrb[48].mxu0 %v820_v57  ;;  %v855_v57 = vpack.c.bf16 %v533_v53, %v526_v52  ;;  %v6119_v52 = vld [vmem:[%s9022_s3 + $0x50] ss:$8 sps:$4 sm:$0xff]   ;;  %v596_v53 = vld [vmem:[%s6617_s9 + $0x9c0] sm:$0xff] }
 0x1b7   : > { %2521 = vmatprep.mubr.bf16.mxu0 %v828_v58  ;;  %v863_v58 = vpack.c.bf16 %v548_v56, %v541_v55  ;;  %v802_v55 = vpack.c.bf16 %v431_v51, %v424_v50  ;;  %v6121_v56 = vld [vmem:[%s9022_s3 + $0x54] ss:$8 sps:$4 sm:$0xff]   ;;  %v890_v59 = vpack.c.bf16 %v603_v54, %v596_v53  ;;  %v501_v53 = vld [vmem:[%s6617_s9 + $0x6c8] sm:$0xff]  ;;  %v508_v0 = vld [vmem:[%s6617_s9 + $0x700] sm:$0xff] }
 0x1b8   : > { %3470 = vmatpush1.bf16.msra.mxu1 %v6116_v26  ;;  %v466_v26 = vld [vmem:[%s6617_s9 + $0x5b0] sm:$0xff] }
 0x1b9   : > { %3471 = vmatprep.subr.bf16.mxu1 %v6121_v56  ;;  %v823_v30 = vpack.c.bf16 %v473_v27, %v466_v26  ;;  %v502_v50 = vld [vmem:[%s6617_s9 + $0x6d0] sm:$0xff]  ;;  %v536_v26 = vld [vmem:[%s6617_s9 + $0x7e0] sm:$0xff]  ;;  %v543_v27 = vld [vmem:[%s6617_s9 + $0x818] sm:$0xff] }
 0x1ba   : > { %v666_v54 = vld [vmem:[%s6617_s9 + $0xbf0] sm:$0xff] }
 0x1bb   : > { %1746 = vmatmul.mubr.bf16.gmra.mrb[24].mxu1 %v774_v3  ;;  %v617_v3 = vld [vmem:[%s6617_s9 + $0xa68] sm:$0xff] }
 0x1bc   : > { %1755 = vmatprep.mubr.bf16.mxu1 %v782_v11  ;;  %3472 = vmatpush1.bf16.msra.mxu1 %v6119_v52  ;;  %v817_v11 = vpack.c.bf16 %v460_v10, %v453_v9  ;;  %v494_v52 = vld [vmem:[%s6617_s9 + $0x690] sm:$0xff] }
 0x1bd   : > { %v837_v56 = vpack.c.bf16 %v501_v53, %v494_v52  ;;  %v9027_v52 = vmov 0   ;;  %v290_v53 = vld [vmem:[%s6617_s9 + $0x30] sm:$0xff] }
 0x1be   : > { %2522 = vmatmul.mubr.bf16.gmra.mrb[52].mxu0 %v827_v5  ;;  %v555_v5 = vld [vmem:[%s6617_s9 + $0x878] sm:$0xff] }
 0x1bf   : > { %2531 = vmatprep.mubr.bf16.mxu0 %v835_v6  ;;  %v562_v6 = vld [vmem:[%s6617_s9 + $0x8b0] sm:$0xff] }
 0x1c0   : > { %v870_v8 = vpack.c.bf16 %v562_v6, %v555_v5  ;;  %v625_v5 = vld [vmem:[%s6617_s9 + $0xaa8] sm:$0xff]  ;;  %v632_v6 = vld [vmem:[%s6617_s9 + $0xae0] sm:$0xff] }
 0x1c3   : > { %1756 = vmatmul.mubr.bf16.gmra.mrb[28].mxu1 %v781_v16  ;;  %v631_v16 = vld [vmem:[%s6617_s9 + $0xad8] sm:$0xff] }
 0x1c4   : > { %1765 = vmatprep.mubr.bf16.mxu1 %v789_v23  ;;  %v467_v23 = vld [vmem:[%s6617_s9 + $0x5b8] sm:$0xff] }
 0x1c5   : > { %v824_v25 = vpack.c.bf16 %v474_v24, %v467_v23  ;;  %v537_v23 = vld [vmem:[%s6617_s9 + $0x7e8] sm:$0xff]  ;;  %v544_v24 = vld [vmem:[%s6617_s9 + $0x820] sm:$0xff] }
 0x1c6   : > { %2532 = vmatmul.mubr.bf16.gmra.mrb[56].mxu0 %v834_v19  ;;  %v869_v19 = vpack.c.bf16 %v561_v15, %v554_v14  ;;  %v6122_v14 = vld [vmem:[%s9022_s3 + $0x60] ss:$8 sps:$4 sm:$0xff]  }
 0x1c7   : > { %2541 = vmatprep.mubr.bf16.mxu0 %v842_v20  ;;  %v877_v20 = vpack.c.bf16 %v576_v18, %v569_v17  ;;  %v624_v15 = vld [vmem:[%s6617_s9 + $0xaa0] sm:$0xff]  ;;  %v816_v17 = vpack.c.bf16 %v459_v13, %v452_v12  ;;  %v530_v12 = vld [vmem:[%s6617_s9 + $0x7b0] sm:$0xff] }
 0x1c8   : > { %v6124_v18 = vld [vmem:[%s9022_s3 + $0x64] ss:$8 sps:$4 sm:$0xff]   ;;  %v904_v21 = vpack.c.bf16 %v631_v16, %v624_v15  ;;  %v694_v16 = vld [vmem:[%s6617_s9 + $0xcd0] sm:$0xff] }
 0x1c9   : > { %3473 = vmatprep.subr.bf16.mxu1 %v6124_v18  ;;  %v529_v15 = vld [vmem:[%s6617_s9 + $0x7a8] sm:$0xff] }
 0x1ca   : > { %3474 = vmatpush1.bf16.msra.mxu1 %v6122_v14  ;;  %v522_v14 = vld [vmem:[%s6617_s9 + $0x770] sm:$0xff] }
 0x1cb   : > { %1766 = vmatmul.mubr.bf16.gmra.mrb[32].mxu1 %v788_v29  ;;  %v645_v29 = vld [vmem:[%s6617_s9 + $0xb48] sm:$0xff]  ;;  %v851_v18 = vpack.c.bf16 %v529_v15, %v522_v14  ;;  %v607_v14 = vld [vmem:[%s6617_s9 + $0xa18] sm:$0xff]  ;;  %v614_v15 = vld [vmem:[%s6617_s9 + $0xa50] sm:$0xff] }
 0x1cc   : > { %1775 = vmatprep.mubr.bf16.mxu1 %v796_v37  ;;  %v831_v37 = vpack.c.bf16 %v488_v36, %v481_v35 }
 0x1ce   : > { %2542 = vmatmul.mubr.bf16.gmra.mrb[60].mxu0 %v841_v31  ;;  %v583_v31 = vld [vmem:[%s6617_s9 + $0x958] sm:$0xff] }
 0x1cf   : > { %2551 = vmatprep.mubr.bf16.mxu0 %v849_v32  ;;  %v590_v32 = vld [vmem:[%s6617_s9 + $0x990] sm:$0xff] }
 0x1d0   : > { %v884_v34 = vpack.c.bf16 %v590_v32, %v583_v31  ;;  %v653_v31 = vld [vmem:[%s6617_s9 + $0xb88] sm:$0xff]  ;;  %v660_v32 = vld [vmem:[%s6617_s9 + $0xbc0] sm:$0xff] }
 0x1d3   : > { %1776 = vmatmul.mubr.bf16.gmra.mrb[36].mxu1 %v795_v42  ;;  %v659_v42 = vld [vmem:[%s6617_s9 + $0xbb8] sm:$0xff] }
 0x1d4   : > { %1785 = vmatprep.mubr.bf16.mxu1 %v803_v49  ;;  %v495_v49 = vld [vmem:[%s6617_s9 + $0x698] sm:$0xff] }
 0x1d5   : > { %v838_v51 = vpack.c.bf16 %v502_v50, %v495_v49  ;;  %v564_v49 = vld [vmem:[%s6617_s9 + $0x8c0] sm:$0xff]  ;;  %v571_v50 = vld [vmem:[%s6617_s9 + $0x8f8] sm:$0xff] }
 0x1d6   : > { %2552 = vmatmul.mubr.bf16.gmra.mrb[64].mxu0 %v848_v45  ;;  %v883_v45 = vpack.c.bf16 %v589_v41, %v582_v40  ;;  %v6125_v40 = vld [vmem:[%s9022_s3 + $0x70] ss:$8 sps:$4 sm:$0xff]   ;;  %v652_v41 = vld [vmem:[%s6617_s9 + $0xb80] sm:$0xff] }
 0x1d7   : > { %2561 = vmatprep.mubr.bf16.mxu0 %v856_v46  ;;  %v891_v46 = vpack.c.bf16 %v604_v44, %v597_v43  ;;  %v830_v43 = vpack.c.bf16 %v487_v39, %v480_v38  ;;  %v6127_v44 = vld [vmem:[%s9022_s3 + $0x74] ss:$8 sps:$4 sm:$0xff]   ;;  %v918_v47 = vpack.c.bf16 %v659_v42, %v652_v41  ;;  %v557_v41 = vld [vmem:[%s6617_s9 + $0x888] sm:$0xff] }
 0x1d8   : > { %3475 = vmatprep.subr.bf16.mxu1 %v6127_v44  ;;  %v558_v38 = vld [vmem:[%s6617_s9 + $0x890] sm:$0xff] }
 0x1d9   : > { %3476 = vmatpush1.bf16.msra.mxu1 %v6125_v40  ;;  %v550_v40 = vld [vmem:[%s6617_s9 + $0x850] sm:$0xff] }
 0x1da   : > { %v722_v42 = vld [vmem:[%s6617_s9 + $0xdb0] sm:$0xff]  ;;  %v865_v44 = vpack.c.bf16 %v557_v41, %v550_v40  ;;  %v367_v40 = vld [vmem:[%s6617_s9 + $0x298] sm:$0xff] }
 0x1db   : > { %1786 = vmatmul.mubr.bf16.gmra.mrb[40].mxu1 %v802_v55  ;;  %v673_v55 = vld [vmem:[%s6617_s9 + $0xc28] sm:$0xff] }
 0x1dc   : > { %1795 = vmatprep.mubr.bf16.mxu1 %v810_v63  ;;  %v845_v63 = vpack.c.bf16 %v516_v62, %v509_v61  ;;  %v578_v61 = vld [vmem:[%s6617_s9 + $0x930] sm:$0xff]  ;;  %v585_v62 = vld [vmem:[%s6617_s9 + $0x968] sm:$0xff] }
 0x1de   : > { %2562 = vmatmul.mubr.bf16.gmra.mrb[68].mxu0 %v855_v57  ;;  %v611_v57 = vld [vmem:[%s6617_s9 + $0xa38] sm:$0xff] }
 0x1df   : > { %2571 = vmatprep.mubr.bf16.mxu0 %v863_v58  ;;  %v618_v58 = vld [vmem:[%s6617_s9 + $0xa70] sm:$0xff] }
 0x1e0   : > { %v898_v60 = vpack.c.bf16 %v618_v58, %v611_v57  ;;  %v681_v57 = vld [vmem:[%s6617_s9 + $0xc68] sm:$0xff]  ;;  %v688_v58 = vld [vmem:[%s6617_s9 + $0xca0] sm:$0xff] }
 0x1e3   : > { %1796 = vmatmul.mubr.bf16.gmra.mrb[44].mxu1 %v809_v4  ;;  %v687_v4 = vld [vmem:[%s6617_s9 + $0xc98] sm:$0xff] }
 0x1e4   : > { %1805 = vmatprep.mubr.bf16.mxu1 %v817_v11  ;;  %v523_v11 = vld [vmem:[%s6617_s9 + $0x778] sm:$0xff] }
 0x1e5   : > { %v852_v13 = vpack.c.bf16 %v530_v12, %v523_v11  ;;  %v6139_v12 = vld [vmem:[%s9022_s3 + $0xb4] ss:$8 sps:$4 sm:$0xff]  }
 0x1e6   : > { %2572 = vmatmul.mubr.bf16.gmra.mrb[72].mxu0 %v862_v7  ;;  %v897_v7 = vpack.c.bf16 %v617_v3, %v610_v2  ;;  %v6128_v2 = vld [vmem:[%s9022_s3 + $0x80] ss:$8 sps:$4 sm:$0xff]  }
 0x1e7   : > { %2581 = vmatprep.mubr.bf16.mxu0 %v870_v8  ;;  %v905_v8 = vpack.c.bf16 %v632_v6, %v625_v5  ;;  %v680_v3 = vld [vmem:[%s6617_s9 + $0xc60] sm:$0xff]  ;;  %v844_v5 = vpack.c.bf16 %v515_v1, %v508_v0  ;;  %v311_v0 = vld [vmem:[%s6617_s9 + $0xd8] sm:$0xff]  ;;  %v879_v1 = vpack.c.bf16 %v585_v62, %v578_v61  ;;  %v662_v61 = vld [vmem:[%s6617_s9 + $0xbd0] sm:$0xff] }
 0x1e8   : > { %v6130_v6 = vld [vmem:[%s9022_s3 + $0x84] ss:$8 sps:$4 sm:$0xff]   ;;  %v932_v9 = vpack.c.bf16 %v687_v4, %v680_v3 }
 0x1e9   : > { %3477 = vmatprep.subr.bf16.mxu1 %v6130_v6  ;;  %v593_v3 = vld [vmem:[%s6617_s9 + $0x9a8] sm:$0xff]  ;;  %v600_v4 = vld [vmem:[%s6617_s9 + $0x9e0] sm:$0xff] }
 0x1ea   : > { %3478 = vmatpush1.bf16.msra.mxu1 %v6128_v2  ;;  %v592_v6 = vld [vmem:[%s6617_s9 + $0x9a0] sm:$0xff]  ;;  %v669_v62 = vld [vmem:[%s6617_s9 + $0xc08] sm:$0xff] }
 0x1eb   : > { %1806 = vmatmul.mubr.bf16.gmra.mrb[48].mxu1 %v816_v17  ;;  %v701_v17 = vld [vmem:[%s6617_s9 + $0xd08] sm:$0xff] }
 0x1ec   : > { %1815 = vmatprep.mubr.bf16.mxu1 %v824_v25  ;;  %v859_v25 = vpack.c.bf16 %v544_v24, %v537_v23  ;;  %v621_v23 = vld [vmem:[%s6617_s9 + $0xa88] sm:$0xff]  ;;  %v628_v24 = vld [vmem:[%s6617_s9 + $0xac0] sm:$0xff] }
 0x1ee   : > { %2582 = vmatmul.mubr.bf16.gmra.mrb[76].mxu0 %v869_v19  ;;  %v639_v19 = vld [vmem:[%s6617_s9 + $0xb18] sm:$0xff] }
 0x1ef   : > { %2591 = vmatprep.mubr.bf16.mxu0 %v877_v20  ;;  %v646_v20 = vld [vmem:[%s6617_s9 + $0xb50] sm:$0xff] }
 0x1f0   : > { %v912_v22 = vpack.c.bf16 %v646_v20, %v639_v19  ;;  %v709_v19 = vld [vmem:[%s6617_s9 + $0xd48] sm:$0xff]  ;;  %v716_v20 = vld [vmem:[%s6617_s9 + $0xd80] sm:$0xff] }
 0x1f3   : > { %1816 = vmatmul.mubr.bf16.gmra.mrb[52].mxu1 %v823_v30  ;;  %v715_v30 = vld [vmem:[%s6617_s9 + $0xd78] sm:$0xff] }
 0x1f4   : > { %1825 = vmatprep.mubr.bf16.mxu1 %v831_v37  ;;  %v551_v37 = vld [vmem:[%s6617_s9 + $0x858] sm:$0xff] }
 0x1f5   : > { %v866_v39 = vpack.c.bf16 %v558_v38, %v551_v37  ;;  %v634_v37 = vld [vmem:[%s6617_s9 + $0xaf0] sm:$0xff]  ;;  %v641_v38 = vld [vmem:[%s6617_s9 + $0xb28] sm:$0xff] }
 0x1f6   : > { %2592 = vmatmul.mubr.bf16.gmra.mrb[80].mxu0 %v876_v33  ;;  %v911_v33 = vpack.c.bf16 %v645_v29, %v638_v28  ;;  %v6131_v28 = vld [vmem:[%s9022_s3 + $0x90] ss:$8 sps:$4 sm:$0xff]   ;;  %v708_v29 = vld [vmem:[%s6617_s9 + $0xd40] sm:$0xff]  ;;  %v907_v41 = vpack.c.bf16 %v641_v38, %v634_v37 }
 0x1f7   : > { %2601 = vmatprep.mubr.bf16.mxu0 %v884_v34  ;;  %v919_v34 = vpack.c.bf16 %v660_v32, %v653_v31  ;;  %v858_v31 = vpack.c.bf16 %v543_v27, %v536_v26  ;;  %v6133_v32 = vld [vmem:[%s9022_s3 + $0x94] ss:$8 sps:$4 sm:$0xff]   ;;  %v946_v35 = vpack.c.bf16 %v715_v30, %v708_v29  ;;  %v620_v26 = vld [vmem:[%s6617_s9 + $0xa80] sm:$0xff]  ;;  %v353_v30 = vld [vmem:[%s6617_s9 + $0x228] sm:$0xff] }
 0x1f8   : > { %3479 = vmatprep.subr.bf16.mxu1 %v6133_v32  ;;  %v627_v27 = vld [vmem:[%s6617_s9 + $0xab8] sm:$0xff]  ;;  %v346_v29 = vld [vmem:[%s6617_s9 + $0x1f0] sm:$0xff]  ;;  %v6142_v32 = vld [vmem:[%s9022_s3 + $0xc4] ss:$8 sps:$4 sm:$0xff]  }
 0x1f9   : > { %3480 = vmatpush1.bf16.msra.mxu1 %v6131_v28  ;;  %v6140_v28 = vld [vmem:[%s9022_s3 + $0xc0] ss:$8 sps:$4 sm:$0xff]  }
 0x1fa   : > { %v704_v38 = vld [vmem:[%s6617_s9 + $0xd20] sm:$0xff] }
 0x1fb   : > { %1826 = vmatmul.mubr.bf16.gmra.mrb[56].mxu1 %v830_v43  ;;  %v729_v43 = vld [vmem:[%s6617_s9 + $0xde8] sm:$0xff] }
 0x1fc   : > { %1835 = vmatprep.mubr.bf16.mxu1 %v838_v51  ;;  %v6134_v51 = vld [vmem:[%s9022_s3 + $0xa0] ss:$8 sps:$4 sm:$0xff]  }
 0x1fe   : > { %2602 = vmatmul.mubr.bf16.gmra.mrb[84].mxu0 %v883_v45  ;;  %v667_v45 = vld [vmem:[%s6617_s9 + $0xbf8] sm:$0xff] }
 0x1ff   : > { %2611 = vmatprep.mubr.bf16.mxu0 %v891_v46  ;;  %v674_v46 = vld [vmem:[%s6617_s9 + $0xc30] sm:$0xff] }
 0x200   : > { %v926_v48 = vpack.c.bf16 %v674_v46, %v667_v45  ;;  %v953_v45 = vpack.c.bf16 %v729_v43, %v722_v42  ;;  %v565_v46 = vld [vmem:[%s6617_s9 + $0x8c8] sm:$0xff] }
 0x201   : > { %v649_v43 = vld [vmem:[%s6617_s9 + $0xb68] sm:$0xff] }
 0x203   : > { %1836 = vmatmul.mubr.bf16.gmra.mrb[60].mxu1 %v837_v56  ;;  %v6136_v56 = vld [vmem:[%s9022_s3 + $0xa4] ss:$8 sps:$4 sm:$0xff]  }
 0x204   : > { %1845 = vmatprep.mubr.bf16.mxu1 %v845_v63  ;;  %3481 = vmatprep.subr.bf16.mxu1 %v6136_v56  ;;  %v304_v63 = vld [vmem:[%s6617_s9 + $0xa0] sm:$0xff] }
 0x205   : > { %3482 = vmatpush1.bf16.msra.mxu1 %v6134_v51  ;;  %v745_v2 = vpack.c.bf16 %v311_v0, %v304_v63  ;;  %v388_v63 = vld [vmem:[%s6617_s9 + $0x340] sm:$0xff]  ;;  %v395_v0 = vld [vmem:[%s6617_s9 + $0x378] sm:$0xff] }
 0x206   : > { %2612 = vmatmul.mubr.bf16.gmra.mrb[88].mxu0 %v890_v59  ;;  %v925_v59 = vpack.c.bf16 %v673_v55, %v666_v54  ;;  %v297_v54 = vld [vmem:[%s6617_s9 + $0x68] sm:$0xff]  ;;  %v872_v55 = vpack.c.bf16 %v571_v50, %v564_v49  ;;  %3483 = vmatprep.subr.bf16.mxu1 %v6139_v12  ;;  %v374_v49 = vld [vmem:[%s6617_s9 + $0x2d0] sm:$0xff] }
 0x207   : > { %2621 = vmatprep.mubr.bf16.mxu0 %v898_v60  ;;  %v933_v60 = vpack.c.bf16 %v688_v58, %v681_v57  ;;  %v738_v57 = vpack.c.bf16 %v297_v54, %v290_v53  ;;  %v579_v58 = vld [vmem:[%s6617_s9 + $0x938] sm:$0xff]  ;;  %v381_v50 = vld [vmem:[%s6617_s9 + $0x308] sm:$0xff] }
 0x208   : > { %v6145_v53 = vld [vmem:[%s9022_s3 + $0xd4] ss:$8 sps:$4 sm:$0xff]   ;;  %v780_v54 = vpack.c.bf16 %v381_v50, %v374_v49  ;;  %v6146_v12 = vld [vmem:[%s9022_s3 + $0xe0] ss:$8 sps:$4 sm:$0xff]  }
 0x209   : > { %v719_v49 = vld [vmem:[%s6617_s9 + $0xd98] sm:$0xff]  ;;  %v726_v50 = vld [vmem:[%s6617_s9 + $0xdd0] sm:$0xff] }
 0x20b   : > { %1846 = vmatmul.mubr.bf16.gmra.mrb[64].mxu1 %v844_v5  ;;  %v887_v5 = vpack.c.bf16 %v600_v4, %v593_v3  ;;  %v787_v3 = vpack.c.bf16 %v395_v0, %v388_v63 }
 0x20c   : > { %1855 = vmatprep.mubr.bf16.mxu1 %v852_v13 }
 0x20e   : > { %2622 = vmatmul.mubr.bf16.gmra.mrb[92].mxu0 %v897_v7  ;;  %v695_v7 = vld [vmem:[%s6617_s9 + $0xcd8] sm:$0xff] }
 0x20f   : > { %2631 = vmatprep.mubr.bf16.mxu0 %v905_v8  ;;  %v702_v8 = vld [vmem:[%s6617_s9 + $0xd10] sm:$0xff] }
 0x210   : > { %v940_v10 = vpack.c.bf16 %v702_v8, %v695_v7  ;;  %v599_v7 = vld [vmem:[%s6617_s9 + $0x9d8] sm:$0xff] }
 0x211   : > { %v6137_v8 = vld [vmem:[%s9022_s3 + $0xb0] ss:$8 sps:$4 sm:$0xff]   ;;  %v886_v11 = vpack.c.bf16 %v599_v7, %v592_v6  ;;  %v677_v6 = vld [vmem:[%s6617_s9 + $0xc48] sm:$0xff]  ;;  %v684_v7 = vld [vmem:[%s6617_s9 + $0xc80] sm:$0xff] }
 0x212   : > { %3484 = vmatpush1.bf16.msra.mxu1 %v6137_v8 }
 0x213   : > { %1856 = vmatmul.mubr.bf16.gmra.mrb[68].mxu1 %v851_v18  ;;  %v613_v18 = vld [vmem:[%s6617_s9 + $0xa48] sm:$0xff]  ;;  %3485 = vmatprep.subr.bf16.mxu1 %v6142_v32 }
 0x214   : > { %1865 = vmatprep.mubr.bf16.mxu1 %v859_v25  ;;  %v901_v25 = vpack.c.bf16 %v628_v24, %v621_v23 }
 0x216   : > { %2632 = vmatmul.mubr.bf16.gmra.mrb[96].mxu0 %v904_v21  ;;  %v939_v21 = vpack.c.bf16 %v701_v17, %v694_v16  ;;  %v894_v16 = vpack.c.bf16 %v614_v15, %v607_v14  ;;  %v606_v17 = vld [vmem:[%s6617_s9 + $0xa10] sm:$0xff]  ;;  %3486 = vmatpush1.bf16.msra.mxu1 %v6140_v28  ;;  %v409_v14 = vld [vmem:[%s6617_s9 + $0x3e8] sm:$0xff]  ;;  %v423_v28 = vld [vmem:[%s6617_s9 + $0x458] sm:$0xff] }
 0x217   : > { %2641 = vmatprep.mubr.bf16.mxu0 %v912_v22  ;;  %v947_v22 = vpack.c.bf16 %v716_v20, %v709_v19  ;;  %v332_v19 = vld [vmem:[%s6617_s9 + $0x180] sm:$0xff]  ;;  %v339_v20 = vld [vmem:[%s6617_s9 + $0x1b8] sm:$0xff]  ;;  %3487 = vmatprep.subr.bf16.mxu1 %v6145_v53  ;;  %v950_v53 = vpack.c.bf16 %v726_v50, %v719_v49 }
 0x21b   : > { %1866 = vmatmul.mubr.bf16.gmra.mrb[72].mxu1 %v858_v31  ;;  %v900_v31 = vpack.c.bf16 %v627_v27, %v620_v26  ;;  %v697_v26 = vld [vmem:[%s6617_s9 + $0xce8] sm:$0xff]  ;;  %v416_v27 = vld [vmem:[%s6617_s9 + $0x420] sm:$0xff] }
 0x21c   : > { %1875 = vmatprep.mubr.bf16.mxu1 %v866_v39  ;;  %v360_v39 = vld [vmem:[%s6617_s9 + $0x260] sm:$0xff] }
 0x21d   : > { %v773_v42 = vpack.c.bf16 %v367_v40, %v360_v39  ;;  %v711_v39 = vld [vmem:[%s6617_s9 + $0xd58] sm:$0xff] }
 0x21e   : > { %2642 = vmatmul.mubr.bf16.gmra.mrb[100].mxu0 %v911_v33  ;;  %v723_v33 = vld [vmem:[%s6617_s9 + $0xdb8] sm:$0xff] }
 0x21f   : > { %2651 = vmatprep.mubr.bf16.mxu0 %v919_v34  ;;  %v730_v34 = vld [vmem:[%s6617_s9 + $0xdf0] sm:$0xff] }
 0x220   : > { %v954_v36 = vpack.c.bf16 %v730_v34, %v723_v33  ;;  %v766_v33 = vpack.c.bf16 %v353_v30, %v346_v29  ;;  %v635_v34 = vld [vmem:[%s6617_s9 + $0xaf8] sm:$0xff] }
 0x221   : > { %v6149_v40 = vld [vmem:[%s9022_s3 + $0xf0] ss:$8 sps:$4 sm:$0xff]  }
 0x223   : > { %1876 = vmatmul.mubr.bf16.gmra.mrb[76].mxu1 %v865_v44  ;;  %v656_v44 = vld [vmem:[%s6617_s9 + $0xba0] sm:$0xff] }
 0x226   : > { %2652 = vmatmul.mubr.bf16.gmra.mrb[104].mxu0 %v918_v47  ;;  %v572_v47 = vld [vmem:[%s6617_s9 + $0x900] sm:$0xff] }
 0x227   : > { %2661 = vmatprep.mubr.bf16.mxu0 %v926_v48  ;;  %v873_v48 = vpack.c.bf16 %v572_v47, %v565_v46  ;;  %v648_v46 = vld [vmem:[%s6617_s9 + $0xb60] sm:$0xff]  ;;  %v655_v47 = vld [vmem:[%s6617_s9 + $0xb98] sm:$0xff] }
 0x228   : > { %v914_v51 = vpack.c.bf16 %v655_v47, %v648_v46 }
 0x229   : > { %1885 = vmatprep.mubr.bf16.mxu1 %v873_v48  ;;  %v6143_v48 = vld [vmem:[%s9022_s3 + $0xd0] ss:$8 sps:$4 sm:$0xff]  }
 0x22a   : > { %3488 = vmatpush1.bf16.msra.mxu1 %v6143_v48 }
 0x22b   : > { %1886 = vmatmul.mubr.bf16.gmra.mrb[80].mxu1 %v872_v55 }
 0x22e   : > { %2662 = vmatmul.mubr.bf16.gmra.mrb[108].mxu0 %v925_v59  ;;  %v586_v59 = vld [vmem:[%s6617_s9 + $0x970] sm:$0xff] }
 0x22f   : > { %2671 = vmatprep.mubr.bf16.mxu0 %v933_v60  ;;  %v880_v60 = vpack.c.bf16 %v586_v59, %v579_v58  ;;  %v670_v58 = vld [vmem:[%s6617_s9 + $0xc10] sm:$0xff] }
 0x231   : > { %1895 = vmatprep.mubr.bf16.mxu1 %v880_v60 }
 0x233   : > { %1896 = vmatmul.mubr.bf16.gmra.mrb[84].mxu1 %v879_v1 }
 0x234   : > { %1905 = vmatprep.mubr.bf16.mxu1 %v887_v5 }
 0x236   : > { %2672 = vmatmul.mubr.bf16.gmra.mrb[112].mxu0 %v932_v9  ;;  %v318_v9 = vld [vmem:[%s6617_s9 + $0x110] sm:$0xff] }
 0x237   : > { %2681 = vmatprep.mubr.bf16.mxu0 %v940_v10  ;;  %v325_v10 = vld [vmem:[%s6617_s9 + $0x148] sm:$0xff] }
 0x238   : > { %v752_v13 = vpack.c.bf16 %v325_v10, %v318_v9  ;;  %v929_v9 = vpack.c.bf16 %v684_v7, %v677_v6  ;;  %v676_v10 = vld [vmem:[%s6617_s9 + $0xc40] sm:$0xff]  ;;  %v458_v6 = vld [vmem:[%s6617_s9 + $0x570] sm:$0xff]  ;;  %v465_v7 = vld [vmem:[%s6617_s9 + $0x5a8] sm:$0xff] }
 0x23b   : > { %1906 = vmatmul.mubr.bf16.gmra.mrb[88].mxu1 %v886_v11  ;;  %v683_v11 = vld [vmem:[%s6617_s9 + $0xc78] sm:$0xff] }
 0x23c   : > { %1915 = vmatprep.mubr.bf16.mxu1 %v894_v16  ;;  %v928_v16 = vpack.c.bf16 %v683_v11, %v676_v10  ;;  %v822_v10 = vpack.c.bf16 %v465_v7, %v458_v6 }
 0x23e   : > { %2682 = vmatmul.mubr.bf16.gmra.mrb[116].mxu0 %v939_v21  ;;  %v893_v21 = vpack.c.bf16 %v613_v18, %v606_v17  ;;  %v6148_v17 = vld [vmem:[%s9022_s3 + $0xe4] ss:$8 sps:$4 sm:$0xff]  }
 0x23f   : > { %2691 = vmatprep.mubr.bf16.mxu0 %v947_v22  ;;  %v759_v22 = vpack.c.bf16 %v339_v20, %v332_v19  ;;  %3489 = vmatprep.subr.bf16.mxu1 %v6148_v17 }
 0x240   : > { %3490 = vmatpush1.bf16.msra.mxu1 %v6146_v12 }
 0x243   : > { %1916 = vmatmul.mubr.bf16.gmra.mrb[92].mxu1 %v893_v21  ;;  %v691_v21 = vld [vmem:[%s6617_s9 + $0xcb8] sm:$0xff] }
 0x244   : > { %1925 = vmatprep.mubr.bf16.mxu1 %v901_v25  ;;  %v690_v25 = vld [vmem:[%s6617_s9 + $0xcb0] sm:$0xff] }
 0x245   : > { %v935_v30 = vpack.c.bf16 %v697_v26, %v690_v25  ;;  %v486_v25 = vld [vmem:[%s6617_s9 + $0x650] sm:$0xff]  ;;  %v493_v26 = vld [vmem:[%s6617_s9 + $0x688] sm:$0xff] }
 0x246   : > { %2692 = vmatmul.mubr.bf16.gmra.mrb[120].mxu0 %v946_v35  ;;  %v642_v35 = vld [vmem:[%s6617_s9 + $0xb30] sm:$0xff] }
 0x247   : > { %2701 = vmatprep.mubr.bf16.mxu0 %v954_v36  ;;  %v908_v36 = vpack.c.bf16 %v642_v35, %v635_v34  ;;  %v705_v34 = vld [vmem:[%s6617_s9 + $0xd28] sm:$0xff]  ;;  %v712_v35 = vld [vmem:[%s6617_s9 + $0xd60] sm:$0xff] }
 0x248   : > { %v943_v37 = vpack.c.bf16 %v712_v35, %v705_v34  ;;  %v500_v35 = vld [vmem:[%s6617_s9 + $0x6c0] sm:$0xff] }
 0x24b   : > { %1926 = vmatmul.mubr.bf16.gmra.mrb[96].mxu1 %v900_v31  ;;  %v801_v31 = vpack.c.bf16 %v423_v28, %v416_v27  ;;  %v836_v28 = vpack.c.bf16 %v493_v26, %v486_v25 }
 0x24c   : > { %1935 = vmatprep.mubr.bf16.mxu1 %v908_v36 }
 0x24e   : > { %2702 = vmatmul.mubr.bf16.gmra.mrb[124].mxu0 %v953_v45  ;;  %v915_v45 = vpack.c.bf16 %v656_v44, %v649_v43  ;;  %v942_v44 = vpack.c.bf16 %v711_v39, %v704_v38 }
 0x24f   : > { %2744 = vmatprep.mubr.bf16.mxu0 %v9027_v52 }
 0x253   : > { %1936 = vmatmul.mubr.bf16.gmra.mrb[100].mxu1 %v907_v41  ;;  %v430_v41 = vld [vmem:[%s6617_s9 + $0x490] sm:$0xff] }
 0x254   : > { %1945 = vmatprep.mubr.bf16.mxu1 %v915_v45  ;;  %v6151_v45 = vld [vmem:[%s9022_s3 + $0xf4] ss:$8 sps:$4 sm:$0xff]  }
 0x255   : > { %v7355_v55 = vpop.f32.mrb[0].mxu1  ;;  %3491 = vmatprep.subr.bf16.mxu1 %v6151_v45  ;;  %v521_v45 = vld [vmem:[%s6617_s9 + $0x768] sm:$0xff] }
 0x256   : > { %5315 = vmatmul.mubr.msk.bf16.vlgmr.msra.gmra.mrb[0].mxu0 %vm1556_vm0, %v738_v57  ;;  %v7357_v56 = vpop.f32.mrb[1].mxu1  ;;  %v663_v57 = vld [vmem:[%s6617_s9 + $0xbd8] sm:$0xff]  ;;  %3492 = vmatpush1.bf16.msra.mxu1 %v6149_v40 }
 0x257   : > { %2754 = vmatprep.mubr.bf16.mxu0 %v9027_v52  ;;  %v7362_v59 = vpop.f32.mrb[2].mxu1  ;;  %v922_v60 = vpack.c.bf16 %v670_v58, %v663_v57  ;;  %4141 = vmatprep.subr.bf16.mxu1 %v9027_v52  ;;  %v725_v57 = vld [vmem:[%s6617_s9 + $0xdc8] sm:$0xff]  ;;  %v444_v58 = vld [vmem:[%s6617_s9 + $0x500] sm:$0xff] }
 0x258   : > { %v7369_v1 = vpop.f32.mrb[3].mxu1 }
 0x25b   : > { %1946 = vmatmul.mubr.bf16.gmra.mrb[104].mxu1 %v914_v51 }
 0x25c   : > { %1955 = vmatprep.mubr.bf16.mxu1 %v922_v60  ;;  %v451_v60 = vld [vmem:[%s6617_s9 + $0x538] sm:$0xff] }
 0x25d   : > { %v815_v63 = vpack.c.bf16 %v451_v60, %v444_v58  ;;  %v535_v58 = vld [vmem:[%s6617_s9 + $0x7d8] sm:$0xff] }
 0x25e   : > { %5316 = vmatmul.mubr.msk.bf16.gmra.mrb[4].mxu0 %vm1556_vm0, %v745_v2  ;;  %v921_v2 = vpack.c.bf16 %v669_v62, %v662_v61 }
 0x25f   : > { %2764 = vmatprep.mubr.bf16.mxu0 %v9027_v52 }
 0x263   : > { %1956 = vmatmul.mubr.bf16.gmra.mrb[108].mxu1 %v921_v2  ;;  %v7371_v4 = vpop.f32.mrb[4].mxu1 }
 0x264   : > { %v7373_v5 = vpop.f32.mrb[5].mxu1  ;;  %1965 = vmatprep.mubr.bf16.mxu1 %v929_v9 }
 0x265   : > { %v7378_v8 = vpop.f32.mrb[6].mxu1 }
 0x266   : > { %5317 = vmatmul.mubr.msk.bf16.gmra.mrb[8].mxu0 %vm1556_vm0, %v752_v13  ;;  %v402_v13 = vld [vmem:[%s6617_s9 + $0x3b0] sm:$0xff]  ;;  %v7388_v15 = vpop.f32.mrb[7].mxu1 }
 0x267   : > { %2774 = vmatprep.mubr.bf16.mxu0 %v9027_v52  ;;  %v794_v18 = vpack.c.bf16 %v409_v14, %v402_v13  ;;  %v472_v14 = vld [vmem:[%s6617_s9 + $0x5e0] sm:$0xff] }
 0x26b   : > { %1966 = vmatmul.mubr.bf16.gmra.mrb[112].mxu1 %v928_v16  ;;  %v7393_v19 = vpop.f32.mrb[8].mxu1  ;;  %v479_v16 = vld [vmem:[%s6617_s9 + $0x618] sm:$0xff] }
 0x26c   : > { %v7395_v20 = vpop.f32.mrb[9].mxu1 }
 0x26d   : > { %v7400_v23 = vpop.f32.mrb[10].mxu1 }
 0x26e   : > { %5318 = vmatmul.mubr.msk.bf16.gmra.mrb[12].mxu0 %vm1556_vm0, %v759_v22  ;;  %v698_v22 = vld [vmem:[%s6617_s9 + $0xcf0] sm:$0xff]  ;;  %v7407_v29 = vpop.f32.mrb[11].mxu1 }
 0x26f   : > { %2784 = vmatprep.mubr.bf16.mxu0 %v9027_v52  ;;  %v936_v24 = vpack.c.bf16 %v698_v22, %v691_v21 }
 0x271   : > { %1975 = vmatprep.mubr.bf16.mxu1 %v936_v24 }
 0x273   : > { %1976 = vmatmul.mubr.bf16.gmra.mrb[116].mxu1 %v935_v30 }
 0x274   : > { %1985 = vmatprep.mubr.bf16.mxu1 %v943_v37  ;;  %v507_v37 = vld [vmem:[%s6617_s9 + $0x6f8] sm:$0xff] }
 0x275   : > { %v7409_v32 = vpop.f32.mrb[12].mxu1  ;;  %v843_v39 = vpack.c.bf16 %v507_v37, %v500_v35  ;;  %v556_v35 = vld [vmem:[%s6617_s9 + $0x880] sm:$0xff]  ;;  %v563_v37 = vld [vmem:[%s6617_s9 + $0x8b8] sm:$0xff] }
 0x276   : > { %5319 = vmatmul.mubr.msk.bf16.gmra.mrb[16].mxu0 %vm1556_vm0, %v766_v33  ;;  %v7411_v33 = vpop.f32.mrb[13].mxu1 }
 0x277   : > { %2794 = vmatprep.mubr.bf16.mxu0 %v9027_v52  ;;  %v7416_v36 = vpop.f32.mrb[14].mxu1 }
 0x278   : > { %v7426_v43 = vpop.f32.mrb[15].mxu1 }
 0x27b   : > { %1986 = vmatmul.mubr.bf16.gmra.mrb[120].mxu1 %v942_v44  ;;  %v514_v44 = vld [vmem:[%s6617_s9 + $0x730] sm:$0xff] }
 0x27c   : > { %1995 = vmatprep.mubr.bf16.mxu1 %v950_v53  ;;  %v850_v49 = vpack.c.bf16 %v521_v45, %v514_v44  ;;  %v871_v44 = vpack.c.bf16 %v563_v37, %v556_v35 }
 0x27e   : > { %5320 = vmatmul.mubr.msk.bf16.gmra.mrb[20].mxu0 %vm1556_vm0, %v773_v42  ;;  %v437_v42 = vld [vmem:[%s6617_s9 + $0x4c8] sm:$0xff]  ;;  %v7432_v47 = vpop.f32.mrb[16].mxu1 }
 0x27f   : > { %2804 = vmatprep.mubr.bf16.mxu0 %v9027_v52  ;;  %v808_v46 = vpack.c.bf16 %v437_v42, %v430_v41  ;;  %v7434_v48 = vpop.f32.mrb[17].mxu1 }
 0x280   : > { %v7439_v51 = vpop.f32.mrb[18].mxu1 }
 0x281   : > { %v7446_v61 = vpop.f32.mrb[19].mxu1 }
 0x286   : > { %5321 = vmatmul.mubr.msk.bf16.gmra.mrb[24].mxu0 %vm1556_vm0, %v780_v54  ;;  %v718_v54 = vld [vmem:[%s6617_s9 + $0xd90] sm:$0xff]  ;;  %v7448_v0 = vpop.f32.mrb[20].mxu1 }
 0x287   : > { %2814 = vmatprep.mubr.bf16.mxu0 %v9027_v52  ;;  %v949_v62 = vpack.c.bf16 %v725_v57, %v718_v54  ;;  %v7450_v2 = vpop.f32.mrb[21].mxu1  ;;  %v528_v57 = vld [vmem:[%s6617_s9 + $0x7a0] sm:$0xff] }
 0x289   : > { %1996 = vmatmul.mubr.bf16.gmra.mrb[124].mxu1 %v949_v62  ;;  %v857_v62 = vpack.c.bf16 %v535_v58, %v528_v57  ;;  %v570_v58 = vld [vmem:[%s6617_s9 + $0x8f0] sm:$0xff] }
 0x28e   : > { %5322 = vmatmul.mubr.msk.bf16.gmra.mrb[28].mxu0 %vm1556_vm0, %v787_v3  ;;  %v7453_v3 = vpop.f32.mrb[22].mxu1 }
 0x28f   : > { %2824 = vmatprep.mubr.bf16.mxu0 %v9027_v52  ;;  %v7458_v9 = vpop.f32.mrb[23].mxu1 }
 0x290   : > { %v7460_v11 = vpop.f32.mrb[24].mxu1 }
 0x291   : > { %v7462_v12 = vpop.f32.mrb[25].mxu1 }
 0x292   : > { %v7465_v13 = vpop.f32.mrb[26].mxu1 }
 0x293   : > { %v7470_v17 = vpop.f32.mrb[27].mxu1 }
 0x296   : > { %5323 = vmatmul.mubr.msk.bf16.gmra.mrb[32].mxu0 %vm1556_vm0, %v794_v18  ;;  %v829_v18 = vpack.c.bf16 %v479_v16, %v472_v14  ;;  %v7472_v21 = vpop.f32.mrb[28].mxu1  ;;  %v549_v14 = vld [vmem:[%s6617_s9 + $0x848] sm:$0xff] }
 0x297   : > { %2834 = vmatprep.mubr.bf16.mxu0 %v9027_v52  ;;  %v7474_v22 = vpop.f32.mrb[29].mxu1 }
 0x298   : > { %v7477_v24 = vpop.f32.mrb[30].mxu1 }
 0x299   : > { %v7482_v27 = vpop.f32.mrb[31].mxu1 }
 0x29e   : > { %5324 = vmatmul.mubr.msk.bf16.gmra.mrb[36].mxu0 %vm1556_vm0, %v801_v31  ;;  %v7484_v30 = vpop.f32.mrb[32].mxu1 }
 0x29f   : > { %2844 = vmatprep.mubr.bf16.mxu0 %v9027_v52  ;;  %v7486_v31 = vpop.f32.mrb[33].mxu1 }
 0x2a0   : > { %v7489_v34 = vpop.f32.mrb[34].mxu1 }
 0x2a1   : > { %v7494_v38 = vpop.f32.mrb[35].mxu1 }
 0x2a6   : > { %5325 = vmatmul.mubr.msk.bf16.gmra.mrb[40].mxu0 %vm1556_vm0, %v808_v46  ;;  %v7496_v40 = vpop.f32.mrb[36].mxu1 }
 0x2a7   : > { %2854 = vmatprep.mubr.bf16.mxu0 %v9027_v52  ;;  %v7498_v41 = vpop.f32.mrb[37].mxu1 }
 0x2a8   : > { %v7501_v42 = vpop.f32.mrb[38].mxu1 }
 0x2a9   : > { %v7506_v46 = vpop.f32.mrb[39].mxu1 }
 0x2ae   : > { %5326 = vmatmul.mubr.msk.bf16.gmra.mrb[44].mxu0 %vm1556_vm0, %v815_v63  ;;  %v7508_v50 = vpop.f32.mrb[40].mxu1 }
 0x2af   : > { %2864 = vmatprep.mubr.bf16.mxu0 %v9027_v52  ;;  %v7510_v53 = vpop.f32.mrb[41].mxu1 }
 0x2b0   : > { %v7513_v54 = vpop.f32.mrb[42].mxu1 }
 0x2b1   : > { %v7518_v60 = vpop.f32.mrb[43].mxu1 }
 0x2b6   : > { %5327 = vmatmul.mubr.msk.bf16.gmra.mrb[48].mxu0 %vm1556_vm0, %v822_v10  ;;  %v7520_v63 = vpop.f32.mrb[44].mxu1  ;;  %v542_v10 = vld [vmem:[%s6617_s9 + $0x810] sm:$0xff] }
 0x2b7   : > { %2874 = vmatprep.mubr.bf16.mxu0 %v9027_v52  ;;  %v7522_v6 = vpop.f32.mrb[45].mxu1 }
 0x2b8   : > { %9047 = vst [vmem:[#allocation5_spill] sm:$0xff] %v7522_v6  ;;  %v7525_v7 = vpop.f32.mrb[46].mxu1 }
 0x2b9   : > { %9048 = vst [vmem:[#allocation6_spill] sm:$0xff] %v7525_v7  ;;  %v7530_v16 = vpop.f32.mrb[47].mxu1 }
 0x2ba   : > { %9049 = vst [vmem:[#allocation7_spill] sm:$0xff] %v7530_v16 }
 0x2be   : > { %5328 = vmatmul.mubr.msk.bf16.gmra.mrb[52].mxu0 %vm1556_vm0, %v829_v18  ;;  %v864_v18 = vpack.c.bf16 %v549_v14, %v542_v10  ;;  %v7532_v25 = vpop.f32.mrb[48].mxu1 }
 0x2bf   : > { %2884 = vmatprep.mubr.bf16.mxu0 %v9027_v52  ;;  %9050 = vst [vmem:[#allocation8_spill] sm:$0xff] %v7532_v25  ;;  %v7534_v26 = vpop.f32.mrb[49].mxu1 }
 0x2c0   : > { %9051 = vst [vmem:[#allocation9_spill] sm:$0xff] %v7534_v26 }
 0x2c6   : > { %5329 = vmatmul.mubr.msk.bf16.gmra.mrb[56].mxu0 %vm1556_vm0, %v836_v28  ;;  %v7537_v28 = vpop.f32.mrb[50].mxu1 }
 0x2c7   : > { %2894 = vmatprep.mubr.bf16.mxu0 %v9027_v52  ;;  %9052 = vst [vmem:[#allocation10_spill] sm:$0xff] %v7537_v28  ;;  %v668_v28 = vld [vmem:[%s6617_s9 + $0xc00] sm:$0xff] }
 0x2ce   : > { %5330 = vmatmul.mubr.msk.bf16.gmra.mrb[60].mxu0 %vm1556_vm0, %v843_v39  ;;  %v7542_v39 = vpop.f32.mrb[51].mxu1 }
 0x2cf   : > { %2904 = vmatprep.mubr.bf16.mxu0 %v9027_v52  ;;  %9053 = vst [vmem:[#allocation11_spill] sm:$0xff] %v7542_v39  ;;  %v7544_v45 = vpop.f32.mrb[52].mxu1 }
 0x2d0   : > { %9054 = vst [vmem:[#allocation12_spill] sm:$0xff] %v7544_v45 }
 0x2d6   : > { %5331 = vmatmul.mubr.msk.bf16.gmra.mrb[64].mxu0 %vm1556_vm0, %v850_v49  ;;  %v7546_v49 = vpop.f32.mrb[53].mxu1 }
 0x2d7   : > { %2914 = vmatprep.mubr.bf16.mxu0 %v9027_v52  ;;  %9055 = vst [vmem:[#allocation13_spill] sm:$0xff] %v7546_v49  ;;  %v7549_v57 = vpop.f32.mrb[54].mxu1 }
 0x2d8   : > { %9056 = vst [vmem:[#allocation14_spill] sm:$0xff] %v7549_v57  ;;  %v7554_v10 = vpop.f32.mrb[55].mxu1  ;;  %v591_v57 = vld [vmem:[%s6617_s9 + $0x998] sm:$0xff] }
 0x2d9   : > { %9057 = vst [vmem:[#allocation15_spill] sm:$0xff] %v7554_v10 }
 0x2de   : > { %5332 = vmatmul.mubr.msk.bf16.gmra.mrb[68].mxu0 %vm1556_vm0, %v857_v62  ;;  %v577_v62 = vld [vmem:[%s6617_s9 + $0x928] sm:$0xff] }
 0x2df   : > { %2924 = vmatprep.mubr.bf16.mxu0 %v9027_v52  ;;  %v878_v14 = vpack.c.bf16 %v577_v62, %v570_v58 }
 0x2e6   : > { %5333 = vmatmul.mubr.msk.bf16.gmra.mrb[72].mxu0 %vm1556_vm0, %v864_v18  ;;  %v7556_v18 = vpop.f32.mrb[56].mxu1 }
 0x2e7   : > { %2934 = vmatprep.mubr.bf16.mxu0 %v9027_v52  ;;  %9058 = vst [vmem:[#allocation16_spill] sm:$0xff] %v7556_v18  ;;  %v7558_v35 = vpop.f32.mrb[57].mxu1 }
 0x2e8   : > { %9059 = vst [vmem:[#allocation17_spill] sm:$0xff] %v7558_v35  ;;  %v7561_v37 = vpop.f32.mrb[58].mxu1 }
 0x2e9   : > { %9060 = vst [vmem:[#allocation18_spill] sm:$0xff] %v7561_v37  ;;  %v7566_v49 = vpop.f32.mrb[59].mxu1  ;;  %v605_v37 = vld [vmem:[%s6617_s9 + $0xa08] sm:$0xff] }
 0x2ea   : > { %9061 = vst [vmem:[#allocation19_spill] sm:$0xff] %v7566_v49  ;;  %v7568_v10 = vpop.f32.mrb[60].mxu1 }
 0x2eb   : > { %9062 = vst [vmem:[#allocation20_spill] sm:$0xff] %v7568_v10  ;;  %v7570_v58 = vpop.f32.mrb[61].mxu1 }
 0x2ec   : > { %9063 = vst [vmem:[#allocation21_spill] sm:$0xff] %v7570_v58  ;;  %v7573_v62 = vpop.f32.mrb[62].mxu1 }
 0x2ed   : > { %9064 = vst [vmem:[#allocation22_spill] sm:$0xff] %v7573_v62  ;;  %v7578_v35 = vpop.f32.mrb[63].mxu1  ;;  %v619_v62 = vld [vmem:[%s6617_s9 + $0xa78] sm:$0xff] }
 0x2ee   : > { %5334 = vmatmul.mubr.msk.bf16.gmra.mrb[76].mxu0 %vm1556_vm0, %v871_v44  ;;  %v584_v44 = vld [vmem:[%s6617_s9 + $0x960] sm:$0xff]  ;;  %9065 = vst [vmem:[#allocation23_spill] sm:$0xff] %v7578_v35  ;;  %v7580_v49 = vpop.f32.mrb[64].mxu1 }
 0x2ef   : > { %2944 = vmatprep.mubr.bf16.mxu0 %v9027_v52  ;;  %v885_v45 = vpack.c.bf16 %v591_v57, %v584_v44  ;;  %9066 = vst [vmem:[#allocation24_spill] sm:$0xff] %v7580_v49  ;;  %v7582_v57 = vpop.f32.mrb[65].mxu1 }
 0x2f0   : > { %9067 = vst [vmem:[#allocation25_spill] sm:$0xff] %v7582_v57  ;;  %v7585_v44 = vpop.f32.mrb[66].mxu1 }
 0x2f1   : > { %9068 = vst [vmem:[#allocation26_spill] sm:$0xff] %v7585_v44  ;;  %v7590_v58 = vpop.f32.mrb[67].mxu1  ;;  %v633_v44 = vld [vmem:[%s6617_s9 + $0xae8] sm:$0xff] }
 0x2f2   : > { %9069 = vst [vmem:[#allocation27_spill] sm:$0xff] %v7590_v58  ;;  %v7592_v35 = vpop.f32.mrb[68].mxu1 }
 0x2f3   : > { %9070 = vst [vmem:[#allocation28_spill] sm:$0xff] %v7592_v35  ;;  %v1056_v35 = vlaneseq }
 0x2f6   : > { %5335 = vmatmul.mubr.msk.bf16.gmra.mrb[80].mxu0 %vm1556_vm0, %v878_v14  ;;  %v598_v14 = vld [vmem:[%s6617_s9 + $0x9d0] sm:$0xff] }
 0x2f7   : > { %2954 = vmatprep.mubr.bf16.mxu0 %v9027_v52  ;;  %v892_v18 = vpack.c.bf16 %v605_v37, %v598_v14  ;;  %v7594_v37 = vpop.f32.mrb[69].mxu1 }
 0x2f8   : > { %9071 = vst [vmem:[#allocation29_spill] sm:$0xff] %v7594_v37  ;;  %v7597_v14 = vpop.f32.mrb[70].mxu1 }
 0x2f9   : > { %9072 = vst [vmem:[#allocation30_spill] sm:$0xff] %v7597_v14  ;;  %v7602_v57 = vpop.f32.mrb[71].mxu1  ;;  %v647_v14 = vld [vmem:[%s6617_s9 + $0xb58] sm:$0xff] }
 0x2fa   : > { %9073 = vst [vmem:[#allocation31_spill] sm:$0xff] %v7602_v57  ;;  %v7604_v39 = vpop.f32.mrb[72].mxu1  ;;  %v7616_v57 = vshrl.u32 %v1056_v35, 7  ;;  %v1054_v35 = vld [vmem:[%s9021_s2] sm:$0x3] }
 0x2fb   : > { %9074 = vst [vmem:[#allocation32_spill] sm:$0xff] %v7604_v39 }
 0x2fc   : > { %9078 = vst [vmem:[#allocation36_spill] sm:$0xff] %v7616_v57 }
 0x2fe   : > { %5336 = vmatmul.mubr.msk.bf16.gmra.mrb[84].mxu0 %vm1556_vm0, %v885_v45  ;;  %v612_v45 = vld [vmem:[%s6617_s9 + $0xa40] sm:$0xff] }
 0x2ff   : > { %2964 = vmatprep.mubr.bf16.mxu0 %v9027_v52  ;;  %v899_v10 = vpack.c.bf16 %v619_v62, %v612_v45  ;;  %v7606_v62 = vpop.f32.mrb[73].mxu1 }
 0x300   : > { %9075 = vst [vmem:[#allocation33_spill] sm:$0xff] %v7606_v62  ;;  %v7609_v45 = vpop.f32.mrb[74].mxu1 }
 0x301   : > { %9076 = vst [vmem:[#allocation34_spill] sm:$0xff] %v7609_v45  ;;  %v7614_v37 = vpop.f32.mrb[75].mxu1  ;;  %v661_v45 = vld [vmem:[%s6617_s9 + $0xbc8] sm:$0xff] }
 0x302   : > { %9077 = vst [vmem:[#allocation35_spill] sm:$0xff] %v7614_v37  ;;  %v9086_v37 = vmov 0  }
 0x306   : > { %5337 = vmatmul.mubr.msk.bf16.gmra.mrb[88].mxu0 %vm1556_vm0, %v892_v18  ;;  %v626_v18 = vld [vmem:[%s6617_s9 + $0xab0] sm:$0xff] }
 0x307   : > { %2974 = vmatprep.mubr.bf16.mxu0 %v9027_v52  ;;  %v906_v49 = vpack.c.bf16 %v633_v44, %v626_v18  ;;  %v7618_v44 = vpop.f32.mrb[76].mxu1 }
 0x308   : > { %9079 = vst [vmem:[#allocation37_spill] sm:$0xff] %v7618_v44  ;;  %v7620_v18 = vpop.f32.mrb[77].mxu1 }
 0x309   : > { %9080 = vst [vmem:[#allocation38_spill] sm:$0xff] %v7620_v18  ;;  %v7623_v62 = vpop.f32.mrb[78].mxu1 }
 0x30a   : > { %9081 = vst [vmem:[#allocation39_spill] sm:$0xff] %v7623_v62  ;;  %v7628_v39 = vpop.f32.mrb[79].mxu1 }
 0x30b   : > { %9082 = vst [vmem:[#allocation40_spill] sm:$0xff] %v7628_v39  ;;  %v7639_v62 = vpop.f32.mrb[80].mxu1 }
 0x30c   : > { %9083 = vst [vmem:[#allocation41_spill] sm:$0xff] %v7639_v62  ;;  %v7645_v39 = vpop.f32.mrb[81].mxu1 }
 0x30d   : > { %9084 = vst [vmem:[#allocation42_spill] sm:$0xff] %v7645_v39  ;;  %v7648_v44 = vpop.f32.mrb[82].mxu1 }
 0x30e   : > { %5338 = vmatmul.mubr.msk.bf16.gmra.mrb[92].mxu0 %vm1556_vm0, %v899_v10  ;;  %v640_v10 = vld [vmem:[%s6617_s9 + $0xb20] sm:$0xff]  ;;  %9085 = vst [vmem:[#allocation43_spill] sm:$0xff] %v7648_v44 }
 0x30f   : > { %2984 = vmatprep.mubr.bf16.mxu0 %v9027_v52  ;;  %v913_v58 = vpack.c.bf16 %v647_v14, %v640_v10  ;;  %v9029_v14 = vsub.s32 0, %v7616_v57  ;;  %v9030_v10 = vsub.s32 1, %v7616_v57 }
 0x316   : > { %5339 = vmatmul.mubr.msk.bf16.gmra.mrb[96].mxu0 %vm1556_vm0, %v906_v49  ;;  %v654_v49 = vld [vmem:[%s6617_s9 + $0xb90] sm:$0xff] }
 0x317   : > { %2994 = vmatprep.mubr.bf16.mxu0 %v9027_v52  ;;  %v920_v18 = vpack.c.bf16 %v661_v45, %v654_v49  ;;  %v675_v45 = vld [vmem:[%s6617_s9 + $0xc38] sm:$0xff]  ;;  %v7653_v49 = vpop.f32.mrb[83].mxu1 }
 0x318   : > { %9087 = vst [vmem:[#allocation44_spill] sm:$0xff] %v7653_v49  ;;  %v927_v39 = vpack.c.bf16 %v675_v45, %v668_v28  ;;  %v689_v45 = vld [vmem:[%s6617_s9 + $0xca8] sm:$0xff] }
 0x31e   : > { %5340 = vmatmul.mubr.msk.bf16.gmra.mrb[100].mxu0 %vm1556_vm0, %v913_v58  ;;  %v7637_v58 = vrot.slane %v1054_v35, %v9029_v14 }
 0x31f   : > { %3004 = vmatprep.mubr.bf16.mxu0 %v9027_v52  ;;  %v7643_v52 = vrot.slane %v1054_v35, %v9030_v10 }
 0x320   : > { %v1688_v14 = vadd.f32 %v7355_v55, %v7637_v58  ;;  %v7663_v55 = vpop.f32.mrb[84].mxu1 }
 0x321   : > { %v1690_v35 = vadd.f32 %v7357_v56, %v7643_v52  ;;  %v1694_v49 = vadd.f32 %v7369_v1, %v7643_v52  ;;  %v7665_v6 = vpop.f32.mrb[85].mxu1 }
 0x326   : > { %5341 = vmatmul.mubr.msk.bf16.gmra.mrb[104].mxu0 %vm1556_vm0, %v920_v18  ;;  %v1692_v18 = vadd.f32 %v7362_v59, %v7637_v58  ;;  %v7668_v59 = vpop.f32.mrb[86].mxu1 }
 0x327   : > { %3014 = vmatprep.mubr.bf16.mxu0 %v9086_v37  ;;  %v7673_v1 = vpop.f32.mrb[87].mxu1 }
 0x328   : > { %9088 = vst [vmem:[#allocation45_spill] sm:$0xff] %v7673_v1 }
 0x329   : > { %v2746_v62 = vpop.f32.mrb[0].mxu0 }
 0x32a   : > { %v5403_v10 = vadd.f32 %v2746_v62, %v1688_v14  ;;  %v2748_v57 = vpop.f32.mrb[1].mxu0  ;;  %v682_v14 = vld [vmem:[%s6617_s9 + $0xc70] sm:$0xff] }
 0x32b   : > { %v5405_v44 = vadd.f32 %v2748_v57, %v1690_v35  ;;  %v2750_v26 = vpop.f32.mrb[2].mxu0 }
 0x32c   : > { %v5407_v25 = vadd.f32 %v2750_v26, %v1692_v18  ;;  %v2752_v16 = vpop.f32.mrb[3].mxu0  ;;  %v3065_v56 = vmax.f32 %v5403_v10, 0.0  ;;  %v1702_v10 = vadd.f32 %v7378_v8, %v7637_v58  ;;  %v934_v18 = vpack.c.bf16 %v689_v45, %v682_v14  ;;  %v6153_v8 = vld [vmem:[%s9024_s5 + $0x8] sm:$0xff]  }
 0x32d   : > { %v5409_v7 = vadd.f32 %v2752_v16, %v1694_v49  ;;  %v3066_v28 = vmax.f32 %v5405_v44, 0.0  ;;  %v1698_v16 = vadd.f32 %v7371_v4, %v7637_v58  ;;  %v1704_v4 = vadd.f32 %v7388_v15, %v7643_v52 }
 0x32e   : > { %v3067_v62 = vmax.f32 %v5407_v25, 0.0  ;;  %5342 = vmatmul.mubr.msk.bf16.gmra.mrb[108].mxu0 %vm1556_vm0, %v927_v39  ;;  %v1700_v25 = vadd.f32 %v7373_v5, %v7643_v52  ;;  %v6152_v39 = vld [vmem:[%s9024_s5] sm:$0xff]   ;;  %v7686_v5 = vpop.f32.mrb[88].mxu1 }
 0x32f   : > { %v3068_v57 = vmax.f32 %v5409_v7, 0.0  ;;  %3024 = vmatprep.mubr.bf16.mxu0 %v9086_v37  ;;  %v7691_v14 = vpop.f32.mrb[89].mxu1 }
 0x330   : > { %v3193_v26 = vpack.c.bf16 %v3067_v62, %v3065_v56  ;;  %v7695_v15 = vpop.f32.mrb[90].mxu1 }
 0x331   : > { %v3194_v49 = vpack.c.bf16 %v3068_v57, %v3066_v28  ;;  %v2756_v35 = vpop.f32.mrb[4].mxu0 }
 0x332   : > { %v5411_v7 = vadd.f32 %v2756_v35, %v1698_v16  ;;  %v2758_v44 = vpop.f32.mrb[5].mxu0  ;;  %v696_v35 = vld [vmem:[%s6617_s9 + $0xce0] sm:$0xff] }
 0x333   : > { %v5413_v1 = vadd.f32 %v2758_v44, %v1700_v25  ;;  %v2760_v56 = vpop.f32.mrb[6].mxu0  ;;  %3493 = vmatprep.mubr.bf16.mxu1 %v3194_v49  ;;  %v703_v25 = vld [vmem:[%s6617_s9 + $0xd18] sm:$0xff] }
 0x334   : > { %v5415_v62 = vadd.f32 %v2760_v56, %v1702_v10  ;;  %v2762_v28 = vpop.f32.mrb[7].mxu0  ;;  %3494 = vmatmul.mubr.bf16.vlgmr.msra.gmra.mrb[128].mxu1 %v3193_v26  ;;  %v3069_v45 = vmax.f32 %v5411_v7, 0.0  ;;  %v1708_v10 = vadd.f32 %v7393_v19, %v7637_v58 }
 0x335   : > { %v5417_v57 = vadd.f32 %v2762_v28, %v1704_v4  ;;  %4142 = vmatpush1.bf16.msra.mxu1 %v6152_v39  ;;  %v3070_v49 = vmax.f32 %v5413_v1, 0.0  ;;  %v7700_v39 = vpop.f32.mrb[91].mxu1  ;;  %v6154_v1 = vld [vmem:[%s9024_s5 + $0x10] sm:$0xff]   ;;  %v1712_v28 = vadd.f32 %v7400_v23, %v7637_v58  ;;  %v6155_v23 = vld [vmem:[%s9024_s5 + $0x18] sm:$0xff]  }
 0x336   : > { %v3071_v16 = vmax.f32 %v5415_v62, 0.0  ;;  %5343 = vmatmul.mubr.msk.bf16.gmra.mrb[112].mxu0 %vm1556_vm0, %v934_v18  ;;  %4143 = vmatprep.subr.bf16.mxu1 %v9086_v37  ;;  %v1710_v18 = vadd.f32 %v7395_v20, %v7643_v52 }
 0x337   : > { %v3072_v26 = vmax.f32 %v5417_v57, 0.0  ;;  %3034 = vmatprep.mubr.bf16.mxu0 %v9086_v37  ;;  %v941_v57 = vpack.c.bf16 %v703_v25, %v696_v35 }
 0x338   : > { %v3195_v44 = vpack.c.bf16 %v3071_v16, %v3069_v45  ;;  %v1714_v16 = vadd.f32 %v7407_v29, %v7643_v52 }
 0x339   : > { %v3196_v7 = vpack.c.bf16 %v3072_v26, %v3070_v49  ;;  %v2766_v56 = vpop.f32.mrb[8].mxu0  ;;  %4144 = vmatpush1.bf16.msra.mxu1 %v6153_v8  ;;  %v7714_v49 = vpop.f32.mrb[92].mxu1 }
 0x33a   : > { %v5419_v4 = vadd.f32 %v2766_v56, %v1708_v10  ;;  %v2768_v62 = vpop.f32.mrb[9].mxu0  ;;  %4145 = vmatprep.subr.bf16.mxu1 %v9086_v37  ;;  %v7719_v35 = vpop.f32.mrb[93].mxu1  ;;  %v710_v56 = vld [vmem:[%s6617_s9 + $0xd50] sm:$0xff] }
 0x33b   : > { %v5421_v45 = vadd.f32 %v2768_v62, %v1710_v18  ;;  %v2770_v19 = vpop.f32.mrb[10].mxu0  ;;  %3503 = vmatprep.mubr.bf16.mxu1 %v3196_v7  ;;  %v7723_v29 = vpop.f32.mrb[94].mxu1  ;;  %v717_v18 = vld [vmem:[%s6617_s9 + $0xd88] sm:$0xff] }
 0x33c   : > { %v5423_v20 = vadd.f32 %v2770_v19, %v1712_v28  ;;  %v2772_v8 = vpop.f32.mrb[11].mxu0  ;;  %3504 = vmatmul.mubr.bf16.gmra.mrb[132].mxu1 %v3195_v44  ;;  %v3073_v25 = vmax.f32 %v5419_v4, 0.0  ;;  %v1718_v28 = vadd.f32 %v7409_v32, %v7637_v58 }
 0x33d   : > { %v5425_v26 = vadd.f32 %v2772_v8, %v1714_v16  ;;  %4146 = vmatpush1.bf16.msra.mxu1 %v6154_v1  ;;  %v3074_v7 = vmax.f32 %v5421_v45, 0.0  ;;  %v7728_v1 = vpop.f32.mrb[95].mxu1  ;;  %v6156_v45 = vld [vmem:[%s9024_s5 + $0x20] sm:$0xff]   ;;  %v1722_v8 = vadd.f32 %v7416_v36, %v7637_v58  ;;  %v6157_v36 = vld [vmem:[%s9024_s5 + $0x28] sm:$0xff]  }
 0x33e   : > { %v3075_v10 = vmax.f32 %v5423_v20, 0.0  ;;  %5344 = vmatmul.mubr.msk.bf16.gmra.mrb[116].mxu0 %vm1556_vm0, %v941_v57  ;;  %4147 = vmatprep.subr.bf16.mxu1 %v9086_v37  ;;  %v1720_v57 = vadd.f32 %v7411_v33, %v7643_v52 }
 0x33f   : > { %v3076_v44 = vmax.f32 %v5425_v26, 0.0  ;;  %3044 = vmatprep.mubr.bf16.mxu0 %v9086_v37  ;;  %v948_v26 = vpack.c.bf16 %v717_v18, %v710_v56 }
 0x340   : > { %v3197_v62 = vpack.c.bf16 %v3075_v10, %v3073_v25  ;;  %v1724_v10 = vadd.f32 %v7426_v43, %v7643_v52 }
 0x341   : > { %v3198_v4 = vpack.c.bf16 %v3076_v44, %v3074_v7  ;;  %v2776_v19 = vpop.f32.mrb[12].mxu0  ;;  %4148 = vmatpush1.bf16.msra.mxu1 %v6155_v23  ;;  %v7742_v7 = vpop.f32.mrb[96].mxu1 }
 0x342   : > { %v5427_v16 = vadd.f32 %v2776_v19, %v1718_v28  ;;  %v2778_v20 = vpop.f32.mrb[13].mxu0  ;;  %4149 = vmatprep.subr.bf16.mxu1 %v9086_v37  ;;  %v7747_v56 = vpop.f32.mrb[97].mxu1  ;;  %v724_v19 = vld [vmem:[%s6617_s9 + $0xdc0] sm:$0xff] }
 0x343   : > { %v5429_v25 = vadd.f32 %v2778_v20, %v1720_v57  ;;  %v2780_v32 = vpop.f32.mrb[14].mxu0  ;;  %3513 = vmatprep.mubr.bf16.mxu1 %v3198_v4  ;;  %v7751_v43 = vpop.f32.mrb[98].mxu1  ;;  %v731_v57 = vld [vmem:[%s6617_s9 + $0xdf8] sm:$0xff] }
 0x344   : > { %v5431_v33 = vadd.f32 %v2780_v32, %v1722_v8  ;;  %v2782_v23 = vpop.f32.mrb[15].mxu0  ;;  %3514 = vmatmul.mubr.bf16.gmra.mrb[136].mxu1 %v3197_v62  ;;  %v3077_v18 = vmax.f32 %v5427_v16, 0.0  ;;  %v1728_v8 = vadd.f32 %v7432_v47, %v7637_v58 }
 0x345   : > { %v5433_v44 = vadd.f32 %v2782_v23, %v1724_v10  ;;  %4150 = vmatpush1.bf16.msra.mxu1 %v6156_v45  ;;  %v3078_v4 = vmax.f32 %v5429_v25, 0.0  ;;  %v7756_v45 = vpop.f32.mrb[99].mxu1  ;;  %v6158_v25 = vld [vmem:[%s9024_s5 + $0x30] sm:$0xff]   ;;  %v1732_v23 = vadd.f32 %v7439_v51, %v7637_v58  ;;  %v6159_v51 = vld [vmem:[%s9024_s5 + $0x38] sm:$0xff]  }
 0x346   : > { %v3079_v28 = vmax.f32 %v5431_v33, 0.0  ;;  %5345 = vmatmul.mubr.msk.bf16.gmra.mrb[120].mxu0 %vm1556_vm0, %v948_v26  ;;  %4151 = vmatprep.subr.bf16.mxu1 %v9086_v37  ;;  %v1730_v26 = vadd.f32 %v7434_v48, %v7643_v52 }
 0x347   : > { %v3080_v62 = vmax.f32 %v5433_v44, 0.0  ;;  %3054 = vmatprep.mubr.bf16.mxu0 %v9086_v37  ;;  %v955_v44 = vpack.c.bf16 %v731_v57, %v724_v19 }
 0x348   : > { %v3199_v20 = vpack.c.bf16 %v3079_v28, %v3077_v18  ;;  %v1734_v28 = vadd.f32 %v7446_v61, %v7643_v52 }
 0x349   : > { %v3200_v16 = vpack.c.bf16 %v3080_v62, %v3078_v4  ;;  %v2786_v32 = vpop.f32.mrb[16].mxu0  ;;  %4152 = vmatpush1.bf16.msra.mxu1 %v6157_v36  ;;  %v7770_v4 = vpop.f32.mrb[100].mxu1 }
 0x34a   : > { %v5435_v10 = vadd.f32 %v2786_v32, %v1728_v8  ;;  %v2788_v33 = vpop.f32.mrb[17].mxu0  ;;  %4153 = vmatprep.subr.bf16.mxu1 %v9086_v37  ;;  %v7775_v19 = vpop.f32.mrb[101].mxu1 }
 0x34b   : > { %v5437_v18 = vadd.f32 %v2788_v33, %v1730_v26  ;;  %v2790_v47 = vpop.f32.mrb[18].mxu0  ;;  %3523 = vmatprep.mubr.bf16.mxu1 %v3200_v16  ;;  %v7779_v61 = vpop.f32.mrb[102].mxu1 }
 0x34c   : > { %v5439_v48 = vadd.f32 %v2790_v47, %v1732_v23  ;;  %v2792_v36 = vpop.f32.mrb[19].mxu0  ;;  %3524 = vmatmul.mubr.bf16.gmra.mrb[140].mxu1 %v3199_v20  ;;  %v3081_v57 = vmax.f32 %v5435_v10, 0.0  ;;  %v7781_v32 = vpop.f32.mrb[103].mxu1  ;;  %v1740_v10 = vadd.f32 %v7450_v2, %v7643_v52 }
 0x34d   : > { %v5441_v62 = vadd.f32 %v2792_v36, %v1734_v28  ;;  %4154 = vmatpush1.bf16.msra.mxu1 %v6158_v25  ;;  %v3082_v16 = vmax.f32 %v5437_v18, 0.0  ;;  %v1738_v25 = vadd.f32 %v7448_v0, %v7637_v58  ;;  %v1742_v18 = vadd.f32 %v7453_v3, %v7637_v58 }
 0x34e   : > { %v3083_v8 = vmax.f32 %v5439_v48, 0.0  ;;  %5346 = vmatmul.mubr.msk.bf16.gmra.mrb[124].mxu0 %vm1556_vm0, %v955_v44  ;;  %4155 = vmatprep.subr.bf16.mxu1 %v9086_v37  ;;  %v6160_v44 = vld [vmem:[%s9024_s5 + $0x40] sm:$0xff]   ;;  %v1744_v0 = vadd.f32 %v7458_v9, %v7643_v52 }
 0x34f   : > { %v3084_v20 = vmax.f32 %v5441_v62, 0.0 }
 0x350   : > { %v3201_v26 = vpack.c.bf16 %v3083_v8, %v3081_v57  ;;  %v6161_v8 = vld [vmem:[%s9024_s5 + $0x48] sm:$0xff]  }
 0x351   : > { %v3202_v33 = vpack.c.bf16 %v3084_v20, %v3082_v16  ;;  %v2796_v23 = vpop.f32.mrb[20].mxu0  ;;  %4156 = vmatpush1.bf16.msra.mxu1 %v6159_v51  ;;  %v7795_v51 = vpop.f32.mrb[104].mxu1 }
 0x352   : > { %v5443_v47 = vadd.f32 %v2796_v23, %v1738_v25  ;;  %v2798_v28 = vpop.f32.mrb[21].mxu0  ;;  %4157 = vmatprep.subr.bf16.mxu1 %v9086_v37  ;;  %v7800_v3 = vpop.f32.mrb[105].mxu1 }
 0x353   : > { %v5445_v48 = vadd.f32 %v2798_v28, %v1740_v10  ;;  %v2800_v36 = vpop.f32.mrb[22].mxu0  ;;  %3533 = vmatprep.mubr.bf16.mxu1 %v3202_v33  ;;  %v7803_v25 = vpop.f32.mrb[106].mxu1  ;;  %v1748_v10 = vadd.f32 %v7460_v11, %v7637_v58  ;;  %v1754_v11 = vadd.f32 %v7470_v17, %v7643_v52 }
 0x354   : > { %v5447_v62 = vadd.f32 %v2800_v36, %v1742_v18  ;;  %v2802_v2 = vpop.f32.mrb[23].mxu0  ;;  %3534 = vmatmul.mubr.bf16.gmra.mrb[144].mxu1 %v3201_v26  ;;  %v3085_v16 = vmax.f32 %v5443_v47, 0.0  ;;  %v7805_v23 = vpop.f32.mrb[107].mxu1  ;;  %v1750_v18 = vadd.f32 %v7462_v12, %v7643_v52  ;;  %v6162_v47 = vld [vmem:[%s9024_s5 + $0x50] sm:$0xff]  }
 0x355   : > { %v5449_v57 = vadd.f32 %v2802_v2, %v1744_v0  ;;  %4158 = vmatpush1.bf16.msra.mxu1 %v6160_v44  ;;  %v3086_v9 = vmax.f32 %v5445_v48, 0.0  ;;  %v1752_v48 = vadd.f32 %v7465_v13, %v7637_v58 }
 0x356   : > { %v3087_v20 = vmax.f32 %v5447_v62, 0.0  ;;  %4159 = vmatprep.subr.bf16.mxu1 %v9086_v37 }
 0x357   : > { %v3088_v33 = vmax.f32 %v5449_v57, 0.0 }
 0x358   : > { %v3203_v26 = vpack.c.bf16 %v3087_v20, %v3085_v16 }
 0x359   : > { %v3204_v44 = vpack.c.bf16 %v3088_v33, %v3086_v9  ;;  %v2806_v28 = vpop.f32.mrb[24].mxu0  ;;  %4160 = vmatpush1.bf16.msra.mxu1 %v6161_v8  ;;  %v7819_v8 = vpop.f32.mrb[108].mxu1 }
 0x35a   : > { %v5451_v36 = vadd.f32 %v2806_v28, %v1748_v10  ;;  %v2808_v0 = vpop.f32.mrb[25].mxu0  ;;  %4161 = vmatprep.subr.bf16.mxu1 %v9086_v37  ;;  %v7821_v20 = vpop.f32.mrb[109].mxu1 }
 0x35b   : > { %v5453_v62 = vadd.f32 %v2808_v0, %v1750_v18  ;;  %v2810_v2 = vpop.f32.mrb[26].mxu0  ;;  %3543 = vmatprep.mubr.bf16.mxu1 %v3204_v44  ;;  %v7823_v13 = vpop.f32.mrb[110].mxu1 }
 0x35c   : > { %v5455_v57 = vadd.f32 %v2810_v2, %v1752_v48  ;;  %v2812_v12 = vpop.f32.mrb[27].mxu0  ;;  %3544 = vmatmul.mubr.bf16.gmra.mrb[148].mxu1 %v3203_v26  ;;  %v3089_v9 = vmax.f32 %v5451_v36, 0.0  ;;  %v7826_v28 = vpop.f32.mrb[111].mxu1  ;;  %v1758_v26 = vadd.f32 %v7472_v21, %v7637_v58  ;;  %v1762_v2 = vadd.f32 %v7477_v24, %v7637_v58 }
 0x35d   : > { %v5457_v16 = vadd.f32 %v2812_v12, %v1754_v11  ;;  %4162 = vmatpush1.bf16.msra.mxu1 %v6162_v47  ;;  %v3090_v10 = vmax.f32 %v5453_v62, 0.0  ;;  %v1760_v47 = vadd.f32 %v7474_v22, %v7643_v52  ;;  %v1764_v62 = vadd.f32 %v7482_v27, %v7643_v52  ;;  %v7836_v21 = vpop.f32.mrb[112].mxu1 }
 0x35e   : > { %v3091_v33 = vmax.f32 %v5455_v57, 0.0  ;;  %4163 = vmatprep.subr.bf16.mxu1 %v9086_v37  ;;  %v1768_v27 = vadd.f32 %v7484_v30, %v7637_v58  ;;  %v1774_v30 = vadd.f32 %v7494_v38, %v7643_v52 }
 0x35f   : > { %v3092_v44 = vmax.f32 %v5457_v16, 0.0 }
 0x360   : > { %v3205_v17 = vpack.c.bf16 %v3091_v33, %v3089_v9  ;;  %v7838_v33 = vpop.f32.mrb[113].mxu1 }
 0x361   : > { %v3206_v18 = vpack.c.bf16 %v3092_v44, %v3090_v10  ;;  %v2816_v0 = vpop.f32.mrb[28].mxu0  ;;  %v7840_v44 = vpop.f32.mrb[114].mxu1 }
 0x362   : > { %v5459_v48 = vadd.f32 %v2816_v0, %v1758_v26  ;;  %v2818_v36 = vpop.f32.mrb[29].mxu0  ;;  %v7842_v0 = vpop.f32.mrb[115].mxu1 }
 0x363   : > { %v5461_v11 = vadd.f32 %v2818_v36, %v1760_v47  ;;  %v2820_v57 = vpop.f32.mrb[30].mxu0  ;;  %3553 = vmatprep.mubr.bf16.mxu1 %v3206_v18 }
 0x364   : > { %v5463_v12 = vadd.f32 %v2820_v57, %v1762_v2  ;;  %v2822_v16 = vpop.f32.mrb[31].mxu0  ;;  %3554 = vmatmul.mubr.bf16.gmra.mrb[152].mxu1 %v3205_v17  ;;  %v3093_v22 = vmax.f32 %v5459_v48, 0.0  ;;  %v1770_v17 = vadd.f32 %v7486_v31, %v7643_v52  ;;  %v6163_v48 = vld [vmem:[%s9024_s5 + $0x58] sm:$0xff]   ;;  %v7855_v31 = vpop.f32.mrb[116].mxu1 }
 0x365   : > { %v5465_v9 = vadd.f32 %v2822_v16, %v1764_v62  ;;  %v3094_v26 = vmax.f32 %v5461_v11, 0.0  ;;  %v1772_v11 = vadd.f32 %v7489_v34, %v7637_v58  ;;  %4164 = vmatpush1.bf16.msra.mxu1 %v6163_v48 }
 0x366   : > { %v3095_v10 = vmax.f32 %v5463_v12, 0.0  ;;  %4165 = vmatprep.subr.bf16.mxu1 %v9086_v37 }
 0x367   : > { %v3096_v24 = vmax.f32 %v5465_v9, 0.0 }
 0x368   : > { %v3207_v18 = vpack.c.bf16 %v3095_v10, %v3093_v22  ;;  %v7858_v10 = vpop.f32.mrb[117].mxu1 }
 0x369   : > { %v3208_v47 = vpack.c.bf16 %v3096_v24, %v3094_v26  ;;  %v2826_v36 = vpop.f32.mrb[32].mxu0  ;;  %v7860_v34 = vpop.f32.mrb[118].mxu1 }
 0x36a   : > { %v5467_v2 = vadd.f32 %v2826_v36, %v1768_v27  ;;  %v2828_v57 = vpop.f32.mrb[33].mxu0  ;;  %v7862_v36 = vpop.f32.mrb[119].mxu1 }
 0x36b   : > { %v5469_v62 = vadd.f32 %v2828_v57, %v1770_v17  ;;  %v2830_v12 = vpop.f32.mrb[34].mxu0  ;;  %3563 = vmatprep.mubr.bf16.mxu1 %v3208_v47  ;;  %v1778_v17 = vadd.f32 %v7496_v40, %v7637_v58  ;;  %v1780_v57 = vadd.f32 %v7498_v41, %v7643_v52  ;;  %v7872_v40 = vpop.f32.mrb[120].mxu1 }
 0x36c   : > { %v5471_v16 = vadd.f32 %v2830_v12, %v1772_v11  ;;  %v2832_v9 = vpop.f32.mrb[35].mxu0  ;;  %3564 = vmatmul.mubr.bf16.gmra.mrb[156].mxu1 %v3207_v18  ;;  %v3097_v26 = vmax.f32 %v5467_v2, 0.0  ;;  %v1782_v2 = vadd.f32 %v7501_v42, %v7637_v58 }
 0x36d   : > { %v5473_v22 = vadd.f32 %v2832_v9, %v1774_v30  ;;  %v3098_v27 = vmax.f32 %v5469_v62, 0.0  ;;  %v1784_v62 = vadd.f32 %v7506_v46, %v7643_v52  ;;  %v1788_v46 = vadd.f32 %v7508_v50, %v7637_v58 }
 0x36e   : > { %v3099_v24 = vmax.f32 %v5471_v16, 0.0  ;;  %v1794_v50 = vadd.f32 %v7518_v60, %v7643_v52 }
 0x36f   : > { %v3100_v47 = vmax.f32 %v5473_v22, 0.0 }
 0x370   : > { %v3209_v38 = vpack.c.bf16 %v3099_v24, %v3097_v26  ;;  %v7874_v24 = vpop.f32.mrb[121].mxu1 }
 0x371   : > { %v3210_v18 = vpack.c.bf16 %v3100_v47, %v3098_v27  ;;  %v2836_v48 = vpop.f32.mrb[36].mxu0  ;;  %v7876_v47 = vpop.f32.mrb[122].mxu1 }
 0x372   : > { %v5475_v11 = vadd.f32 %v2836_v48, %v1778_v17  ;;  %v2838_v12 = vpop.f32.mrb[37].mxu0  ;;  %v7878_v48 = vpop.f32.mrb[123].mxu1 }
 0x373   : > { %v5477_v30 = vadd.f32 %v2838_v12, %v1780_v57  ;;  %v2840_v16 = vpop.f32.mrb[38].mxu0  ;;  %3573 = vmatprep.mubr.bf16.mxu1 %v3210_v18 }
 0x374   : > { %v5479_v9 = vadd.f32 %v2840_v16, %v1782_v2  ;;  %v2842_v22 = vpop.f32.mrb[39].mxu0  ;;  %3574 = vmatmul.mubr.bf16.gmra.mrb[160].mxu1 %v3209_v38  ;;  %v3101_v41 = vmax.f32 %v5475_v11, 0.0  ;;  %v1790_v38 = vadd.f32 %v7510_v53, %v7643_v52  ;;  %v6164_v11 = vld [vmem:[%s9024_s5 + $0x60] sm:$0xff]   ;;  %v7891_v53 = vpop.f32.mrb[124].mxu1 }
 0x375   : > { %v5481_v26 = vadd.f32 %v2842_v22, %v1784_v62  ;;  %v3102_v17 = vmax.f32 %v5477_v30, 0.0  ;;  %v1792_v30 = vadd.f32 %v7513_v54, %v7637_v58  ;;  %4166 = vmatpush1.bf16.msra.mxu1 %v6164_v11  ;;  %9089 = vst [vmem:[#allocation46_spill] sm:$0xff] %v7891_v53 }
 0x376   : > { %v3103_v27 = vmax.f32 %v5479_v9, 0.0  ;;  %4167 = vmatprep.subr.bf16.mxu1 %v9086_v37 }
 0x377   : > { %v3104_v42 = vmax.f32 %v5481_v26, 0.0 }
 0x378   : > { %v3211_v18 = vpack.c.bf16 %v3103_v27, %v3101_v41  ;;  %v7894_v27 = vpop.f32.mrb[125].mxu1 }
 0x379   : > { %v3212_v57 = vpack.c.bf16 %v3104_v42, %v3102_v17  ;;  %v2846_v12 = vpop.f32.mrb[40].mxu0  ;;  %9090 = vst [vmem:[#allocation47_spill] sm:$0xff] %v7894_v27  ;;  %v7896_v54 = vpop.f32.mrb[126].mxu1 }
 0x37a   : > { %v5483_v2 = vadd.f32 %v2846_v12, %v1788_v46  ;;  %v2848_v16 = vpop.f32.mrb[41].mxu0  ;;  %9091 = vst [vmem:[#allocation48_spill] sm:$0xff] %v7896_v54  ;;  %v7898_v12 = vpop.f32.mrb[127].mxu1 }
 0x37b   : > { %v5485_v62 = vadd.f32 %v2848_v16, %v1790_v38  ;;  %v2850_v9 = vpop.f32.mrb[42].mxu0  ;;  %3583 = vmatprep.mubr.bf16.mxu1 %v3212_v57  ;;  %9092 = vst [vmem:[#allocation49_spill] sm:$0xff] %v7898_v12  ;;  %v1798_v38 = vadd.f32 %v7520_v63, %v7637_v58  ;;  %v9093_v16 = vld [vmem:[#allocation5_spill] sm:$0xff] }
 0x37c   : > { %v5487_v22 = vadd.f32 %v2850_v9, %v1792_v30  ;;  %v2852_v26 = vpop.f32.mrb[43].mxu0  ;;  %3584 = vmatmul.mubr.bf16.gmra.mrb[164].mxu1 %v3211_v18  ;;  %v3105_v17 = vmax.f32 %v5483_v2, 0.0  ;;  %v1800_v30 = vadd.f32 %v9093_v16, %v7643_v52  ;;  %v9094_v2 = vld [vmem:[#allocation6_spill] sm:$0xff] }
 0x37d   : > { %v5489_v41 = vadd.f32 %v2852_v26, %v1794_v50  ;;  %v3106_v46 = vmax.f32 %v5485_v62, 0.0  ;;  %v9095_v62 = vld [vmem:[#allocation7_spill] sm:$0xff] }
 0x37e   : > { %v3107_v42 = vmax.f32 %v5487_v22, 0.0  ;;  %v1802_v22 = vadd.f32 %v9094_v2, %v7637_v58 }
 0x37f   : > { %v3108_v57 = vmax.f32 %v5489_v41, 0.0  ;;  %v1804_v41 = vadd.f32 %v9095_v62, %v7643_v52 }
 0x380   : > { %v3213_v60 = vpack.c.bf16 %v3107_v42, %v3105_v17 }
 0x381   : > { %v3214_v18 = vpack.c.bf16 %v3108_v57, %v3106_v46  ;;  %v2856_v11 = vpop.f32.mrb[44].mxu0 }
 0x382   : > { %v5491_v9 = vadd.f32 %v2856_v11, %v1798_v38  ;;  %v2858_v50 = vpop.f32.mrb[45].mxu0  ;;  %v9096_v38 = vld [vmem:[#allocation8_spill] sm:$0xff] }
 0x383   : > { %v5493_v26 = vadd.f32 %v2858_v50, %v1800_v30  ;;  %v2860_v54 = vpop.f32.mrb[46].mxu0  ;;  %3593 = vmatprep.mubr.bf16.mxu1 %v3214_v18  ;;  %v1808_v11 = vadd.f32 %v9096_v38, %v7637_v58  ;;  %v9097_v30 = vld [vmem:[#allocation9_spill] sm:$0xff] }
 0x384   : > { %v5495_v17 = vadd.f32 %v2860_v54, %v1802_v22  ;;  %v2862_v42 = vpop.f32.mrb[47].mxu0  ;;  %3594 = vmatmul.mubr.bf16.gmra.mrb[168].mxu1 %v3213_v60  ;;  %v3109_v46 = vmax.f32 %v5491_v9, 0.0  ;;  %v1810_v18 = vadd.f32 %v9097_v30, %v7643_v52  ;;  %v6165_v54 = vld [vmem:[%s9024_s5 + $0x68] sm:$0xff]  }
 0x385   : > { %v5497_v63 = vadd.f32 %v2862_v42, %v1804_v41  ;;  %v3110_v12 = vmax.f32 %v5493_v26, 0.0  ;;  %v9098_v9 = vld [vmem:[#allocation10_spill] sm:$0xff]  ;;  %v9099_v41 = vld [vmem:[#allocation11_spill] sm:$0xff]  ;;  %4168 = vmatpush1.bf16.msra.mxu1 %v6165_v54 }
 0x386   : > { %v3111_v57 = vmax.f32 %v5495_v17, 0.0  ;;  %v1812_v22 = vadd.f32 %v9098_v9, %v7637_v58  ;;  %v1814_v17 = vadd.f32 %v9099_v41, %v7643_v52  ;;  %4169 = vmatprep.subr.bf16.mxu1 %v9086_v37 }
 0x387   : > { %v3112_v27 = vmax.f32 %v5497_v63, 0.0 }
 0x388   : > { %v3215_v16 = vpack.c.bf16 %v3111_v57, %v3109_v46 }
 0x389   : > { %v3216_v53 = vpack.c.bf16 %v3112_v27, %v3110_v12  ;;  %v2866_v2 = vpop.f32.mrb[48].mxu0 }
 0x38a   : > { %v5499_v50 = vadd.f32 %v2866_v2, %v1808_v11  ;;  %v2868_v60 = vpop.f32.mrb[49].mxu0  ;;  %v9100_v2 = vld [vmem:[#allocation12_spill] sm:$0xff] }
 0x38b   : > { %v5501_v26 = vadd.f32 %v2868_v60, %v1810_v18  ;;  %v2870_v62 = vpop.f32.mrb[50].mxu0  ;;  %3603 = vmatprep.mubr.bf16.mxu1 %v3216_v53  ;;  %v1818_v30 = vadd.f32 %v9100_v2, %v7637_v58  ;;  %v9101_v60 = vld [vmem:[#allocation13_spill] sm:$0xff] }
 0x38c   : > { %v5503_v27 = vadd.f32 %v2870_v62, %v1812_v22  ;;  %v2872_v12 = vpop.f32.mrb[51].mxu0  ;;  %3604 = vmatmul.mubr.bf16.gmra.mrb[172].mxu1 %v3215_v16  ;;  %v3113_v63 = vmax.f32 %v5499_v50, 0.0  ;;  %v1820_v9 = vadd.f32 %v9101_v60, %v7643_v52  ;;  %v9102_v16 = vld [vmem:[#allocation14_spill] sm:$0xff]  ;;  %v9103_v50 = vld [vmem:[#allocation15_spill] sm:$0xff] }
 0x38d   : > { %v5505_v42 = vadd.f32 %v2872_v12, %v1814_v17  ;;  %v3114_v57 = vmax.f32 %v5501_v26, 0.0  ;;  %v1822_v62 = vadd.f32 %v9102_v16, %v7637_v58  ;;  %v1824_v26 = vadd.f32 %v9103_v50, %v7643_v52 }
 0x38e   : > { %v3115_v46 = vmax.f32 %v5503_v27, 0.0 }
 0x38f   : > { %v3116_v38 = vmax.f32 %v5505_v42, 0.0 }
 0x390   : > { %v3217_v11 = vpack.c.bf16 %v3115_v46, %v3113_v63 }
 0x391   : > { %v3218_v18 = vpack.c.bf16 %v3116_v38, %v3114_v57  ;;  %v2876_v53 = vpop.f32.mrb[52].mxu0 }
 0x392   : > { %v5507_v54 = vadd.f32 %v2876_v53, %v1818_v30  ;;  %v2878_v22 = vpop.f32.mrb[53].mxu0  ;;  %v9104_v30 = vld [vmem:[#allocation16_spill] sm:$0xff] }
 0x393   : > { %v5509_v41 = vadd.f32 %v2878_v22, %v1820_v9  ;;  %v2880_v17 = vpop.f32.mrb[54].mxu0  ;;  %3613 = vmatprep.mubr.bf16.mxu1 %v3218_v18  ;;  %v1828_v53 = vadd.f32 %v9104_v30, %v7637_v58  ;;  %v9105_v9 = vld [vmem:[#allocation17_spill] sm:$0xff]  ;;  %v6166_v22 = vld [vmem:[%s9024_s5 + $0x70] sm:$0xff]  }
 0x394   : > { %v5511_v27 = vadd.f32 %v2880_v17, %v1822_v62  ;;  %v2882_v12 = vpop.f32.mrb[55].mxu0  ;;  %3614 = vmatmul.mubr.bf16.gmra.mrb[176].mxu1 %v3217_v11  ;;  %v3117_v63 = vmax.f32 %v5507_v54, 0.0  ;;  %v1830_v18 = vadd.f32 %v9105_v9, %v7643_v52  ;;  %v9106_v54 = vld [vmem:[#allocation18_spill] sm:$0xff] }
 0x395   : > { %v5513_v42 = vadd.f32 %v2882_v12, %v1824_v26  ;;  %v3118_v57 = vmax.f32 %v5509_v41, 0.0  ;;  %v1832_v17 = vadd.f32 %v9106_v54, %v7637_v58  ;;  %v9107_v26 = vld [vmem:[#allocation19_spill] sm:$0xff]  ;;  %4170 = vmatpush1.bf16.msra.mxu1 %v6166_v22 }
 0x396   : > { %v3119_v46 = vmax.f32 %v5511_v27, 0.0  ;;  %v1834_v27 = vadd.f32 %v9107_v26, %v7643_v52  ;;  %4171 = vmatprep.subr.bf16.mxu1 %v9086_v37 }
 0x397   : > { %v3120_v38 = vmax.f32 %v5513_v42, 0.0 }
 0x398   : > { %v3219_v2 = vpack.c.bf16 %v3119_v46, %v3117_v63 }
 0x399   : > { %v3220_v60 = vpack.c.bf16 %v3120_v38, %v3118_v57  ;;  %v2886_v16 = vpop.f32.mrb[56].mxu0 }
 0x39a   : > { %v5515_v62 = vadd.f32 %v2886_v16, %v1828_v53  ;;  %v2888_v11 = vpop.f32.mrb[57].mxu0  ;;  %v9108_v16 = vld [vmem:[#allocation20_spill] sm:$0xff] }
 0x39b   : > { %v5517_v41 = vadd.f32 %v2888_v11, %v1830_v18  ;;  %v2890_v50 = vpop.f32.mrb[58].mxu0  ;;  %3623 = vmatprep.mubr.bf16.mxu1 %v3220_v60  ;;  %v1838_v9 = vadd.f32 %v9108_v16, %v7637_v58  ;;  %v9109_v11 = vld [vmem:[#allocation21_spill] sm:$0xff]  ;;  %v9112_v16 = vld [vmem:[#allocation24_spill] sm:$0xff] }
 0x39c   : > { %v5519_v12 = vadd.f32 %v2890_v50, %v1832_v17  ;;  %v2892_v42 = vpop.f32.mrb[59].mxu0  ;;  %3624 = vmatmul.mubr.bf16.gmra.mrb[180].mxu1 %v3219_v2  ;;  %v3121_v46 = vmax.f32 %v5515_v62, 0.0  ;;  %v1840_v54 = vadd.f32 %v9109_v11, %v7643_v52  ;;  %v9110_v2 = vld [vmem:[#allocation22_spill] sm:$0xff]  ;;  %v9111_v62 = vld [vmem:[#allocation23_spill] sm:$0xff] }
 0x39d   : > { %v5521_v63 = vadd.f32 %v2892_v42, %v1834_v27  ;;  %v3122_v38 = vmax.f32 %v5517_v41, 0.0  ;;  %v1842_v50 = vadd.f32 %v9110_v2, %v7637_v58  ;;  %v1844_v41 = vadd.f32 %v9111_v62, %v7643_v52  ;;  %v9115_v62 = vld [vmem:[#allocation27_spill] sm:$0xff] }
 0x39e   : > { %v3123_v57 = vmax.f32 %v5519_v12, 0.0 }
 0x39f   : > { %v3124_v30 = vmax.f32 %v5521_v63, 0.0 }
 0x3a0   : > { %v3221_v53 = vpack.c.bf16 %v3123_v57, %v3121_v46 }
 0x3a1   : > { %v3222_v18 = vpack.c.bf16 %v3124_v30, %v3122_v38  ;;  %v2896_v60 = vpop.f32.mrb[60].mxu0 }
 0x3a2   : > { %v5523_v22 = vadd.f32 %v2896_v60, %v1838_v9  ;;  %v2898_v17 = vpop.f32.mrb[61].mxu0  ;;  %v1848_v9 = vadd.f32 %v9112_v16, %v7637_v58 }
 0x3a3   : > { %v5525_v37 = vadd.f32 %v2898_v17, %v1840_v54  ;;  %v2900_v26 = vpop.f32.mrb[62].mxu0  ;;  %3633 = vmatprep.mubr.bf16.mxu1 %v3222_v18  ;;  %v9113_v54 = vld [vmem:[#allocation25_spill] sm:$0xff]  ;;  %v6167_v17 = vld [vmem:[%s9024_s5 + $0x78] sm:$0xff]  }
 0x3a4   : > { %v5527_v27 = vadd.f32 %v2900_v26, %v1842_v50  ;;  %v2902_v12 = vpop.f32.mrb[63].mxu0  ;;  %3634 = vmatmul.mubr.bf16.gmra.mrb[184].mxu1 %v3221_v53  ;;  %v3125_v63 = vmax.f32 %v5523_v22, 0.0  ;;  %v1850_v18 = vadd.f32 %v9113_v54, %v7643_v52  ;;  %v9114_v22 = vld [vmem:[#allocation26_spill] sm:$0xff] }
 0x3a5   : > { %v5529_v42 = vadd.f32 %v2902_v12, %v1844_v41  ;;  %v3126_v57 = vmax.f32 %v5525_v37, 0.0  ;;  %v1852_v50 = vadd.f32 %v9114_v22, %v7637_v58  ;;  %v1854_v41 = vadd.f32 %v9115_v62, %v7643_v52  ;;  %4172 = vmatpush1.bf16.msra.mxu1 %v6167_v17  ;;  %v9118_v17 = vld [vmem:[#allocation30_spill] sm:$0xff] }
 0x3a6   : > { %v3127_v46 = vmax.f32 %v5527_v27, 0.0 }
 0x3a7   : > { %v3128_v38 = vmax.f32 %v5529_v42, 0.0 }
 0x3a8   : > { %v3223_v30 = vpack.c.bf16 %v3127_v46, %v3125_v63 }
 0x3a9   : > { %v3224_v60 = vpack.c.bf16 %v3128_v38, %v3126_v57  ;;  %v2906_v11 = vpop.f32.mrb[64].mxu0 }
 0x3aa   : > { %v5531_v2 = vadd.f32 %v2906_v11, %v1848_v9  ;;  %v2908_v53 = vpop.f32.mrb[65].mxu0  ;;  %v9116_v9 = vld [vmem:[#allocation28_spill] sm:$0xff] }
 0x3ab   : > { %v5533_v37 = vadd.f32 %v2908_v53, %v1850_v18  ;;  %v2910_v26 = vpop.f32.mrb[66].mxu0  ;;  %3643 = vmatprep.mubr.bf16.mxu1 %v3224_v60  ;;  %v1858_v11 = vadd.f32 %v9116_v9, %v7637_v58  ;;  %v9117_v60 = vld [vmem:[#allocation29_spill] sm:$0xff]  ;;  %v9120_v9 = vld [vmem:[#allocation32_spill] sm:$0xff] }
 0x3ac   : > { %v5535_v27 = vadd.f32 %v2910_v26, %v1852_v50  ;;  %v2912_v12 = vpop.f32.mrb[67].mxu0  ;;  %3644 = vmatmul.mubr.bf16.gmra.mrb[188].mxu1 %v3223_v30  ;;  %v3129_v63 = vmax.f32 %v5531_v2, 0.0  ;;  %v1860_v53 = vadd.f32 %v9117_v60, %v7643_v52  ;;  %v1862_v50 = vadd.f32 %v9118_v17, %v7637_v58  ;;  %v9119_v2 = vld [vmem:[#allocation31_spill] sm:$0xff] }
 0x3ad   : > { %v5537_v42 = vadd.f32 %v2912_v12, %v1854_v41  ;;  %v3130_v57 = vmax.f32 %v5533_v37, 0.0  ;;  %v1864_v37 = vadd.f32 %v9119_v2, %v7643_v52 }
 0x3ae   : > { %v3131_v46 = vmax.f32 %v5535_v27, 0.0 }
 0x3af   : > { %v3132_v38 = vmax.f32 %v5537_v42, 0.0 }
 0x3b0   : > { %v3225_v16 = vpack.c.bf16 %v3131_v46, %v3129_v63 }
 0x3b1   : > { %v3226_v54 = vpack.c.bf16 %v3132_v38, %v3130_v57  ;;  %v2916_v18 = vpop.f32.mrb[68].mxu0 }
 0x3b2   : > { %v5539_v22 = vadd.f32 %v2916_v18, %v1858_v11  ;;  %v2918_v62 = vpop.f32.mrb[69].mxu0  ;;  %v1868_v11 = vadd.f32 %v9120_v9, %v7637_v58  ;;  %v9124_v9 = vld [vmem:[#allocation37_spill] sm:$0xff] }
 0x3b3   : > { %v5541_v30 = vadd.f32 %v2918_v62, %v1860_v53  ;;  %v2920_v26 = vpop.f32.mrb[70].mxu0  ;;  %3653 = vmatprep.mubr.bf16.mxu1 %v3226_v54  ;;  %v9121_v53 = vld [vmem:[#allocation33_spill] sm:$0xff] }
 0x3b4   : > { %v5543_v41 = vadd.f32 %v2920_v26, %v1862_v50  ;;  %v2922_v27 = vpop.f32.mrb[71].mxu0  ;;  %3654 = vmatmul.mubr.bf16.gmra.mrb[192].mxu1 %v3225_v16  ;;  %v3133_v42 = vmax.f32 %v5539_v22, 0.0  ;;  %v1870_v54 = vadd.f32 %v9121_v53, %v7643_v52  ;;  %v9122_v50 = vld [vmem:[#allocation34_spill] sm:$0xff]  ;;  %v9123_v22 = vld [vmem:[#allocation35_spill] sm:$0xff] }
 0x3b5   : > { %v5545_v12 = vadd.f32 %v2922_v27, %v1864_v37  ;;  %v3134_v46 = vmax.f32 %v5541_v30, 0.0  ;;  %v1872_v26 = vadd.f32 %v9122_v50, %v7637_v58  ;;  %v1874_v30 = vadd.f32 %v9123_v22, %v7643_v52 }
 0x3b6   : > { %v3135_v63 = vmax.f32 %v5543_v41, 0.0 }
 0x3b7   : > { %v3136_v57 = vmax.f32 %v5545_v12, 0.0 }
 0x3b8   : > { %v3227_v38 = vpack.c.bf16 %v3135_v63, %v3133_v42 }
 0x3b9   : > { %v3228_v18 = vpack.c.bf16 %v3136_v57, %v3134_v46  ;;  %v2926_v60 = vpop.f32.mrb[72].mxu0 }
 0x3ba   : > { %v5547_v62 = vadd.f32 %v2926_v60, %v1868_v11  ;;  %v2928_v17 = vpop.f32.mrb[73].mxu0  ;;  %v1878_v11 = vadd.f32 %v9124_v9, %v7637_v58  ;;  %v9128_v9 = vld [vmem:[#allocation41_spill] sm:$0xff] }
 0x3bb   : > { %v5549_v16 = vadd.f32 %v2928_v17, %v1870_v54  ;;  %v2930_v2 = vpop.f32.mrb[74].mxu0  ;;  %3663 = vmatprep.mubr.bf16.mxu1 %v3228_v18  ;;  %v9125_v54 = vld [vmem:[#allocation38_spill] sm:$0xff] }
 0x3bc   : > { %v5551_v37 = vadd.f32 %v2930_v2, %v1872_v26  ;;  %v2932_v41 = vpop.f32.mrb[75].mxu0  ;;  %3664 = vmatmul.mubr.bf16.gmra.mrb[196].mxu1 %v3227_v38  ;;  %v3137_v12 = vmax.f32 %v5547_v62, 0.0  ;;  %v1880_v18 = vadd.f32 %v9125_v54, %v7643_v52  ;;  %v9126_v26 = vld [vmem:[#allocation39_spill] sm:$0xff]  ;;  %v9127_v62 = vld [vmem:[#allocation40_spill] sm:$0xff] }
 0x3bd   : > { %v5553_v27 = vadd.f32 %v2932_v41, %v1874_v30  ;;  %v3138_v63 = vmax.f32 %v5549_v16, 0.0  ;;  %v1882_v2 = vadd.f32 %v9126_v26, %v7637_v58  ;;  %v1884_v16 = vadd.f32 %v9127_v62, %v7643_v52 }
 0x3be   : > { %v3139_v42 = vmax.f32 %v5551_v37, 0.0 }
 0x3bf   : > { %v3140_v46 = vmax.f32 %v5553_v27, 0.0 }
 0x3c0   : > { %v3229_v57 = vpack.c.bf16 %v3139_v42, %v3137_v12 }
 0x3c1   : > { %v3230_v60 = vpack.c.bf16 %v3140_v46, %v3138_v63  ;;  %v2936_v53 = vpop.f32.mrb[76].mxu0 }
 0x3c2   : > { %v5555_v17 = vadd.f32 %v2936_v53, %v1878_v11  ;;  %v2938_v50 = vpop.f32.mrb[77].mxu0  ;;  %v1888_v11 = vadd.f32 %v9128_v9, %v7637_v58  ;;  %v1898_v9 = vadd.f32 %v7663_v55, %v7637_v58 }
 0x3c3   : > { %v5557_v38 = vadd.f32 %v2938_v50, %v1880_v18  ;;  %v2940_v22 = vpop.f32.mrb[78].mxu0  ;;  %3673 = vmatprep.mubr.bf16.mxu1 %v3230_v60  ;;  %v9129_v18 = vld [vmem:[#allocation42_spill] sm:$0xff] }
 0x3c4   : > { %v5559_v30 = vadd.f32 %v2940_v22, %v1882_v2  ;;  %v2942_v37 = vpop.f32.mrb[79].mxu0  ;;  %3674 = vmatmul.mubr.bf16.gmra.mrb[200].mxu1 %v3229_v57  ;;  %v3141_v27 = vmax.f32 %v5555_v17, 0.0  ;;  %v1890_v60 = vadd.f32 %v9129_v18, %v7643_v52  ;;  %v9130_v2 = vld [vmem:[#allocation43_spill] sm:$0xff]  ;;  %v9131_v17 = vld [vmem:[#allocation44_spill] sm:$0xff] }
 0x3c5   : > { %v5561_v41 = vadd.f32 %v2942_v37, %v1884_v16  ;;  %v3142_v42 = vmax.f32 %v5557_v38, 0.0  ;;  %v1892_v22 = vadd.f32 %v9130_v2, %v7637_v58  ;;  %v1894_v38 = vadd.f32 %v9131_v17, %v7643_v52 }
 0x3c6   : > { %v3143_v12 = vmax.f32 %v5559_v30, 0.0 }
 0x3c7   : > { %v3144_v63 = vmax.f32 %v5561_v41, 0.0 }
 0x3c8   : > { %v3231_v46 = vpack.c.bf16 %v3143_v12, %v3141_v27 }
 0x3c9   : > { %v3232_v53 = vpack.c.bf16 %v3144_v63, %v3142_v42  ;;  %v2946_v54 = vpop.f32.mrb[80].mxu0 }
 0x3ca   : > { %v5563_v50 = vadd.f32 %v2946_v54, %v1888_v11  ;;  %v2948_v26 = vpop.f32.mrb[81].mxu0 }
 0x3cb   : > { %v5565_v57 = vadd.f32 %v2948_v26, %v1890_v60  ;;  %v2950_v62 = vpop.f32.mrb[82].mxu0  ;;  %3683 = vmatprep.mubr.bf16.mxu1 %v3232_v53  ;;  %v1900_v53 = vadd.f32 %v7665_v6, %v7643_v52  ;;  %v1902_v26 = vadd.f32 %v7668_v59, %v7637_v58 }
 0x3cc   : > { %v5567_v16 = vadd.f32 %v2950_v62, %v1892_v22  ;;  %v2952_v30 = vpop.f32.mrb[83].mxu0  ;;  %3684 = vmatmul.mubr.bf16.gmra.mrb[204].mxu1 %v3231_v46  ;;  %v3145_v41 = vmax.f32 %v5563_v50, 0.0  ;;  %v9132_v50 = vld [vmem:[#allocation45_spill] sm:$0xff] }
 0x3cd   : > { %v5569_v37 = vadd.f32 %v2952_v30, %v1894_v38  ;;  %v3146_v12 = vmax.f32 %v5565_v57, 0.0  ;;  %v1904_v22 = vadd.f32 %v9132_v50, %v7643_v52  ;;  %v1918_v50 = vadd.f32 %v7714_v49, %v7637_v58 }
 0x3ce   : > { %v3147_v27 = vmax.f32 %v5567_v16, 0.0 }
 0x3cf   : > { %v3148_v42 = vmax.f32 %v5569_v37, 0.0  ;;  %v1908_v37 = vadd.f32 %v7686_v5, %v7637_v58 }
 0x3d0   : > { %v3233_v63 = vpack.c.bf16 %v3147_v27, %v3145_v41  ;;  %v1910_v27 = vadd.f32 %v7691_v14, %v7643_v52 }
 0x3d1   : > { %v3234_v11 = vpack.c.bf16 %v3148_v42, %v3146_v12  ;;  %v2956_v54 = vpop.f32.mrb[84].mxu0 }
 0x3d2   : > { %v5571_v18 = vadd.f32 %v2956_v54, %v1898_v9  ;;  %v2958_v60 = vpop.f32.mrb[85].mxu0  ;;  %v1912_v9 = vadd.f32 %v7695_v15, %v7637_v58  ;;  %v1914_v54 = vadd.f32 %v7700_v39, %v7643_v52  ;;  %v1922_v39 = vadd.f32 %v7723_v29, %v7637_v58 }
 0x3d3   : > { %v5573_v46 = vadd.f32 %v2958_v60, %v1900_v53  ;;  %v2960_v2 = vpop.f32.mrb[86].mxu0  ;;  %3693 = vmatprep.mubr.bf16.mxu1 %v3234_v11 }
 0x3d4   : > { %v5575_v57 = vadd.f32 %v2960_v2, %v1902_v26  ;;  %v2962_v62 = vpop.f32.mrb[87].mxu0  ;;  %3694 = vmatmul.mubr.bf16.gmra.mrb[208].mxu1 %v3233_v63  ;;  %v3149_v17 = vmax.f32 %v5571_v18, 0.0 }
 0x3d5   : > { %v5577_v55 = vadd.f32 %v2962_v62, %v1904_v22  ;;  %v3150_v16 = vmax.f32 %v5573_v46, 0.0 }
 0x3d6   : > { %v3151_v38 = vmax.f32 %v5575_v57, 0.0  ;;  %v1920_v57 = vadd.f32 %v7719_v35, %v7643_v52 }
 0x3d7   : > { %v3152_v30 = vmax.f32 %v5577_v55, 0.0 }
 0x3d8   : > { %v3235_v6 = vpack.c.bf16 %v3151_v38, %v3149_v17 }
 0x3d9   : > { %v3236_v41 = vpack.c.bf16 %v3152_v30, %v3150_v16  ;;  %v2966_v59 = vpop.f32.mrb[88].mxu0  ;;  %v1924_v16 = vadd.f32 %v7728_v1, %v7643_v52  ;;  %v1932_v1 = vadd.f32 %v7751_v43, %v7637_v58 }
 0x3da   : > { %v5579_v12 = vadd.f32 %v2966_v59, %v1908_v37  ;;  %v2968_v42 = vpop.f32.mrb[89].mxu0 }
 0x3db   : > { %v5581_v63 = vadd.f32 %v2968_v42, %v1910_v27  ;;  %v2970_v11 = vpop.f32.mrb[90].mxu0  ;;  %3703 = vmatprep.mubr.bf16.mxu1 %v3236_v41 }
 0x3dc   : > { %v5583_v53 = vadd.f32 %v2970_v11, %v1912_v9  ;;  %v2972_v18 = vpop.f32.mrb[91].mxu0  ;;  %3704 = vmatmul.mubr.bf16.gmra.mrb[212].mxu1 %v3235_v6  ;;  %v3153_v60 = vmax.f32 %v5579_v12, 0.0  ;;  %v1928_v12 = vadd.f32 %v7742_v7, %v7637_v58  ;;  %v1930_v9 = vadd.f32 %v7747_v56, %v7643_v52 }
 0x3dd   : > { %v5585_v5 = vadd.f32 %v2972_v18, %v1914_v54  ;;  %v3154_v46 = vmax.f32 %v5581_v63, 0.0  ;;  %v1934_v18 = vadd.f32 %v7756_v45, %v7643_v52  ;;  %v1942_v45 = vadd.f32 %v7779_v61, %v7637_v58 }
 0x3de   : > { %v3155_v26 = vmax.f32 %v5583_v53, 0.0 }
 0x3df   : > { %v3156_v2 = vmax.f32 %v5585_v5, 0.0 }
 0x3e0   : > { %v3237_v14 = vpack.c.bf16 %v3155_v26, %v3153_v60 }
 0x3e1   : > { %v3238_v22 = vpack.c.bf16 %v3156_v2, %v3154_v46  ;;  %v2976_v15 = vpop.f32.mrb[92].mxu0 }
 0x3e2   : > { %v5587_v62 = vadd.f32 %v2976_v15, %v1918_v50  ;;  %v2978_v55 = vpop.f32.mrb[93].mxu0  ;;  %v1938_v50 = vadd.f32 %v7770_v4, %v7637_v58  ;;  %v1940_v15 = vadd.f32 %v7775_v19, %v7643_v52 }
 0x3e3   : > { %v5589_v17 = vadd.f32 %v2978_v55, %v1920_v57  ;;  %v2980_v38 = vpop.f32.mrb[94].mxu0  ;;  %3713 = vmatprep.mubr.bf16.mxu1 %v3238_v22 }
 0x3e4   : > { %v5591_v30 = vadd.f32 %v2980_v38, %v1922_v39  ;;  %v2982_v6 = vpop.f32.mrb[95].mxu0  ;;  %3714 = vmatmul.mubr.bf16.gmra.mrb[216].mxu1 %v3237_v14  ;;  %v3157_v37 = vmax.f32 %v5587_v62, 0.0 }
 0x3e5   : > { %v5593_v49 = vadd.f32 %v2982_v6, %v1924_v16  ;;  %v3158_v59 = vmax.f32 %v5589_v17, 0.0  ;;  %v1944_v17 = vadd.f32 %v7781_v32, %v7643_v52  ;;  %v1952_v32 = vadd.f32 %v7803_v25, %v7637_v58 }
 0x3e6   : > { %v3159_v41 = vmax.f32 %v5591_v30, 0.0 }
 0x3e7   : > { %v3160_v27 = vmax.f32 %v5593_v49, 0.0 }
 0x3e8   : > { %v3239_v35 = vpack.c.bf16 %v3159_v41, %v3157_v37  ;;  %v1948_v41 = vadd.f32 %v7795_v51, %v7637_v58 }
 0x3e9   : > { %v3240_v42 = vpack.c.bf16 %v3160_v27, %v3158_v59  ;;  %v2986_v29 = vpop.f32.mrb[96].mxu0  ;;  %v1950_v27 = vadd.f32 %v7800_v3, %v7643_v52 }
 0x3ea   : > { %v5595_v63 = vadd.f32 %v2986_v29, %v1928_v12  ;;  %v2988_v11 = vpop.f32.mrb[97].mxu0 }
 0x3eb   : > { %v5597_v54 = vadd.f32 %v2988_v11, %v1930_v9  ;;  %v2990_v53 = vpop.f32.mrb[98].mxu0  ;;  %3723 = vmatprep.mubr.bf16.mxu1 %v3240_v42  ;;  %v1954_v9 = vadd.f32 %v7805_v23, %v7643_v52  ;;  %v3289_v23 = vld [vmem:[%s9023_s4] sm:$0x3] }
 0x3ec   : > { %v5599_v5 = vadd.f32 %v2990_v53, %v1932_v1  ;;  %v2992_v60 = vpop.f32.mrb[99].mxu0  ;;  %3724 = vmatmul.mubr.bf16.gmra.mrb[220].mxu1 %v3239_v35  ;;  %v3161_v26 = vmax.f32 %v5595_v63, 0.0 }
 0x3ed   : > { %v5601_v7 = vadd.f32 %v2992_v60, %v1934_v18  ;;  %v3162_v2 = vmax.f32 %v5597_v54, 0.0 }
 0x3ee   : > { %v3163_v46 = vmax.f32 %v5599_v5, 0.0  ;;  %v1958_v5 = vadd.f32 %v7819_v8, %v7637_v58  ;;  %v1964_v8 = vadd.f32 %v7826_v28, %v7643_v52 }
 0x3ef   : > { %v3164_v14 = vmax.f32 %v5601_v7, 0.0  ;;  %v1960_v7 = vadd.f32 %v7821_v20, %v7643_v52 }
 0x3f0   : > { %v3241_v56 = vpack.c.bf16 %v3163_v46, %v3161_v26 }
 0x3f1   : > { %v3242_v22 = vpack.c.bf16 %v3164_v14, %v3162_v2  ;;  %v2996_v43 = vpop.f32.mrb[100].mxu0  ;;  %v1962_v2 = vadd.f32 %v7823_v13, %v7637_v58 }
 0x3f2   : > { %v5603_v57 = vadd.f32 %v2996_v43, %v1938_v50  ;;  %v2998_v62 = vpop.f32.mrb[101].mxu0  ;;  %v9133_v43 = vld [vmem:[#allocation36_spill] sm:$0xff] }
 0x3f3   : > { %v5605_v55 = vadd.f32 %v2998_v62, %v1940_v15  ;;  %v3000_v39 = vpop.f32.mrb[102].mxu0  ;;  %3733 = vmatprep.mubr.bf16.mxu1 %v3242_v22  ;;  %v9134_v20 = vsub.s32 0, %v9133_v43  ;;  %v9135_v62 = vsub.s32 1, %v9133_v43 }
 0x3f4   : > { %v5607_v38 = vadd.f32 %v3000_v39, %v1942_v45  ;;  %v3002_v16 = vpop.f32.mrb[103].mxu0  ;;  %3734 = vmatmul.mubr.bf16.gmra.mrb[224].mxu1 %v3241_v56  ;;  %v3165_v30 = vmax.f32 %v5603_v57, 0.0 }
 0x3f5   : > { %v5609_v4 = vadd.f32 %v3002_v16, %v1944_v17  ;;  %v3166_v49 = vmax.f32 %v5605_v55, 0.0  ;;  %v8052_v15 = vrot.slane %v3289_v23, %v9134_v20  ;;  %v8056_v45 = vrot.slane %v3289_v23, %v9135_v62 }
 0x3f6   : > { %v3167_v6 = vmax.f32 %v5607_v38, 0.0 }
 0x3f7   : > { %v3168_v37 = vmax.f32 %v5609_v4, 0.0 }
 0x3f8   : > { %v3243_v19 = vpack.c.bf16 %v3167_v6, %v3165_v30  ;;  %v1968_v30 = vadd.f32 %v7836_v21, %v7637_v58 }
 0x3f9   : > { %v3244_v59 = vpack.c.bf16 %v3168_v37, %v3166_v49  ;;  %v3006_v61 = vpop.f32.mrb[104].mxu0 }
 0x3fa   : > { %v5611_v35 = vadd.f32 %v3006_v61, %v1948_v41  ;;  %v3008_v12 = vpop.f32.mrb[105].mxu0  ;;  %v1970_v41 = vadd.f32 %v7838_v33, %v7643_v52 }
 0x3fb   : > { %v5613_v42 = vadd.f32 %v3008_v12, %v1950_v27  ;;  %v3010_v29 = vpop.f32.mrb[106].mxu0  ;;  %3743 = vmatprep.mubr.bf16.mxu1 %v3244_v59  ;;  %v1972_v12 = vadd.f32 %v7840_v44, %v7637_v58 }
 0x3fc   : > { %v5615_v63 = vadd.f32 %v3010_v29, %v1952_v32  ;;  %v3012_v11 = vpop.f32.mrb[107].mxu0  ;;  %3744 = vmatmul.mubr.bf16.gmra.mrb[228].mxu1 %v3243_v19  ;;  %v3169_v1 = vmax.f32 %v5611_v35, 0.0  ;;  %v1974_v29 = vadd.f32 %v7842_v0, %v7643_v52 }
 0x3fd   : > { %v5617_v51 = vadd.f32 %v3012_v11, %v1954_v9  ;;  %v3170_v53 = vmax.f32 %v5613_v42, 0.0 }
 0x3fe   : > { %v3171_v54 = vmax.f32 %v5615_v63, 0.0 }
 0x3ff   : > { %v3172_v18 = vmax.f32 %v5617_v51, 0.0 }
 0x400   : > { %v3245_v3 = vpack.c.bf16 %v3171_v54, %v3169_v1 }
 0x401   : > { %v3246_v60 = vpack.c.bf16 %v3172_v18, %v3170_v53  ;;  %v3016_v25 = vpop.f32.mrb[108].mxu0 }
 0x402   : > { %v5619_v26 = vadd.f32 %v3016_v25, %v1958_v5  ;;  %v3018_v46 = vpop.f32.mrb[109].mxu0 }
 0x403   : > { %v5621_v14 = vadd.f32 %v3018_v46, %v1960_v7  ;;  %v3020_v56 = vpop.f32.mrb[110].mxu0  ;;  %3753 = vmatprep.mubr.bf16.mxu1 %v3246_v60 }
 0x404   : > { %v5623_v50 = vadd.f32 %v3020_v56, %v1962_v2  ;;  %v3022_v22 = vpop.f32.mrb[111].mxu0  ;;  %3754 = vmatmul.mubr.bf16.gmra.mrb[232].mxu1 %v3245_v3  ;;  %v3173_v55 = vmax.f32 %v5619_v26, 0.0  ;;  %v1978_v26 = vadd.f32 %v7855_v31, %v7637_v58 }
 0x405   : > { %v5625_v57 = vadd.f32 %v3022_v22, %v1964_v8  ;;  %v3174_v39 = vmax.f32 %v5621_v14, 0.0  ;;  %v1980_v8 = vadd.f32 %v7858_v10, %v7643_v52 }
 0x406   : > { %v3175_v13 = vmax.f32 %v5623_v50, 0.0 }
 0x407   : > { %v3176_v17 = vmax.f32 %v5625_v57, 0.0  ;;  %v3495_v38 = vpop.f32.mrb[128].mxu1  ;;  %v1982_v57 = vadd.f32 %v7860_v34, %v7637_v58 }
 0x408   : > { %v3247_v16 = vpack.c.bf16 %v3175_v13, %v3173_v55  ;;  %v3496_v28 = vadd.f32 %v3495_v38, %v8052_v15  ;;  %v3497_v4 = vpop.f32.mrb[129].mxu1  ;;  %v1984_v13 = vadd.f32 %v7862_v36, %v7643_v52 }
 0x409   : > { %v3248_v6 = vpack.c.bf16 %v3176_v17, %v3174_v39  ;;  %v3498_v49 = vadd.f32 %v3497_v4, %v8056_v45  ;;  %v3026_v37 = vpop.f32.mrb[112].mxu0  ;;  %v3499_v19 = vpop.f32.mrb[130].mxu1 }
 0x40a   : > { %v5627_v59 = vadd.f32 %v3026_v37, %v1968_v30  ;;  %v3500_v61 = vadd.f32 %v3499_v19, %v8052_v15  ;;  %v3028_v27 = vpop.f32.mrb[113].mxu0  ;;  %v3501_v35 = vpop.f32.mrb[131].mxu1  ;;  %v3814_v9 = vmax.f32 %v3496_v28, 0.0 }
 0x40b   : > { %v5629_v32 = vadd.f32 %v3028_v27, %v1970_v41  ;;  %v3502_v42 = vadd.f32 %v3501_v35, %v8056_v45  ;;  %v3030_v21 = vpop.f32.mrb[114].mxu0  ;;  %3763 = vmatprep.mubr.bf16.mxu1 %v3248_v6  ;;  %v3815_v51 = vmax.f32 %v3498_v49, 0.0  ;;  %v1988_v27 = vadd.f32 %v7872_v40, %v7637_v58 }
 0x40c   : > { %v3816_v63 = vmax.f32 %v3500_v61, 0.0  ;;  %v5631_v11 = vadd.f32 %v3030_v21, %v1972_v12  ;;  %v3032_v33 = vpop.f32.mrb[115].mxu0  ;;  %3764 = vmatmul.mubr.bf16.gmra.mrb[236].mxu1 %v3247_v16  ;;  %v3177_v53 = vmax.f32 %v5627_v59, 0.0  ;;  %v1990_v21 = vadd.f32 %v7874_v24, %v7643_v52 }
 0x40d   : > { %v3817_v1 = vmax.f32 %v3502_v42, 0.0  ;;  %v5633_v54 = vadd.f32 %v3032_v33, %v1974_v29  ;;  %v3178_v3 = vmax.f32 %v5629_v32, 0.0  ;;  %v1992_v33 = vadd.f32 %v7876_v47, %v7637_v58 }
 0x40e   : > { %v8070_v18 = vpack.c.bf16 %v3816_v63, %v3814_v9  ;;  %v3179_v44 = vmax.f32 %v5631_v11, 0.0 }
 0x40f   : > { %v8072_v5 = vpack.c.bf16 %v3817_v1, %v3815_v51  ;;  %v3180_v60 = vmax.f32 %v5633_v54, 0.0  ;;  %v3505_v25 = vpop.f32.mrb[132].mxu1  ;;  %v1994_v54 = vadd.f32 %v7878_v48, %v7643_v52 }
 0x410   : > { %v3249_v7 = vpack.c.bf16 %v3179_v44, %v3177_v53  ;;  %v3506_v0 = vadd.f32 %v3505_v25, %v8052_v15  ;;  %v3507_v23 = vpop.f32.mrb[133].mxu1 }
 0x411   : > { %v3250_v46 = vpack.c.bf16 %v3180_v60, %v3178_v3  ;;  %v3508_v2 = vadd.f32 %v3507_v23, %v8056_v45  ;;  %v3036_v14 = vpop.f32.mrb[116].mxu0  ;;  %v3509_v56 = vpop.f32.mrb[134].mxu1 }
 0x412   : > { %v5635_v50 = vadd.f32 %v3036_v14, %v1978_v26  ;;  %v3510_v22 = vadd.f32 %v3509_v56, %v8052_v15  ;;  %v3038_v43 = vpop.f32.mrb[117].mxu0  ;;  %v3511_v20 = vpop.f32.mrb[135].mxu1  ;;  %v3818_v39 = vmax.f32 %v3506_v0, 0.0 }
 0x413   : > { %v5637_v62 = vadd.f32 %v3038_v43, %v1980_v8  ;;  %v3512_v55 = vadd.f32 %v3511_v20, %v8056_v45  ;;  %v3040_v31 = vpop.f32.mrb[118].mxu0  ;;  %3773 = vmatprep.mubr.bf16.mxu1 %v3250_v46  ;;  %v3819_v16 = vmax.f32 %v3508_v2, 0.0 }
 0x414   : > { %v3820_v17 = vmax.f32 %v3510_v22, 0.0  ;;  %v5639_v38 = vadd.f32 %v3040_v31, %v1982_v57  ;;  %v3042_v10 = vpop.f32.mrb[119].mxu0  ;;  %3774 = vmatmul.mubr.bf16.gmra.mrb[240].mxu1 %v3249_v7  ;;  %v3181_v30 = vmax.f32 %v5635_v50, 0.0  ;;  %v9136_v50 = vld [vmem:[#allocation46_spill] sm:$0xff] }
 0x415   : > { %v3821_v28 = vmax.f32 %v3512_v55, 0.0  ;;  %v5641_v4 = vadd.f32 %v3042_v10, %v1984_v13  ;;  %v3182_v49 = vmax.f32 %v5637_v62, 0.0  ;;  %v1998_v22 = vadd.f32 %v9136_v50, %v7637_v58  ;;  %v9137_v55 = vld [vmem:[#allocation47_spill] sm:$0xff]  ;;  %v9138_v10 = vld [vmem:[#allocation48_spill] sm:$0xff] }
 0x416   : > { %v8086_v6 = vpack.c.bf16 %v3820_v17, %v3818_v39  ;;  %v3183_v34 = vmax.f32 %v5639_v38, 0.0  ;;  %v2000_v31 = vadd.f32 %v9137_v55, %v7643_v52 }
 0x417   : > { %v8088_v37 = vpack.c.bf16 %v3821_v28, %v3819_v16  ;;  %v3184_v19 = vmax.f32 %v5641_v4, 0.0  ;;  %v3515_v41 = vpop.f32.mrb[136].mxu1  ;;  %v2002_v16 = vadd.f32 %v9138_v10, %v7637_v58 }
 0x418   : > { %v3251_v59 = vpack.c.bf16 %v3183_v34, %v3181_v30  ;;  %v3516_v36 = vadd.f32 %v3515_v41, %v8052_v15  ;;  %v3517_v61 = vpop.f32.mrb[137].mxu1  ;;  %v9139_v34 = vld [vmem:[#allocation49_spill] sm:$0xff] }
 0x419   : > { %v3252_v35 = vpack.c.bf16 %v3184_v19, %v3182_v49  ;;  %v3518_v12 = vadd.f32 %v3517_v61, %v8056_v45  ;;  %v3046_v32 = vpop.f32.mrb[120].mxu0  ;;  %v3519_v42 = vpop.f32.mrb[138].mxu1  ;;  %v2004_v49 = vadd.f32 %v9139_v34, %v7643_v52 }
 0x41a   : > { %v5643_v29 = vadd.f32 %v3046_v32, %v1988_v27  ;;  %v3520_v9 = vadd.f32 %v3519_v42, %v8052_v15  ;;  %v3048_v63 = vpop.f32.mrb[121].mxu0  ;;  %v3521_v11 = vpop.f32.mrb[139].mxu1  ;;  %v3822_v53 = vmax.f32 %v3516_v36, 0.0 }
 0x41b   : > { %v5645_v51 = vadd.f32 %v3048_v63, %v1990_v21  ;;  %v3522_v1 = vadd.f32 %v3521_v11, %v8056_v45  ;;  %v3050_v40 = vpop.f32.mrb[122].mxu0  ;;  %3783 = vmatprep.mubr.bf16.mxu1 %v3252_v35  ;;  %v3823_v60 = vmax.f32 %v3518_v12, 0.0 }
 0x41c   : > { %v3824_v44 = vmax.f32 %v3520_v9, 0.0  ;;  %v5647_v3 = vadd.f32 %v3050_v40, %v1992_v33  ;;  %v3052_v24 = vpop.f32.mrb[123].mxu0  ;;  %3784 = vmatmul.mubr.bf16.gmra.mrb[244].mxu1 %v3251_v59  ;;  %v3185_v0 = vmax.f32 %v5643_v29, 0.0 }
 0x41d   : > { %v3825_v25 = vmax.f32 %v3522_v1, 0.0  ;;  %v5649_v7 = vadd.f32 %v3052_v24, %v1994_v54  ;;  %v3186_v26 = vmax.f32 %v5645_v51, 0.0 }
 0x41e   : > { %v8102_v23 = vpack.c.bf16 %v3824_v44, %v3822_v53  ;;  %v3187_v47 = vmax.f32 %v5647_v3, 0.0 }
 0x41f   : > { %v8104_v46 = vpack.c.bf16 %v3825_v25, %v3823_v60  ;;  %v3188_v2 = vmax.f32 %v5649_v7, 0.0  ;;  %v3525_v14 = vpop.f32.mrb[140].mxu1 }
 0x420   : > { %v3253_v56 = vpack.c.bf16 %v3187_v47, %v3185_v0  ;;  %v3526_v48 = vadd.f32 %v3525_v14, %v8052_v15  ;;  %v3527_v8 = vpop.f32.mrb[141].mxu1 }
 0x421   : > { %v3254_v43 = vpack.c.bf16 %v3188_v2, %v3186_v26  ;;  %v3528_v20 = vadd.f32 %v3527_v8, %v8056_v45  ;;  %v3056_v57 = vpop.f32.mrb[124].mxu0  ;;  %v3529_v62 = vpop.f32.mrb[142].mxu1 }
 0x422   : > { %v5651_v13 = vadd.f32 %v3056_v57, %v1998_v22  ;;  %v3530_v39 = vadd.f32 %v3529_v62, %v8052_v15  ;;  %v3058_v17 = vpop.f32.mrb[125].mxu0  ;;  %v3531_v38 = vpop.f32.mrb[143].mxu1  ;;  %v3826_v19 = vmax.f32 %v3526_v48, 0.0 }
 0x423   : > { %v5653_v28 = vadd.f32 %v3058_v17, %v2000_v31  ;;  %v3532_v4 = vadd.f32 %v3531_v38, %v8056_v45  ;;  %v3060_v30 = vpop.f32.mrb[126].mxu0  ;;  %3793 = vmatprep.mubr.bf16.mxu1 %v3254_v43  ;;  %v3827_v61 = vmax.f32 %v3528_v20, 0.0 }
 0x424   : > { %v3828_v41 = vmax.f32 %v3530_v39, 0.0  ;;  %v5655_v59 = vadd.f32 %v3060_v30, %v2002_v16  ;;  %v3062_v36 = vpop.f32.mrb[127].mxu0  ;;  %3794 = vmatmul.mubr.bf16.gmra.mrb[248].mxu1 %v3253_v56  ;;  %v3189_v12 = vmax.f32 %v5651_v13, 0.0 }
 0x425   : > { %v3829_v27 = vmax.f32 %v3532_v4, 0.0  ;;  %v5657_v35 = vadd.f32 %v3062_v36, %v2004_v49  ;;  %v3190_v42 = vmax.f32 %v5653_v28, 0.0 }
 0x426   : > { %v8118_v32 = vpack.c.bf16 %v3828_v41, %v3826_v19  ;;  %v3191_v58 = vmax.f32 %v5655_v59, 0.0 }
 0x427   : > { %v8120_v21 = vpack.c.bf16 %v3829_v27, %v3827_v61  ;;  %v3192_v29 = vmax.f32 %v5657_v35, 0.0  ;;  %v3535_v9 = vpop.f32.mrb[144].mxu1 }
 0x428   : > { %v3255_v63 = vpack.c.bf16 %v3191_v58, %v3189_v12  ;;  %v3536_v52 = vadd.f32 %v3535_v9, %v8052_v15  ;;  %v3537_v11 = vpop.f32.mrb[145].mxu1 }
 0x429   : > { %v3256_v33 = vpack.c.bf16 %v3192_v29, %v3190_v42  ;;  %v3538_v51 = vadd.f32 %v3537_v11, %v8056_v45  ;;  %v3539_v1 = vpop.f32.mrb[146].mxu1 }
 0x42a   : > { %v3540_v40 = vadd.f32 %v3539_v1, %v8052_v15  ;;  %v3541_v54 = vpop.f32.mrb[147].mxu1  ;;  %v3830_v44 = vmax.f32 %v3536_v52, 0.0 }
 0x42b   : > { %v3542_v53 = vadd.f32 %v3541_v54, %v8056_v45  ;;  %3803 = vmatprep.mubr.bf16.mxu1 %v3256_v33  ;;  %v3831_v24 = vmax.f32 %v3538_v51, 0.0 }
 0x42c   : > { %v3832_v3 = vmax.f32 %v3540_v40, 0.0  ;;  %3804 = vmatmul.mubr.bf16.gmra.mrb[252].mxu1 %v3255_v63 }
 0x42d   : > { %v3833_v60 = vmax.f32 %v3542_v53, 0.0  ;;  %4173 = vmatprep.mubr.bf16.mxu1 %v8072_v5 }
 0x42e   : > { %v8127_v25 = vpack.c.bf16 %v3832_v3, %v3830_v44 }
 0x42f   : > { %v3951_v7 = vpack.c.bf16 %v3833_v60, %v3831_v24  ;;  %v3545_v0 = vpop.f32.mrb[148].mxu1 }
 0x430   : > { %v3546_v47 = vadd.f32 %v3545_v0, %v8052_v15  ;;  %v3547_v26 = vpop.f32.mrb[149].mxu1 }
 0x431   : > { %v3548_v2 = vadd.f32 %v3547_v26, %v8056_v45  ;;  %v3549_v14 = vpop.f32.mrb[150].mxu1 }
 0x432   : > { %v3550_v56 = vadd.f32 %v3549_v14, %v8052_v15  ;;  %v3551_v48 = vpop.f32.mrb[151].mxu1  ;;  %v3834_v50 = vmax.f32 %v3546_v47, 0.0 }
 0x433   : > { %v3552_v8 = vadd.f32 %v3551_v48, %v8056_v45  ;;  %v3835_v5 = vmax.f32 %v3548_v2, 0.0 }
 0x434   : > { %v3836_v22 = vmax.f32 %v3550_v56, 0.0  ;;  %4174 = vmatmul.mubr.bf16.vlgmr.msra.gmra.mrb[0].mxu1 %v8070_v18 }
 0x435   : > { %v3837_v43 = vmax.f32 %v3552_v8, 0.0  ;;  %4181 = vmatprep.mubr.bf16.mxu1 %v8088_v37 }
 0x436   : > { %v8135_v20 = vpack.c.bf16 %v3836_v22, %v3834_v50 }
 0x437   : > { %v3953_v57 = vpack.c.bf16 %v3837_v43, %v3835_v5  ;;  %v3555_v62 = vpop.f32.mrb[152].mxu1 }
 0x438   : > { %v3556_v55 = vadd.f32 %v3555_v62, %v8052_v15  ;;  %v3557_v31 = vpop.f32.mrb[153].mxu1 }
 0x439   : > { %v3558_v13 = vadd.f32 %v3557_v31, %v8056_v45  ;;  %v3559_v39 = vpop.f32.mrb[154].mxu1 }
 0x43a   : > { %v3560_v17 = vadd.f32 %v3559_v39, %v8052_v15  ;;  %v3561_v38 = vpop.f32.mrb[155].mxu1  ;;  %v3838_v18 = vmax.f32 %v3556_v55, 0.0 }
 0x43b   : > { %v3562_v10 = vadd.f32 %v3561_v38, %v8056_v45  ;;  %v3839_v37 = vmax.f32 %v3558_v13, 0.0 }
 0x43c   : > { %v3840_v16 = vmax.f32 %v3560_v17, 0.0  ;;  %4182 = vmatmul.mubr.bf16.gmra.mrb[4].mxu1 %v8086_v6 }
 0x43d   : > { %v3841_v28 = vmax.f32 %v3562_v10, 0.0  ;;  %4189 = vmatprep.mubr.bf16.mxu1 %v8104_v46 }
 0x43e   : > { %v8143_v4 = vpack.c.bf16 %v3840_v16, %v3838_v18 }
 0x43f   : > { %v3955_v30 = vpack.c.bf16 %v3841_v28, %v3839_v37  ;;  %v3565_v34 = vpop.f32.mrb[156].mxu1 }
 0x440   : > { %v3566_v49 = vadd.f32 %v3565_v34, %v8052_v15  ;;  %v3567_v19 = vpop.f32.mrb[157].mxu1 }
 0x441   : > { %v3568_v41 = vadd.f32 %v3567_v19, %v8056_v45  ;;  %v3569_v59 = vpop.f32.mrb[158].mxu1 }
 0x442   : > { %v3570_v36 = vadd.f32 %v3569_v59, %v8052_v15  ;;  %v3571_v61 = vpop.f32.mrb[159].mxu1  ;;  %v3842_v6 = vmax.f32 %v3566_v49, 0.0 }
 0x443   : > { %v3572_v27 = vadd.f32 %v3571_v61, %v8056_v45  ;;  %v3843_v46 = vmax.f32 %v3568_v41, 0.0 }
 0x444   : > { %v3844_v35 = vmax.f32 %v3570_v36, 0.0  ;;  %4190 = vmatmul.mubr.bf16.gmra.mrb[8].mxu1 %v8102_v23 }
 0x445   : > { %v3845_v12 = vmax.f32 %v3572_v27, 0.0  ;;  %4197 = vmatprep.mubr.bf16.mxu1 %v8120_v21 }
 0x446   : > { %v8151_v58 = vpack.c.bf16 %v3844_v35, %v3842_v6 }
 0x447   : > { %v3957_v42 = vpack.c.bf16 %v3845_v12, %v3843_v46  ;;  %v3575_v29 = vpop.f32.mrb[160].mxu1 }
 0x448   : > { %v3576_v9 = vadd.f32 %v3575_v29, %v8052_v15  ;;  %v3577_v63 = vpop.f32.mrb[161].mxu1 }
 0x449   : > { %v3578_v52 = vadd.f32 %v3577_v63, %v8056_v45  ;;  %v3579_v11 = vpop.f32.mrb[162].mxu1 }
 0x44a   : > { %v3580_v33 = vadd.f32 %v3579_v11, %v8052_v15  ;;  %v3581_v51 = vpop.f32.mrb[163].mxu1  ;;  %v3846_v23 = vmax.f32 %v3576_v9, 0.0 }
 0x44b   : > { %v3582_v1 = vadd.f32 %v3581_v51, %v8056_v45  ;;  %v3847_v21 = vmax.f32 %v3578_v52, 0.0 }
 0x44c   : > { %v3848_v40 = vmax.f32 %v3580_v33, 0.0  ;;  %4198 = vmatmul.mubr.bf16.gmra.mrb[12].mxu1 %v8118_v32 }
 0x44d   : > { %v3849_v54 = vmax.f32 %v3582_v1, 0.0  ;;  %4205 = vmatprep.mubr.bf16.mxu1 %v3951_v7 }
 0x44e   : > { %v8158_v53 = vpack.c.bf16 %v3848_v40, %v3846_v23 }
 0x44f   : > { %v3959_v44 = vpack.c.bf16 %v3849_v54, %v3847_v21  ;;  %v3585_v3 = vpop.f32.mrb[164].mxu1 }
 0x450   : > { %v3586_v24 = vadd.f32 %v3585_v3, %v8052_v15  ;;  %v3587_v60 = vpop.f32.mrb[165].mxu1 }
 0x451   : > { %v3588_v0 = vadd.f32 %v3587_v60, %v8056_v45  ;;  %v3589_v47 = vpop.f32.mrb[166].mxu1 }
 0x452   : > { %v3590_v26 = vadd.f32 %v3589_v47, %v8052_v15  ;;  %v3591_v2 = vpop.f32.mrb[167].mxu1  ;;  %v3850_v56 = vmax.f32 %v3586_v24, 0.0 }
 0x453   : > { %v3592_v14 = vadd.f32 %v3591_v2, %v8056_v45  ;;  %v3851_v7 = vmax.f32 %v3588_v0, 0.0 }
 0x454   : > { %v3852_v32 = vmax.f32 %v3590_v26, 0.0  ;;  %4206 = vmatmul.mubr.bf16.gmra.mrb[16].mxu1 %v8127_v25 }
 0x455   : > { %v3853_v48 = vmax.f32 %v3592_v14, 0.0  ;;  %4213 = vmatprep.mubr.bf16.mxu1 %v3953_v57 }
 0x456   : > { %v8165_v8 = vpack.c.bf16 %v3852_v32, %v3850_v56 }
 0x457   : > { %v3961_v50 = vpack.c.bf16 %v3853_v48, %v3851_v7  ;;  %v3595_v22 = vpop.f32.mrb[168].mxu1 }
 0x458   : > { %v3596_v5 = vadd.f32 %v3595_v22, %v8052_v15  ;;  %v3597_v43 = vpop.f32.mrb[169].mxu1 }
 0x459   : > { %v3598_v62 = vadd.f32 %v3597_v43, %v8056_v45  ;;  %v3599_v55 = vpop.f32.mrb[170].mxu1 }
 0x45a   : > { %v3600_v31 = vadd.f32 %v3599_v55, %v8052_v15  ;;  %v3601_v13 = vpop.f32.mrb[171].mxu1  ;;  %v3854_v17 = vmax.f32 %v3596_v5, 0.0 }
 0x45b   : > { %v3602_v39 = vadd.f32 %v3601_v13, %v8056_v45  ;;  %v3855_v57 = vmax.f32 %v3598_v62, 0.0 }
 0x45c   : > { %v3856_v25 = vmax.f32 %v3600_v31, 0.0  ;;  %4214 = vmatmul.mubr.bf16.gmra.mrb[20].mxu1 %v8135_v20 }
 0x45d   : > { %v3857_v38 = vmax.f32 %v3602_v39, 0.0  ;;  %4221 = vmatprep.mubr.bf16.mxu1 %v3955_v30 }
 0x45e   : > { %v8172_v10 = vpack.c.bf16 %v3856_v25, %v3854_v17 }
 0x45f   : > { %v3963_v18 = vpack.c.bf16 %v3857_v38, %v3855_v57  ;;  %v3605_v16 = vpop.f32.mrb[172].mxu1 }
 0x460   : > { %v3606_v37 = vadd.f32 %v3605_v16, %v8052_v15  ;;  %v3607_v28 = vpop.f32.mrb[173].mxu1 }
 0x461   : > { %v3608_v34 = vadd.f32 %v3607_v28, %v8056_v45  ;;  %v3609_v49 = vpop.f32.mrb[174].mxu1 }
 0x462   : > { %v3610_v19 = vadd.f32 %v3609_v49, %v8052_v15  ;;  %v3611_v41 = vpop.f32.mrb[175].mxu1  ;;  %v3858_v36 = vmax.f32 %v3606_v37, 0.0 }
 0x463   : > { %v3612_v59 = vadd.f32 %v3611_v41, %v8056_v45  ;;  %v3859_v30 = vmax.f32 %v3608_v34, 0.0 }
 0x464   : > { %v3860_v20 = vmax.f32 %v3610_v19, 0.0  ;;  %4222 = vmatmul.mubr.bf16.gmra.mrb[24].mxu1 %v8143_v4 }
 0x465   : > { %v3861_v61 = vmax.f32 %v3612_v59, 0.0  ;;  %4229 = vmatprep.mubr.bf16.mxu1 %v3957_v42 }
 0x466   : > { %v8179_v27 = vpack.c.bf16 %v3860_v20, %v3858_v36 }
 0x467   : > { %v3965_v6 = vpack.c.bf16 %v3861_v61, %v3859_v30  ;;  %v3615_v35 = vpop.f32.mrb[176].mxu1 }
 0x468   : > { %v3616_v46 = vadd.f32 %v3615_v35, %v8052_v15  ;;  %v3617_v12 = vpop.f32.mrb[177].mxu1 }
 0x469   : > { %v3618_v29 = vadd.f32 %v3617_v12, %v8056_v45  ;;  %v3619_v9 = vpop.f32.mrb[178].mxu1 }
 0x46a   : > { %v3620_v63 = vadd.f32 %v3619_v9, %v8052_v15  ;;  %v3621_v52 = vpop.f32.mrb[179].mxu1  ;;  %v3862_v33 = vmax.f32 %v3616_v46, 0.0 }
 0x46b   : > { %v3622_v11 = vadd.f32 %v3621_v52, %v8056_v45  ;;  %v3863_v42 = vmax.f32 %v3618_v29, 0.0 }
 0x46c   : > { %v3864_v4 = vmax.f32 %v3620_v63, 0.0  ;;  %4230 = vmatmul.mubr.bf16.gmra.mrb[28].mxu1 %v8151_v58 }
 0x46d   : > { %v3865_v51 = vmax.f32 %v3622_v11, 0.0  ;;  %4237 = vmatprep.mubr.bf16.mxu1 %v3959_v44 }
 0x46e   : > { %v8186_v1 = vpack.c.bf16 %v3864_v4, %v3862_v33 }
 0x46f   : > { %v3967_v23 = vpack.c.bf16 %v3865_v51, %v3863_v42  ;;  %v3625_v40 = vpop.f32.mrb[180].mxu1 }
 0x470   : > { %v3626_v21 = vadd.f32 %v3625_v40, %v8052_v15  ;;  %v3627_v54 = vpop.f32.mrb[181].mxu1 }
 0x471   : > { %v3628_v3 = vadd.f32 %v3627_v54, %v8056_v45  ;;  %v3629_v24 = vpop.f32.mrb[182].mxu1 }
 0x472   : > { %v3630_v60 = vadd.f32 %v3629_v24, %v8052_v15  ;;  %v3631_v0 = vpop.f32.mrb[183].mxu1  ;;  %v3866_v26 = vmax.f32 %v3626_v21, 0.0 }
 0x473   : > { %v3632_v47 = vadd.f32 %v3631_v0, %v8056_v45  ;;  %v3867_v44 = vmax.f32 %v3628_v3, 0.0 }
 0x474   : > { %v3868_v58 = vmax.f32 %v3630_v60, 0.0  ;;  %4238 = vmatmul.mubr.bf16.gmra.mrb[32].mxu1 %v8158_v53 }
 0x475   : > { %v3869_v2 = vmax.f32 %v3632_v47, 0.0  ;;  %4245 = vmatprep.mubr.bf16.mxu1 %v3961_v50 }
 0x476   : > { %v8193_v14 = vpack.c.bf16 %v3868_v58, %v3866_v26 }
 0x477   : > { %v3969_v56 = vpack.c.bf16 %v3869_v2, %v3867_v44  ;;  %v3635_v32 = vpop.f32.mrb[184].mxu1 }
 0x478   : > { %v3636_v7 = vadd.f32 %v3635_v32, %v8052_v15  ;;  %v3637_v48 = vpop.f32.mrb[185].mxu1 }
 0x479   : > { %v3638_v22 = vadd.f32 %v3637_v48, %v8056_v45  ;;  %v3639_v5 = vpop.f32.mrb[186].mxu1 }
 0x47a   : > { %v3640_v43 = vadd.f32 %v3639_v5, %v8052_v15  ;;  %v3641_v62 = vpop.f32.mrb[187].mxu1  ;;  %v3870_v31 = vmax.f32 %v3636_v7, 0.0 }
 0x47b   : > { %v3642_v55 = vadd.f32 %v3641_v62, %v8056_v45  ;;  %v3871_v50 = vmax.f32 %v3638_v22, 0.0 }
 0x47c   : > { %v3872_v53 = vmax.f32 %v3640_v43, 0.0  ;;  %4246 = vmatmul.mubr.bf16.gmra.mrb[36].mxu1 %v8165_v8 }
 0x47d   : > { %v3873_v13 = vmax.f32 %v3642_v55, 0.0  ;;  %4253 = vmatprep.mubr.bf16.mxu1 %v3963_v18 }
 0x47e   : > { %v8200_v39 = vpack.c.bf16 %v3872_v53, %v3870_v31 }
 0x47f   : > { %v3971_v17 = vpack.c.bf16 %v3873_v13, %v3871_v50  ;;  %v3645_v25 = vpop.f32.mrb[188].mxu1 }
 0x480   : > { %v3646_v57 = vadd.f32 %v3645_v25, %v8052_v15  ;;  %v3647_v38 = vpop.f32.mrb[189].mxu1 }
 0x481   : > { %v3648_v16 = vadd.f32 %v3647_v38, %v8056_v45  ;;  %v3649_v37 = vpop.f32.mrb[190].mxu1 }
 0x482   : > { %v3650_v28 = vadd.f32 %v3649_v37, %v8052_v15  ;;  %v3651_v34 = vpop.f32.mrb[191].mxu1  ;;  %v3874_v19 = vmax.f32 %v3646_v57, 0.0 }
 0x483   : > { %v3652_v49 = vadd.f32 %v3651_v34, %v8056_v45  ;;  %v3875_v18 = vmax.f32 %v3648_v16, 0.0 }
 0x484   : > { %v3876_v8 = vmax.f32 %v3650_v28, 0.0  ;;  %4254 = vmatmul.mubr.bf16.gmra.mrb[40].mxu1 %v8172_v10 }
 0x485   : > { %v3877_v41 = vmax.f32 %v3652_v49, 0.0  ;;  %4261 = vmatprep.mubr.bf16.mxu1 %v3965_v6 }
 0x486   : > { %v8207_v59 = vpack.c.bf16 %v3876_v8, %v3874_v19 }
 0x487   : > { %v3973_v36 = vpack.c.bf16 %v3877_v41, %v3875_v18  ;;  %v3655_v20 = vpop.f32.mrb[192].mxu1 }
 0x488   : > { %v3656_v30 = vadd.f32 %v3655_v20, %v8052_v15  ;;  %v3657_v61 = vpop.f32.mrb[193].mxu1 }
 0x489   : > { %v3658_v35 = vadd.f32 %v3657_v61, %v8056_v45  ;;  %v3659_v46 = vpop.f32.mrb[194].mxu1 }
 0x48a   : > { %v3660_v12 = vadd.f32 %v3659_v46, %v8052_v15  ;;  %v3661_v29 = vpop.f32.mrb[195].mxu1  ;;  %v3878_v63 = vmax.f32 %v3656_v30, 0.0 }
 0x48b   : > { %v3662_v9 = vadd.f32 %v3661_v29, %v8056_v45  ;;  %v3879_v6 = vmax.f32 %v3658_v35, 0.0 }
 0x48c   : > { %v3880_v10 = vmax.f32 %v3660_v12, 0.0  ;;  %4262 = vmatmul.mubr.bf16.gmra.mrb[44].mxu1 %v8179_v27 }
 0x48d   : > { %v3881_v52 = vmax.f32 %v3662_v9, 0.0  ;;  %4269 = vmatprep.mubr.bf16.mxu1 %v3967_v23 }
 0x48e   : > { %v8214_v11 = vpack.c.bf16 %v3880_v10, %v3878_v63 }
 0x48f   : > { %v3975_v33 = vpack.c.bf16 %v3881_v52, %v3879_v6  ;;  %v3665_v4 = vpop.f32.mrb[196].mxu1 }
 0x490   : > { %v3666_v42 = vadd.f32 %v3665_v4, %v8052_v15  ;;  %v3667_v51 = vpop.f32.mrb[197].mxu1 }
 0x491   : > { %v3668_v40 = vadd.f32 %v3667_v51, %v8056_v45  ;;  %v3669_v21 = vpop.f32.mrb[198].mxu1 }
 0x492   : > { %v3670_v54 = vadd.f32 %v3669_v21, %v8052_v15  ;;  %v3671_v3 = vpop.f32.mrb[199].mxu1  ;;  %v3882_v60 = vmax.f32 %v3666_v42, 0.0 }
 0x493   : > { %v3672_v24 = vadd.f32 %v3671_v3, %v8056_v45  ;;  %v3883_v23 = vmax.f32 %v3668_v40, 0.0 }
 0x494   : > { %v3884_v27 = vmax.f32 %v3670_v54, 0.0  ;;  %4270 = vmatmul.mubr.bf16.gmra.mrb[48].mxu1 %v8186_v1 }
 0x495   : > { %v3885_v0 = vmax.f32 %v3672_v24, 0.0  ;;  %4277 = vmatprep.mubr.bf16.mxu1 %v3969_v56 }
 0x496   : > { %v8221_v47 = vpack.c.bf16 %v3884_v27, %v3882_v60 }
 0x497   : > { %v3977_v26 = vpack.c.bf16 %v3885_v0, %v3883_v23  ;;  %v3675_v58 = vpop.f32.mrb[200].mxu1 }
 0x498   : > { %v3676_v44 = vadd.f32 %v3675_v58, %v8052_v15  ;;  %v3677_v2 = vpop.f32.mrb[201].mxu1 }
 0x499   : > { %v3678_v32 = vadd.f32 %v3677_v2, %v8056_v45  ;;  %v3679_v7 = vpop.f32.mrb[202].mxu1 }
 0x49a   : > { %v3680_v48 = vadd.f32 %v3679_v7, %v8052_v15  ;;  %v3681_v22 = vpop.f32.mrb[203].mxu1  ;;  %v3886_v43 = vmax.f32 %v3676_v44, 0.0 }
 0x49b   : > { %v3682_v5 = vadd.f32 %v3681_v22, %v8056_v45  ;;  %v3887_v56 = vmax.f32 %v3678_v32, 0.0 }
 0x49c   : > { %v3888_v1 = vmax.f32 %v3680_v48, 0.0  ;;  %4278 = vmatmul.mubr.bf16.gmra.mrb[52].mxu1 %v8193_v14 }
 0x49d   : > { %v3889_v62 = vmax.f32 %v3682_v5, 0.0  ;;  %4285 = vmatprep.mubr.bf16.mxu1 %v3971_v17 }
 0x49e   : > { %v8228_v55 = vpack.c.bf16 %v3888_v1, %v3886_v43 }
 0x49f   : > { %v3979_v31 = vpack.c.bf16 %v3889_v62, %v3887_v56  ;;  %v3685_v53 = vpop.f32.mrb[204].mxu1 }
 0x4a0   : > { %v3686_v50 = vadd.f32 %v3685_v53, %v8052_v15  ;;  %v3687_v13 = vpop.f32.mrb[205].mxu1 }
 0x4a1   : > { %v3688_v25 = vadd.f32 %v3687_v13, %v8056_v45  ;;  %v3689_v57 = vpop.f32.mrb[206].mxu1 }
 0x4a2   : > { %v3690_v38 = vadd.f32 %v3689_v57, %v8052_v15  ;;  %v3691_v16 = vpop.f32.mrb[207].mxu1  ;;  %v3890_v28 = vmax.f32 %v3686_v50, 0.0 }
 0x4a3   : > { %v3692_v37 = vadd.f32 %v3691_v16, %v8056_v45  ;;  %v3891_v17 = vmax.f32 %v3688_v25, 0.0 }
 0x4a4   : > { %v3892_v14 = vmax.f32 %v3690_v38, 0.0  ;;  %4286 = vmatmul.mubr.bf16.gmra.mrb[56].mxu1 %v8200_v39 }
 0x4a5   : > { %v3893_v34 = vmax.f32 %v3692_v37, 0.0  ;;  %4293 = vmatprep.mubr.bf16.mxu1 %v3973_v36 }
 0x4a6   : > { %v8235_v49 = vpack.c.bf16 %v3892_v14, %v3890_v28 }
 0x4a7   : > { %v3981_v19 = vpack.c.bf16 %v3893_v34, %v3891_v17  ;;  %v3695_v8 = vpop.f32.mrb[208].mxu1 }
 0x4a8   : > { %v3696_v18 = vadd.f32 %v3695_v8, %v8052_v15  ;;  %v3697_v41 = vpop.f32.mrb[209].mxu1 }
 0x4a9   : > { %v3698_v20 = vadd.f32 %v3697_v41, %v8056_v45  ;;  %v3699_v30 = vpop.f32.mrb[210].mxu1 }
 0x4aa   : > { %v3700_v61 = vadd.f32 %v3699_v30, %v8052_v15  ;;  %v3701_v35 = vpop.f32.mrb[211].mxu1  ;;  %v3894_v12 = vmax.f32 %v3696_v18, 0.0 }
 0x4ab   : > { %v3702_v46 = vadd.f32 %v3701_v35, %v8056_v45  ;;  %v3895_v36 = vmax.f32 %v3698_v20, 0.0 }
 0x4ac   : > { %v3896_v39 = vmax.f32 %v3700_v61, 0.0  ;;  %4294 = vmatmul.mubr.bf16.gmra.mrb[60].mxu1 %v8207_v59 }
 0x4ad   : > { %v3897_v29 = vmax.f32 %v3702_v46, 0.0  ;;  %4301 = vmatprep.mubr.bf16.mxu1 %v3975_v33 }
 0x4ae   : > { %v8242_v9 = vpack.c.bf16 %v3896_v39, %v3894_v12 }
 0x4af   : > { %v3983_v63 = vpack.c.bf16 %v3897_v29, %v3895_v36  ;;  %v3705_v10 = vpop.f32.mrb[212].mxu1 }
 0x4b0   : > { %v3706_v6 = vadd.f32 %v3705_v10, %v8052_v15  ;;  %v3707_v52 = vpop.f32.mrb[213].mxu1 }
 0x4b1   : > { %v3708_v4 = vadd.f32 %v3707_v52, %v8056_v45  ;;  %v3709_v42 = vpop.f32.mrb[214].mxu1 }
 0x4b2   : > { %v3710_v51 = vadd.f32 %v3709_v42, %v8052_v15  ;;  %v3711_v40 = vpop.f32.mrb[215].mxu1  ;;  %v3898_v54 = vmax.f32 %v3706_v6, 0.0 }
 0x4b3   : > { %v3712_v21 = vadd.f32 %v3711_v40, %v8056_v45  ;;  %v3899_v33 = vmax.f32 %v3708_v4, 0.0 }
 0x4b4   : > { %v3900_v59 = vmax.f32 %v3710_v51, 0.0  ;;  %4302 = vmatmul.mubr.bf16.gmra.mrb[64].mxu1 %v8214_v11 }
 0x4b5   : > { %v3901_v3 = vmax.f32 %v3712_v21, 0.0  ;;  %4309 = vmatprep.mubr.bf16.mxu1 %v3977_v26 }
 0x4b6   : > { %v8249_v24 = vpack.c.bf16 %v3900_v59, %v3898_v54 }
 0x4b7   : > { %v3985_v60 = vpack.c.bf16 %v3901_v3, %v3899_v33  ;;  %v3715_v27 = vpop.f32.mrb[216].mxu1 }
 0x4b8   : > { %v3716_v23 = vadd.f32 %v3715_v27, %v8052_v15  ;;  %v3717_v0 = vpop.f32.mrb[217].mxu1 }
 0x4b9   : > { %v3718_v58 = vadd.f32 %v3717_v0, %v8056_v45  ;;  %v3719_v44 = vpop.f32.mrb[218].mxu1 }
 0x4ba   : > { %v3720_v2 = vadd.f32 %v3719_v44, %v8052_v15  ;;  %v3721_v32 = vpop.f32.mrb[219].mxu1  ;;  %v3902_v48 = vmax.f32 %v3716_v23, 0.0 }
 0x4bb   : > { %v3722_v7 = vadd.f32 %v3721_v32, %v8056_v45  ;;  %v3903_v26 = vmax.f32 %v3718_v58, 0.0 }
 0x4bc   : > { %v3904_v11 = vmax.f32 %v3720_v2, 0.0  ;;  %4310 = vmatmul.mubr.bf16.gmra.mrb[68].mxu1 %v8221_v47 }
 0x4bd   : > { %v3905_v22 = vmax.f32 %v3722_v7, 0.0  ;;  %4317 = vmatprep.mubr.bf16.mxu1 %v3979_v31 }
 0x4be   : > { %v8256_v5 = vpack.c.bf16 %v3904_v11, %v3902_v48 }
 0x4bf   : > { %v3987_v43 = vpack.c.bf16 %v3905_v22, %v3903_v26  ;;  %v3725_v1 = vpop.f32.mrb[220].mxu1 }
 0x4c0   : > { %v3726_v56 = vadd.f32 %v3725_v1, %v8052_v15  ;;  %v3727_v62 = vpop.f32.mrb[221].mxu1 }
 0x4c1   : > { %v3728_v53 = vadd.f32 %v3727_v62, %v8056_v45  ;;  %v3729_v50 = vpop.f32.mrb[222].mxu1 }
 0x4c2   : > { %v3730_v13 = vadd.f32 %v3729_v50, %v8052_v15  ;;  %v3731_v25 = vpop.f32.mrb[223].mxu1  ;;  %v3906_v38 = vmax.f32 %v3726_v56, 0.0 }
 0x4c3   : > { %v3732_v57 = vadd.f32 %v3731_v25, %v8056_v45  ;;  %v3907_v31 = vmax.f32 %v3728_v53, 0.0 }
 0x4c4   : > { %v3908_v47 = vmax.f32 %v3730_v13, 0.0  ;;  %4318 = vmatmul.mubr.bf16.gmra.mrb[72].mxu1 %v8228_v55 }
 0x4c5   : > { %v3909_v16 = vmax.f32 %v3732_v57, 0.0  ;;  %4325 = vmatprep.mubr.bf16.mxu1 %v3981_v19 }
 0x4c6   : > { %v8263_v37 = vpack.c.bf16 %v3908_v47, %v3906_v38 }
 0x4c7   : > { %v3989_v28 = vpack.c.bf16 %v3909_v16, %v3907_v31  ;;  %v3735_v14 = vpop.f32.mrb[224].mxu1 }
 0x4c8   : > { %v3736_v17 = vadd.f32 %v3735_v14, %v8052_v15  ;;  %v3737_v34 = vpop.f32.mrb[225].mxu1 }
 0x4c9   : > { %v3738_v8 = vadd.f32 %v3737_v34, %v8056_v45  ;;  %v3739_v18 = vpop.f32.mrb[226].mxu1 }
 0x4ca   : > { %v3740_v41 = vadd.f32 %v3739_v18, %v8052_v15  ;;  %v3741_v20 = vpop.f32.mrb[227].mxu1  ;;  %v3910_v61 = vmax.f32 %v3736_v17, 0.0 }
 0x4cb   : > { %v3742_v30 = vadd.f32 %v3741_v20, %v8056_v45  ;;  %v3911_v19 = vmax.f32 %v3738_v8, 0.0 }
 0x4cc   : > { %v3912_v55 = vmax.f32 %v3740_v41, 0.0  ;;  %4326 = vmatmul.mubr.bf16.gmra.mrb[76].mxu1 %v8235_v49 }
 0x4cd   : > { %v3913_v35 = vmax.f32 %v3742_v30, 0.0  ;;  %4333 = vmatprep.mubr.bf16.mxu1 %v3983_v63 }
 0x4ce   : > { %v8270_v46 = vpack.c.bf16 %v3912_v55, %v3910_v61 }
 0x4cf   : > { %v3991_v12 = vpack.c.bf16 %v3913_v35, %v3911_v19  ;;  %v3745_v39 = vpop.f32.mrb[228].mxu1 }
 0x4d0   : > { %v3746_v36 = vadd.f32 %v3745_v39, %v8052_v15  ;;  %v3747_v29 = vpop.f32.mrb[229].mxu1 }
 0x4d1   : > { %v3748_v10 = vadd.f32 %v3747_v29, %v8056_v45  ;;  %v3749_v6 = vpop.f32.mrb[230].mxu1 }
 0x4d2   : > { %v3750_v52 = vadd.f32 %v3749_v6, %v8052_v15  ;;  %v3751_v4 = vpop.f32.mrb[231].mxu1  ;;  %v3914_v51 = vmax.f32 %v3746_v36, 0.0 }
 0x4d3   : > { %v3752_v42 = vadd.f32 %v3751_v4, %v8056_v45  ;;  %v3915_v63 = vmax.f32 %v3748_v10, 0.0 }
 0x4d4   : > { %v3916_v49 = vmax.f32 %v3750_v52, 0.0  ;;  %4334 = vmatmul.mubr.bf16.gmra.mrb[80].mxu1 %v8242_v9 }
 0x4d5   : > { %v3917_v40 = vmax.f32 %v3752_v42, 0.0  ;;  %4341 = vmatprep.mubr.bf16.mxu1 %v3985_v60 }
 0x4d6   : > { %v8277_v21 = vpack.c.bf16 %v3916_v49, %v3914_v51 }
 0x4d7   : > { %v3993_v54 = vpack.c.bf16 %v3917_v40, %v3915_v63  ;;  %v3755_v59 = vpop.f32.mrb[232].mxu1 }
 0x4d8   : > { %v3756_v33 = vadd.f32 %v3755_v59, %v8052_v15  ;;  %v3757_v3 = vpop.f32.mrb[233].mxu1 }
 0x4d9   : > { %v3758_v27 = vadd.f32 %v3757_v3, %v8056_v45  ;;  %v3759_v23 = vpop.f32.mrb[234].mxu1 }
 0x4da   : > { %v3760_v0 = vadd.f32 %v3759_v23, %v8052_v15  ;;  %v3761_v58 = vpop.f32.mrb[235].mxu1  ;;  %v3918_v2 = vmax.f32 %v3756_v33, 0.0 }
 0x4db   : > { %v3762_v44 = vadd.f32 %v3761_v58, %v8056_v45  ;;  %v3919_v60 = vmax.f32 %v3758_v27, 0.0 }
 0x4dc   : > { %v3920_v9 = vmax.f32 %v3760_v0, 0.0  ;;  %4342 = vmatmul.mubr.bf16.gmra.mrb[84].mxu1 %v8249_v24 }
 0x4dd   : > { %v3921_v32 = vmax.f32 %v3762_v44, 0.0  ;;  %4349 = vmatprep.mubr.bf16.mxu1 %v3987_v43 }
 0x4de   : > { %v8284_v7 = vpack.c.bf16 %v3920_v9, %v3918_v2 }
 0x4df   : > { %v3995_v48 = vpack.c.bf16 %v3921_v32, %v3919_v60  ;;  %v3765_v11 = vpop.f32.mrb[236].mxu1 }
 0x4e0   : > { %v3766_v26 = vadd.f32 %v3765_v11, %v8052_v15  ;;  %v3767_v22 = vpop.f32.mrb[237].mxu1 }
 0x4e1   : > { %v3768_v1 = vadd.f32 %v3767_v22, %v8056_v45  ;;  %v3769_v56 = vpop.f32.mrb[238].mxu1 }
 0x4e2   : > { %v3770_v62 = vadd.f32 %v3769_v56, %v8052_v15  ;;  %v3771_v53 = vpop.f32.mrb[239].mxu1  ;;  %v3922_v13 = vmax.f32 %v3766_v26, 0.0 }
 0x4e3   : > { %v3772_v50 = vadd.f32 %v3771_v53, %v8056_v45  ;;  %v3923_v43 = vmax.f32 %v3768_v1, 0.0 }
 0x4e4   : > { %v3924_v24 = vmax.f32 %v3770_v62, 0.0  ;;  %4350 = vmatmul.mubr.bf16.gmra.mrb[88].mxu1 %v8256_v5 }
 0x4e5   : > { %v3925_v25 = vmax.f32 %v3772_v50, 0.0  ;;  %4357 = vmatprep.mubr.bf16.mxu1 %v3989_v28  ;;  %v8318_v50 = vld [vmem:[%s9025_s6] ss:$0 sm:$0xff] }
 0x4e6   : > { %v8291_v57 = vpack.c.bf16 %v3924_v24, %v3922_v13 }
 0x4e7   : > { %v3997_v38 = vpack.c.bf16 %v3925_v25, %v3923_v43  ;;  %v3775_v47 = vpop.f32.mrb[240].mxu1 }
 0x4e8   : > { %v3776_v31 = vadd.f32 %v3775_v47, %v8052_v15  ;;  %v3777_v16 = vpop.f32.mrb[241].mxu1 }
 0x4e9   : > { %v3778_v14 = vadd.f32 %v3777_v16, %v8056_v45  ;;  %v3779_v17 = vpop.f32.mrb[242].mxu1 }
 0x4ea   : > { %v3780_v34 = vadd.f32 %v3779_v17, %v8052_v15  ;;  %v3781_v8 = vpop.f32.mrb[243].mxu1  ;;  %v3926_v41 = vmax.f32 %v3776_v31, 0.0 }
 0x4eb   : > { %v3782_v18 = vadd.f32 %v3781_v8, %v8056_v45  ;;  %v3927_v28 = vmax.f32 %v3778_v14, 0.0 }
 0x4ec   : > { %v3928_v5 = vmax.f32 %v3780_v34, 0.0  ;;  %4358 = vmatmul.mubr.bf16.gmra.mrb[92].mxu1 %v8263_v37 }
 0x4ed   : > { %v3929_v20 = vmax.f32 %v3782_v18, 0.0  ;;  %4365 = vmatprep.mubr.bf16.mxu1 %v3991_v12 }
 0x4ee   : > { %v8298_v30 = vpack.c.bf16 %v3928_v5, %v3926_v41 }
 0x4ef   : > { %v3999_v61 = vpack.c.bf16 %v3929_v20, %v3927_v28  ;;  %v3785_v55 = vpop.f32.mrb[244].mxu1 }
 0x4f0   : > { %v3786_v19 = vadd.f32 %v3785_v55, %v8052_v15  ;;  %v3787_v35 = vpop.f32.mrb[245].mxu1 }
 0x4f1   : > { %v3788_v39 = vadd.f32 %v3787_v35, %v8056_v45  ;;  %v3789_v36 = vpop.f32.mrb[246].mxu1 }
 0x4f2   : > { %v3790_v29 = vadd.f32 %v3789_v36, %v8052_v15  ;;  %v3791_v10 = vpop.f32.mrb[247].mxu1  ;;  %v3930_v52 = vmax.f32 %v3786_v19, 0.0 }
 0x4f3   : > { %v3792_v6 = vadd.f32 %v3791_v10, %v8056_v45  ;;  %v3931_v12 = vmax.f32 %v3788_v39, 0.0 }
 0x4f4   : > { %v3932_v37 = vmax.f32 %v3790_v29, 0.0  ;;  %4366 = vmatmul.mubr.bf16.gmra.mrb[96].mxu1 %v8270_v46 }
 0x4f5   : > { %v3933_v4 = vmax.f32 %v3792_v6, 0.0  ;;  %4373 = vmatprep.mubr.bf16.mxu1 %v3993_v54 }
 0x4f6   : > { %v4000_v42 = vpack.c.bf16 %v3932_v37, %v3930_v52 }
 0x4f7   : > { %v4001_v51 = vpack.c.bf16 %v3933_v4, %v3931_v12  ;;  %v3795_v49 = vpop.f32.mrb[248].mxu1 }
 0x4f8   : > { %v3796_v63 = vadd.f32 %v3795_v49, %v8052_v15  ;;  %v3797_v40 = vpop.f32.mrb[249].mxu1 }
 0x4f9   : > { %v3798_v59 = vadd.f32 %v3797_v40, %v8056_v45  ;;  %v3799_v33 = vpop.f32.mrb[250].mxu1 }
 0x4fa   : > { %v3800_v3 = vadd.f32 %v3799_v33, %v8052_v15  ;;  %v3801_v27 = vpop.f32.mrb[251].mxu1  ;;  %v3934_v0 = vmax.f32 %v3796_v63, 0.0 }
 0x4fb   : > { %v3802_v23 = vadd.f32 %v3801_v27, %v8056_v45  ;;  %v3935_v46 = vmax.f32 %v3798_v59, 0.0 }
 0x4fc   : > { %v3936_v58 = vmax.f32 %v3800_v3, 0.0  ;;  %4374 = vmatmul.mubr.bf16.gmra.mrb[100].mxu1 %v8277_v21 }
 0x4fd   : > { %v3937_v54 = vmax.f32 %v3802_v23, 0.0  ;;  %4381 = vmatprep.mubr.bf16.mxu1 %v3995_v48 }
 0x4fe   : > { %v4002_v44 = vpack.c.bf16 %v3936_v58, %v3934_v0 }
 0x4ff   : > { %v4003_v2 = vpack.c.bf16 %v3937_v54, %v3935_v46  ;;  %v3805_v9 = vpop.f32.mrb[252].mxu1 }
 0x500   : > { %v3806_v60 = vadd.f32 %v3805_v9, %v8052_v15  ;;  %v3807_v32 = vpop.f32.mrb[253].mxu1 }
 0x501   : > { %v3808_v11 = vadd.f32 %v3807_v32, %v8056_v45  ;;  %v3809_v26 = vpop.f32.mrb[254].mxu1 }
 0x502   : > { %v3810_v22 = vadd.f32 %v3809_v26, %v8052_v15  ;;  %v3811_v1 = vpop.f32.mrb[255].mxu1  ;;  %v3938_v62 = vmax.f32 %v3806_v60, 0.0 }
 0x503   : > { %v3812_v56 = vadd.f32 %v3811_v1, %v8056_v45  ;;  %v3939_v21 = vmax.f32 %v3808_v11, 0.0 }
 0x504   : > { %v3940_v53 = vmax.f32 %v3810_v22, 0.0  ;;  %4382 = vmatmul.mubr.bf16.gmra.mrb[104].mxu1 %v8284_v7 }
 0x505   : > { %v3941_v48 = vmax.f32 %v3812_v56, 0.0  ;;  %4389 = vmatprep.mubr.bf16.mxu1 %v3997_v38 }
 0x506   : > { %v4004_v13 = vpack.c.bf16 %v3940_v53, %v3938_v62 }
 0x507   : > { %v4005_v24 = vpack.c.bf16 %v3941_v48, %v3939_v21  ;;  %v4175_v43 = vpop.f32.mrb[0].mxu1 }
 0x508   : > { %v8321_v15 = vadd.f32 %v8318_v50, %v4175_v43  ;;  %v4177_v25 = vpop.f32.mrb[1].mxu1 }
 0x509   : > { %v4178_v45 = vpop.f32.mrb[2].mxu1 }
 0x50a   : > { %v4180_v47 = vpop.f32.mrb[3].mxu1  ;;  %4430 = vmax.xlane.f32.xlu0 %v8321_v15  ;;  %v8325_v7 = vadd.f32 %v8318_v50, %v4178_v45 }
 0x50c   : > { %4390 = vmatmul.mubr.bf16.gmra.mrb[108].mxu1 %v8291_v57 }
 0x50d   : > { %4397 = vmatprep.mubr.bf16.mxu1 %v3999_v61 }
 0x50e   : > { %4432 = vmax.xlane.f32.xlu0 %v8325_v7 }
 0x50f   : > { %v4183_v38 = vpop.f32.mrb[4].mxu1 }
 0x510   : > { %v8330_v31 = vadd.f32 %v8318_v50, %v4183_v38  ;;  %v4185_v16 = vpop.f32.mrb[5].mxu1 }
 0x511   : > { %v4186_v14 = vpop.f32.mrb[6].mxu1 }
 0x512   : > { %v4188_v17 = vpop.f32.mrb[7].mxu1  ;;  %4434 = vmax.xlane.f32.xlu1 %v8330_v31  ;;  %v8334_v34 = vadd.f32 %v8318_v50, %v4186_v14 }
 0x514   : > { %4398 = vmatmul.mubr.bf16.gmra.mrb[112].mxu1 %v8298_v30 }
 0x515   : > { %4405 = vmatprep.mubr.bf16.mxu1 %v4001_v51 }
 0x516   : > { %4436 = vmax.xlane.f32.xlu1 %v8334_v34 }
 0x517   : > { %v4191_v57 = vpop.f32.mrb[8].mxu1 }
 0x518   : > { %v8339_v8 = vadd.f32 %v8318_v50, %v4191_v57  ;;  %v4193_v18 = vpop.f32.mrb[9].mxu1 }
 0x519   : > { %v4194_v41 = vpop.f32.mrb[10].mxu1 }
 0x51a   : > { %v8342_v5 = vadd.f32 %v8318_v50, %v4194_v41  ;;  %v4196_v28 = vpop.f32.mrb[11].mxu1  ;;  %4438 = vmax.xlane.f32.xlu0 %v8339_v8 }
 0x51c   : > { %4406 = vmatmul.mubr.bf16.gmra.mrb[116].mxu1 %v4000_v42  ;;  %4440 = vmax.xlane.f32.xlu1 %v8342_v5 }
 0x51d   : > { %4413 = vmatprep.mubr.bf16.mxu1 %v4003_v2 }
 0x51f   : > { %v4199_v20 = vpop.f32.mrb[12].mxu1 }
 0x520   : > { %v8347_v30 = vadd.f32 %v8318_v50, %v4199_v20  ;;  %v4201_v61 = vpop.f32.mrb[13].mxu1 }
 0x521   : > { %v4202_v55 = vpop.f32.mrb[14].mxu1 }
 0x522   : > { %v8350_v19 = vadd.f32 %v8318_v50, %v4202_v55  ;;  %v4204_v35 = vpop.f32.mrb[15].mxu1  ;;  %4442 = vmax.xlane.f32.xlu0 %v8347_v30 }
 0x524   : > { %4414 = vmatmul.mubr.bf16.gmra.mrb[120].mxu1 %v4002_v44  ;;  %4444 = vmax.xlane.f32.xlu1 %v8350_v19 }
 0x525   : > { %4421 = vmatprep.mubr.bf16.mxu1 %v4005_v24 }
 0x527   : > { %v4207_v39 = vpop.f32.mrb[16].mxu1 }
 0x528   : > { %v8355_v36 = vadd.f32 %v8318_v50, %v4207_v39  ;;  %v4209_v29 = vpop.f32.mrb[17].mxu1 }
 0x529   : > { %v4210_v10 = vpop.f32.mrb[18].mxu1 }
 0x52a   : > { %v8358_v6 = vadd.f32 %v8318_v50, %v4210_v10  ;;  %v4212_v52 = vpop.f32.mrb[19].mxu1  ;;  %4446 = vmax.xlane.f32.xlu0 %v8355_v36 }
 0x52c   : > { %4422 = vmatmul.mubr.bf16.gmra.mrb[124].mxu1 %v4004_v13  ;;  %4448 = vmax.xlane.f32.xlu1 %v8358_v6 }
 0x52f   : > { %v4215_v37 = vpop.f32.mrb[20].mxu1 }
 0x530   : > { %v8363_v12 = vadd.f32 %v8318_v50, %v4215_v37  ;;  %v4217_v4 = vpop.f32.mrb[21].mxu1 }
 0x531   : > { %v4218_v42 = vpop.f32.mrb[22].mxu1 }
 0x532   : > { %v8366_v51 = vadd.f32 %v8318_v50, %v4218_v42  ;;  %v4220_v49 = vpop.f32.mrb[23].mxu1  ;;  %4450 = vmax.xlane.f32.xlu0 %v8363_v12 }
 0x534   : > { %4452 = vmax.xlane.f32.xlu1 %v8366_v51 }
 0x537   : > { %v4223_v63 = vpop.f32.mrb[24].mxu1 }
 0x538   : > { %v8371_v40 = vadd.f32 %v8318_v50, %v4223_v63  ;;  %v4225_v59 = vpop.f32.mrb[25].mxu1 }
 0x539   : > { %v4226_v33 = vpop.f32.mrb[26].mxu1 }
 0x53a   : > { %v8374_v3 = vadd.f32 %v8318_v50, %v4226_v33  ;;  %v4228_v27 = vpop.f32.mrb[27].mxu1  ;;  %4454 = vmax.xlane.f32.xlu0 %v8371_v40 }
 0x53c   : > { %4456 = vmax.xlane.f32.xlu1 %v8374_v3 }
 0x53f   : > { %v4231_v23 = vpop.f32.mrb[28].mxu1 }
 0x540   : > { %v8379_v0 = vadd.f32 %v8318_v50, %v4231_v23  ;;  %v4233_v58 = vpop.f32.mrb[29].mxu1 }
 0x541   : > { %v4234_v46 = vpop.f32.mrb[30].mxu1 }
 0x542   : > { %v8382_v54 = vadd.f32 %v8318_v50, %v4234_v46  ;;  %v4236_v44 = vpop.f32.mrb[31].mxu1  ;;  %4458 = vmax.xlane.f32.xlu0 %v8379_v0 }
 0x544   : > { %4460 = vmax.xlane.f32.xlu1 %v8382_v54 }
 0x547   : > { %v4239_v2 = vpop.f32.mrb[32].mxu1 }
 0x548   : > { %v8387_v9 = vadd.f32 %v8318_v50, %v4239_v2  ;;  %v4241_v60 = vpop.f32.mrb[33].mxu1 }
 0x549   : > { %v4242_v32 = vpop.f32.mrb[34].mxu1 }
 0x54a   : > { %v8390_v11 = vadd.f32 %v8318_v50, %v4242_v32  ;;  %v4244_v26 = vpop.f32.mrb[35].mxu1  ;;  %4462 = vmax.xlane.f32.xlu0 %v8387_v9 }
 0x54c   : > { %4464 = vmax.xlane.f32.xlu1 %v8390_v11 }
 0x54f   : > { %v4247_v22 = vpop.f32.mrb[36].mxu1 }
 0x550   : > { %v8395_v1 = vadd.f32 %v8318_v50, %v4247_v22  ;;  %v4249_v56 = vpop.f32.mrb[37].mxu1 }
 0x551   : > { %v4250_v62 = vpop.f32.mrb[38].mxu1 }
 0x552   : > { %v8398_v53 = vadd.f32 %v8318_v50, %v4250_v62  ;;  %v4252_v21 = vpop.f32.mrb[39].mxu1  ;;  %4466 = vmax.xlane.f32.xlu0 %v8395_v1 }
 0x554   : > { %4468 = vmax.xlane.f32.xlu1 %v8398_v53 }
 0x557   : > { %v4255_v48 = vpop.f32.mrb[40].mxu1 }
 0x558   : > { %v8403_v13 = vadd.f32 %v8318_v50, %v4255_v48  ;;  %v4257_v24 = vpop.f32.mrb[41].mxu1 }
 0x559   : > { %v4258_v43 = vpop.f32.mrb[42].mxu1 }
 0x55a   : > { %v8406_v25 = vadd.f32 %v8318_v50, %v4258_v43  ;;  %v4260_v45 = vpop.f32.mrb[43].mxu1  ;;  %4470 = vmax.xlane.f32.xlu0 %v8403_v13 }
 0x55c   : > { %4472 = vmax.xlane.f32.xlu1 %v8406_v25 }
 0x55f   : > { %v4263_v47 = vpop.f32.mrb[44].mxu1 }
 0x560   : > { %v8411_v38 = vadd.f32 %v8318_v50, %v4263_v47  ;;  %v4265_v16 = vpop.f32.mrb[45].mxu1 }
 0x561   : > { %v4266_v14 = vpop.f32.mrb[46].mxu1 }
 0x562   : > { %v8414_v17 = vadd.f32 %v8318_v50, %v4266_v14  ;;  %v4268_v57 = vpop.f32.mrb[47].mxu1  ;;  %4474 = vmax.xlane.f32.xlu0 %v8411_v38 }
 0x564   : > { %4476 = vmax.xlane.f32.xlu1 %v8414_v17 }
 0x567   : > { %v4271_v18 = vpop.f32.mrb[48].mxu1 }
 0x568   : > { %v8419_v41 = vadd.f32 %v8318_v50, %v4271_v18  ;;  %v4273_v28 = vpop.f32.mrb[49].mxu1 }
 0x569   : > { %v4274_v20 = vpop.f32.mrb[50].mxu1 }
 0x56a   : > { %v8422_v61 = vadd.f32 %v8318_v50, %v4274_v20  ;;  %v4276_v55 = vpop.f32.mrb[51].mxu1  ;;  %4478 = vmax.xlane.f32.xlu0 %v8419_v41 }
 0x56c   : > { %4480 = vmax.xlane.f32.xlu1 %v8422_v61 }
 0x56f   : > { %v4279_v35 = vpop.f32.mrb[52].mxu1 }
 0x570   : > { %v8427_v39 = vadd.f32 %v8318_v50, %v4279_v35  ;;  %v4281_v29 = vpop.f32.mrb[53].mxu1 }
 0x571   : > { %v4282_v10 = vpop.f32.mrb[54].mxu1 }
 0x572   : > { %v8430_v52 = vadd.f32 %v8318_v50, %v4282_v10  ;;  %v4284_v37 = vpop.f32.mrb[55].mxu1  ;;  %4482 = vmax.xlane.f32.xlu0 %v8427_v39 }
 0x574   : > { %4484 = vmax.xlane.f32.xlu1 %v8430_v52 }
 0x577   : > { %v4287_v4 = vpop.f32.mrb[56].mxu1 }
 0x578   : > { %v8435_v42 = vadd.f32 %v8318_v50, %v4287_v4  ;;  %v4289_v49 = vpop.f32.mrb[57].mxu1 }
 0x579   : > { %v4290_v63 = vpop.f32.mrb[58].mxu1 }
 0x57a   : > { %v8438_v59 = vadd.f32 %v8318_v50, %v4290_v63  ;;  %v4292_v33 = vpop.f32.mrb[59].mxu1  ;;  %4486 = vmax.xlane.f32.xlu0 %v8435_v42 }
 0x57c   : > { %4488 = vmax.xlane.f32.xlu1 %v8438_v59 }
 0x57f   : > { %v4295_v27 = vpop.f32.mrb[60].mxu1 }
 0x580   : > { %v8443_v23 = vadd.f32 %v8318_v50, %v4295_v27  ;;  %v4297_v58 = vpop.f32.mrb[61].mxu1 }
 0x581   : > { %v4298_v46 = vpop.f32.mrb[62].mxu1 }
 0x582   : > { %v8446_v44 = vadd.f32 %v8318_v50, %v4298_v46  ;;  %v4300_v2 = vpop.f32.mrb[63].mxu1  ;;  %4490 = vmax.xlane.f32.xlu0 %v8443_v23 }
 0x584   : > { %4492 = vmax.xlane.f32.xlu1 %v8446_v44 }
 0x587   : > { %v4303_v60 = vpop.f32.mrb[64].mxu1 }
 0x588   : > { %v8451_v32 = vadd.f32 %v8318_v50, %v4303_v60  ;;  %v4305_v26 = vpop.f32.mrb[65].mxu1 }
 0x589   : > { %v4306_v22 = vpop.f32.mrb[66].mxu1 }
 0x58a   : > { %v8454_v56 = vadd.f32 %v8318_v50, %v4306_v22  ;;  %v4308_v62 = vpop.f32.mrb[67].mxu1  ;;  %4494 = vmax.xlane.f32.xlu0 %v8451_v32 }
 0x58c   : > { %4496 = vmax.xlane.f32.xlu1 %v8454_v56 }
 0x58f   : > { %v4311_v21 = vpop.f32.mrb[68].mxu1 }
 0x590   : > { %v8459_v48 = vadd.f32 %v8318_v50, %v4311_v21  ;;  %v4313_v24 = vpop.f32.mrb[69].mxu1 }
 0x591   : > { %v4314_v43 = vpop.f32.mrb[70].mxu1 }
 0x592   : > { %v8462_v45 = vadd.f32 %v8318_v50, %v4314_v43  ;;  %v4316_v47 = vpop.f32.mrb[71].mxu1  ;;  %4498 = vmax.xlane.f32.xlu0 %v8459_v48 }
 0x594   : > { %4500 = vmax.xlane.f32.xlu1 %v8462_v45 }
 0x597   : > { %v4319_v16 = vpop.f32.mrb[72].mxu1  ;;  %v4431_v14 = vpop.xlane.xlu0 %4430 }
 0x598   : > { %v8467_v57 = vadd.f32 %v8318_v50, %v4319_v16  ;;  %v8470_v18 = vsub.f32 %v8321_v15, %v4431_v14  ;;  %v4321_v28 = vpop.f32.mrb[73].mxu1 }
 0x599   : > { %v4322_v20 = vpop.f32.mrb[74].mxu1 }
 0x59a   : > { %v4622_v55 = vmul.f32 1.442695, %v8470_v18  ;;  %v8474_v35 = vadd.f32 %v8318_v50, %v4322_v20  ;;  %v4324_v29 = vpop.f32.mrb[75].mxu1  ;;  %4502 = vmax.xlane.f32.xlu0 %v8467_v57 }
 0x59b   : > { %v4433_v10 = vpop.xlane.xlu0 %4432 }
 0x59c   : > { %6168 = vpow2.f32 %v4622_v55  ;;  %v8478_v37 = vsub.f32 %v8325_v7, %v4433_v10  ;;  %4504 = vmax.xlane.f32.xlu1 %v8474_v35 }
 0x59e   : > { %v4624_v15 = vmul.f32 1.442695, %v8478_v37 }
 0x59f   : > { %v4327_v4 = vpop.f32.mrb[76].mxu1  ;;  %v4435_v49 = vpop.xlane.xlu1 %4434 }
 0x5a0   : > { %6170 = vpow2.f32 %v4624_v15  ;;  %v8483_v63 = vadd.f32 %v8318_v50, %v4327_v4  ;;  %v8486_v33 = vsub.f32 %v8330_v31, %v4435_v49  ;;  %v4329_v27 = vpop.f32.mrb[77].mxu1 }
 0x5a1   : > { %v4330_v58 = vpop.f32.mrb[78].mxu1 }
 0x5a2   : > { %v4626_v46 = vmul.f32 1.442695, %v8486_v33  ;;  %v8490_v7 = vadd.f32 %v8318_v50, %v4330_v58  ;;  %v4332_v2 = vpop.f32.mrb[79].mxu1  ;;  %4506 = vmax.xlane.f32.xlu0 %v8483_v63 }
 0x5a3   : > { %v4437_v60 = vpop.xlane.xlu1 %4436 }
 0x5a4   : > { %6172 = vpow2.f32 %v4626_v46  ;;  %v8494_v26 = vsub.f32 %v8334_v34, %v4437_v60  ;;  %4508 = vmax.xlane.f32.xlu1 %v8490_v7 }
 0x5a6   : > { %v6169_v22 = vpop.eup %6168  ;;  %v4628_v31 = vmul.f32 1.442695, %v8494_v26 }
 0x5a7   : > { %v4335_v62 = vpop.f32.mrb[80].mxu1  ;;  %4750 = vadd.xlane.f32.xlu0 %v6169_v22  ;;  %v4439_v21 = vpop.xlane.xlu0 %4438 }
 0x5a8   : > { %6174 = vpow2.f32 %v4628_v31  ;;  %v8499_v24 = vadd.f32 %v8318_v50, %v4335_v62  ;;  %v8502_v43 = vsub.f32 %v8339_v8, %v4439_v21  ;;  %v4337_v47 = vpop.f32.mrb[81].mxu1 }
 0x5a9   : > { %v4338_v16 = vpop.f32.mrb[82].mxu1  ;;  %v4441_v14 = vpop.xlane.xlu1 %4440 }
 0x5aa   : > { %v6171_v34 = vpop.eup %6170  ;;  %v4630_v28 = vmul.f32 1.442695, %v8502_v43  ;;  %v8506_v20 = vsub.f32 %v8342_v5, %v4441_v14  ;;  %v4340_v55 = vpop.f32.mrb[83].mxu1  ;;  %v8511_v10 = vadd.f32 %v8318_v50, %v4338_v16 }
 0x5ab   : > { %4510 = vmax.xlane.f32.xlu0 %v8499_v24  ;;  %4752 = vadd.xlane.f32.xlu1 %v6171_v34 }
 0x5ac   : > { %6176 = vpow2.f32 %v4630_v28  ;;  %v4632_v29 = vmul.f32 1.442695, %v8506_v20 }
 0x5ae   : > { %v6173_v8 = vpop.eup %6172  ;;  %6178 = vpow2.f32 %v4632_v29 }
 0x5af   : > { %v4343_v15 = vpop.f32.mrb[84].mxu1  ;;  %4754 = vadd.xlane.f32.xlu0 %v6173_v8  ;;  %4512 = vmax.xlane.f32.xlu1 %v8511_v10  ;;  %v4443_v4 = vpop.xlane.xlu0 %4442 }
 0x5b0   : > { %v8515_v5 = vadd.f32 %v8318_v50, %v4343_v15  ;;  %v8518_v49 = vsub.f32 %v8347_v30, %v4443_v4  ;;  %v4345_v27 = vpop.f32.mrb[85].mxu1 }
 0x5b1   : > { %v4346_v58 = vpop.f32.mrb[86].mxu1  ;;  %v4445_v46 = vpop.xlane.xlu1 %4444 }
 0x5b2   : > { %v6175_v2 = vpop.eup %6174  ;;  %v4634_v60 = vmul.f32 1.442695, %v8518_v49  ;;  %v8522_v22 = vsub.f32 %v8350_v19, %v4445_v46  ;;  %v4348_v31 = vpop.f32.mrb[87].mxu1  ;;  %v8527_v21 = vadd.f32 %v8318_v50, %v4346_v58 }
 0x5b3   : > { %4514 = vmax.xlane.f32.xlu0 %v8515_v5  ;;  %4756 = vadd.xlane.f32.xlu1 %v6175_v2 }
 0x5b4   : > { %6180 = vpow2.f32 %v4634_v60  ;;  %v4636_v62 = vmul.f32 1.442695, %v8522_v22 }
 0x5b6   : > { %v6177_v30 = vpop.eup %6176  ;;  %6182 = vpow2.f32 %v4636_v62 }
 0x5b7   : > { %v4351_v47 = vpop.f32.mrb[88].mxu1  ;;  %4516 = vmax.xlane.f32.xlu1 %v8527_v21  ;;  %4758 = vadd.xlane.f32.xlu0 %v6177_v30  ;;  %v4447_v16 = vpop.xlane.xlu0 %4446 }
 0x5b8   : > { %v8531_v19 = vadd.f32 %v8318_v50, %v4351_v47  ;;  %v8534_v14 = vsub.f32 %v8355_v36, %v4447_v16  ;;  %v4353_v34 = vpop.f32.mrb[89].mxu1  ;;  %v6179_v29 = vpop.eup %6178 }
 0x5b9   : > { %v4354_v28 = vpop.f32.mrb[90].mxu1  ;;  %v4449_v55 = vpop.xlane.xlu1 %4448 }
 0x5ba   : > { %v4638_v8 = vmul.f32 1.442695, %v8534_v14  ;;  %v8538_v15 = vsub.f32 %v8358_v6, %v4449_v55  ;;  %v4356_v4 = vpop.f32.mrb[91].mxu1  ;;  %v8543_v58 = vadd.f32 %v8318_v50, %v4354_v28 }
 0x5bb   : > { %4760 = vadd.xlane.f32.xlu1 %v6179_v29  ;;  %4518 = vmax.xlane.f32.xlu0 %v8531_v19 }
 0x5bc   : > { %6184 = vpow2.f32 %v4638_v8  ;;  %v4640_v27 = vmul.f32 1.442695, %v8538_v15 }
 0x5be   : > { %v6181_v36 = vpop.eup %6180  ;;  %6186 = vpow2.f32 %v4640_v27 }
 0x5bf   : > { %v4359_v46 = vpop.f32.mrb[92].mxu1  ;;  %4520 = vmax.xlane.f32.xlu1 %v8543_v58  ;;  %4762 = vadd.xlane.f32.xlu0 %v6181_v36  ;;  %v4451_v2 = vpop.xlane.xlu0 %4450 }
 0x5c0   : > { %v8547_v6 = vadd.f32 %v8318_v50, %v4359_v46  ;;  %v8550_v60 = vsub.f32 %v8363_v12, %v4451_v2  ;;  %v4361_v31 = vpop.f32.mrb[93].mxu1  ;;  %v6183_v47 = vpop.eup %6182 }
 0x5c1   : > { %v4362_v62 = vpop.f32.mrb[94].mxu1  ;;  %v4453_v30 = vpop.xlane.xlu1 %4452 }
 0x5c2   : > { %v4642_v16 = vmul.f32 1.442695, %v8550_v60  ;;  %v8554_v34 = vsub.f32 %v8366_v51, %v4453_v30  ;;  %v4364_v28 = vpop.f32.mrb[95].mxu1  ;;  %v8559_v29 = vadd.f32 %v8318_v50, %v4362_v62 }
 0x5c3   : > { %4764 = vadd.xlane.f32.xlu1 %v6183_v47  ;;  %4522 = vmax.xlane.f32.xlu0 %v8547_v6 }
 0x5c4   : > { %6188 = vpow2.f32 %v4642_v16  ;;  %v4644_v55 = vmul.f32 1.442695, %v8554_v34 }
 0x5c6   : > { %v6185_v12 = vpop.eup %6184  ;;  %6190 = vpow2.f32 %v4644_v55 }
 0x5c7   : > { %v4367_v8 = vpop.f32.mrb[96].mxu1  ;;  %4524 = vmax.xlane.f32.xlu1 %v8559_v29  ;;  %4766 = vadd.xlane.f32.xlu0 %v6185_v12  ;;  %v4455_v4 = vpop.xlane.xlu0 %4454 }
 0x5c8   : > { %v8563_v51 = vadd.f32 %v8318_v50, %v4367_v8  ;;  %v8566_v27 = vsub.f32 %v8371_v40, %v4455_v4  ;;  %v4369_v36 = vpop.f32.mrb[97].mxu1  ;;  %v6187_v31 = vpop.eup %6186 }
 0x5c9   : > { %v4370_v46 = vpop.f32.mrb[98].mxu1  ;;  %v4457_v2 = vpop.xlane.xlu1 %4456 }
 0x5ca   : > { %v4646_v62 = vmul.f32 1.442695, %v8566_v27  ;;  %v8570_v30 = vsub.f32 %v8374_v3, %v4457_v2  ;;  %v4372_v47 = vpop.f32.mrb[99].mxu1  ;;  %v8575_v28 = vadd.f32 %v8318_v50, %v4370_v46 }
 0x5cb   : > { %4768 = vadd.xlane.f32.xlu1 %v6187_v31  ;;  %4526 = vmax.xlane.f32.xlu0 %v8563_v51 }
 0x5cc   : > { %6192 = vpow2.f32 %v4646_v62  ;;  %v4648_v16 = vmul.f32 1.442695, %v8570_v30 }
 0x5ce   : > { %v6189_v40 = vpop.eup %6188  ;;  %6194 = vpow2.f32 %v4648_v16 }
 0x5cf   : > { %v4375_v55 = vpop.f32.mrb[100].mxu1  ;;  %4528 = vmax.xlane.f32.xlu1 %v8575_v28  ;;  %4770 = vadd.xlane.f32.xlu0 %v6189_v40  ;;  %v4459_v12 = vpop.xlane.xlu0 %4458 }
 0x5d0   : > { %v8579_v3 = vadd.f32 %v8318_v50, %v4375_v55  ;;  %v8582_v8 = vsub.f32 %v8379_v0, %v4459_v12  ;;  %v4377_v4 = vpop.f32.mrb[101].mxu1  ;;  %v6191_v31 = vpop.eup %6190 }
 0x5d1   : > { %v4378_v36 = vpop.f32.mrb[102].mxu1  ;;  %v4461_v2 = vpop.xlane.xlu1 %4460 }
 0x5d2   : > { %9140 = vst [vmem:[#allocation5_spill] sm:$0xff] %v8582_v8  ;;  %v4650_v46 = vmul.f32 1.442695, %v8582_v8  ;;  %v8586_v62 = vsub.f32 %v8382_v54, %v4461_v2  ;;  %v4380_v47 = vpop.f32.mrb[103].mxu1  ;;  %v8591_v40 = vadd.f32 %v8318_v50, %v4378_v36 }
 0x5d3   : > { %4772 = vadd.xlane.f32.xlu1 %v6191_v31  ;;  %4530 = vmax.xlane.f32.xlu0 %v8579_v3 }
 0x5d4   : > { %9141 = vst [vmem:[#allocation6_spill] sm:$0xff] %v8586_v62  ;;  %6196 = vpow2.f32 %v4650_v46  ;;  %v4652_v16 = vmul.f32 1.442695, %v8586_v62 }
 0x5d6   : > { %v6193_v0 = vpop.eup %6192  ;;  %6198 = vpow2.f32 %v4652_v16 }
 0x5d7   : > { %v4383_v55 = vpop.f32.mrb[104].mxu1  ;;  %4532 = vmax.xlane.f32.xlu1 %v8591_v40  ;;  %4774 = vadd.xlane.f32.xlu0 %v6193_v0  ;;  %v4463_v12 = vpop.xlane.xlu0 %4462 }
 0x5d8   : > { %v8595_v54 = vadd.f32 %v8318_v50, %v4383_v55  ;;  %v8598_v4 = vsub.f32 %v8387_v9, %v4463_v12  ;;  %v4385_v2 = vpop.f32.mrb[105].mxu1  ;;  %v6195_v47 = vpop.eup %6194 }
 0x5d9   : > { %v4386_v31 = vpop.f32.mrb[106].mxu1  ;;  %v4465_v46 = vpop.xlane.xlu1 %4464 }
 0x5da   : > { %9142 = vst [vmem:[#allocation7_spill] sm:$0xff] %v8598_v4  ;;  %v4654_v36 = vmul.f32 1.442695, %v8598_v4  ;;  %v8602_v62 = vsub.f32 %v8390_v11, %v4465_v46  ;;  %v4388_v8 = vpop.f32.mrb[107].mxu1  ;;  %v8607_v0 = vadd.f32 %v8318_v50, %v4386_v31 }
 0x5db   : > { %4776 = vadd.xlane.f32.xlu1 %v6195_v47  ;;  %4534 = vmax.xlane.f32.xlu0 %v8595_v54 }
 0x5dc   : > { %9143 = vst [vmem:[#allocation8_spill] sm:$0xff] %v8602_v62  ;;  %6200 = vpow2.f32 %v4654_v36  ;;  %v4656_v16 = vmul.f32 1.442695, %v8602_v62 }
 0x5de   : > { %v6197_v9 = vpop.eup %6196  ;;  %6202 = vpow2.f32 %v4656_v16 }
 0x5df   : > { %v4391_v55 = vpop.f32.mrb[108].mxu1  ;;  %4536 = vmax.xlane.f32.xlu1 %v8607_v0  ;;  %4778 = vadd.xlane.f32.xlu0 %v6197_v9  ;;  %v4467_v12 = vpop.xlane.xlu0 %4466 }
 0x5e0   : > { %v8611_v11 = vadd.f32 %v8318_v50, %v4391_v55  ;;  %v8614_v8 = vsub.f32 %v8395_v1, %v4467_v12  ;;  %v4393_v2 = vpop.f32.mrb[109].mxu1  ;;  %v6199_v36 = vpop.eup %6198 }
 0x5e1   : > { %v4394_v46 = vpop.f32.mrb[110].mxu1  ;;  %v4469_v47 = vpop.xlane.xlu1 %4468 }
 0x5e2   : > { %9144 = vst [vmem:[#allocation9_spill] sm:$0xff] %v8614_v8  ;;  %v4658_v31 = vmul.f32 1.442695, %v8614_v8  ;;  %v8618_v62 = vsub.f32 %v8398_v53, %v4469_v47  ;;  %v4396_v4 = vpop.f32.mrb[111].mxu1  ;;  %v8623_v9 = vadd.f32 %v8318_v50, %v4394_v46 }
 0x5e3   : > { %4780 = vadd.xlane.f32.xlu1 %v6199_v36  ;;  %4538 = vmax.xlane.f32.xlu0 %v8611_v11 }
 0x5e4   : > { %9145 = vst [vmem:[#allocation10_spill] sm:$0xff] %v8618_v62  ;;  %6204 = vpow2.f32 %v4658_v31  ;;  %v4660_v16 = vmul.f32 1.442695, %v8618_v62 }
 0x5e6   : > { %v6201_v1 = vpop.eup %6200  ;;  %6206 = vpow2.f32 %v4660_v16 }
 0x5e7   : > { %v4399_v55 = vpop.f32.mrb[112].mxu1  ;;  %4540 = vmax.xlane.f32.xlu1 %v8623_v9  ;;  %4782 = vadd.xlane.f32.xlu0 %v6201_v1  ;;  %v4471_v1 = vpop.xlane.xlu0 %4470 }
 0x5e8   : > { %v8627_v12 = vadd.f32 %v8318_v50, %v4399_v55  ;;  %v4401_v53 = vpop.f32.mrb[113].mxu1  ;;  %v6203_v2 = vpop.eup %6202 }
 0x5e9   : > { %v4402_v4 = vpop.f32.mrb[114].mxu1  ;;  %v4473_v8 = vpop.xlane.xlu1 %4472 }
 0x5ea   : > { %9146 = vst [vmem:[#allocation11_spill] sm:$0xff] %v8627_v12  ;;  %v4404_v47 = vpop.f32.mrb[115].mxu1  ;;  %v8631_v36 = vadd.f32 %v8318_v50, %v4402_v4 }
 0x5eb   : > { %4784 = vadd.xlane.f32.xlu1 %v6203_v2  ;;  %4542 = vmax.xlane.f32.xlu0 %v8627_v12  ;;  %v8638_v2 = vsub.f32 %v8403_v13, %v4471_v1  ;;  %v8642_v12 = vsub.f32 %v8406_v25, %v4473_v8 }
 0x5ec   : > { %9147 = vst [vmem:[#allocation12_spill] sm:$0xff] %v8631_v36 }
 0x5ed   : > { %9149 = vst [vmem:[#allocation14_spill] sm:$0xff] %v8638_v2  ;;  %v4664_v25 = vmul.f32 1.442695, %v8642_v12 }
 0x5ee   : > { %v6205_v46 = vpop.eup %6204 }
 0x5ef   : > { %v4407_v31 = vpop.f32.mrb[116].mxu1  ;;  %4544 = vmax.xlane.f32.xlu1 %v8631_v36  ;;  %4786 = vadd.xlane.f32.xlu0 %v6205_v46  ;;  %v4475_v4 = vpop.xlane.xlu0 %4474 }
 0x5f0   : > { %v8635_v16 = vadd.f32 %v8318_v50, %v4407_v31  ;;  %v4409_v55 = vpop.f32.mrb[117].mxu1  ;;  %v6207_v62 = vpop.eup %6206  ;;  %v8649_v36 = vsub.f32 %v8411_v38, %v4475_v4 }
 0x5f1   : > { %v4410_v53 = vpop.f32.mrb[118].mxu1  ;;  %v4477_v31 = vpop.xlane.xlu1 %4476  ;;  %v4662_v55 = vmul.f32 1.442695, %v8638_v2 }
 0x5f2   : > { %9148 = vst [vmem:[#allocation13_spill] sm:$0xff] %v8635_v16  ;;  %v4412_v47 = vpop.f32.mrb[119].mxu1  ;;  %v8645_v46 = vadd.f32 %v8318_v50, %v4410_v53  ;;  %9150 = vst [vmem:[#allocation15_spill] sm:$0xff] %v8649_v36  ;;  %v8657_v8 = vsub.f32 %v8414_v17, %v4477_v31  ;;  %v4666_v4 = vmul.f32 1.442695, %v8649_v36 }
 0x5f3   : > { %4788 = vadd.xlane.f32.xlu1 %v6207_v62  ;;  %4546 = vmax.xlane.f32.xlu0 %v8635_v16  ;;  %6208 = vpow2.f32 %v4662_v55 }
 0x5f4   : > { %9151 = vst [vmem:[#allocation16_spill] sm:$0xff] %v8657_v8  ;;  %6210 = vpow2.f32 %v4664_v25  ;;  %v4668_v17 = vmul.f32 1.442695, %v8657_v8 }
 0x5f5   : > { %6212 = vpow2.f32 %v4666_v4 }
 0x5f6   : > { %6214 = vpow2.f32 %v4668_v17 }
 0x5f7   : > { %v4415_v47 = vpop.f32.mrb[120].mxu1  ;;  %4548 = vmax.xlane.f32.xlu1 %v8645_v46  ;;  %v4479_v62 = vpop.xlane.xlu0 %4478 }
 0x5f8   : > { %v8653_v13 = vadd.f32 %v8318_v50, %v4415_v47  ;;  %v4417_v1 = vpop.f32.mrb[121].mxu1  ;;  %v8665_v47 = vsub.f32 %v8419_v41, %v4479_v62 }
 0x5f9   : > { %v4418_v53 = vpop.f32.mrb[122].mxu1  ;;  %v4481_v2 = vpop.xlane.xlu1 %4480 }
 0x5fa   : > { %v8660_v16 = vadd.f32 %v8318_v50, %v4418_v53  ;;  %v4420_v38 = vpop.f32.mrb[123].mxu1  ;;  %4550 = vmax.xlane.f32.xlu0 %v8653_v13  ;;  %v8670_v31 = vsub.f32 %v8422_v61, %v4481_v2  ;;  %v4670_v1 = vmul.f32 1.442695, %v8665_v47 }
 0x5fc   : > { %4552 = vmax.xlane.f32.xlu1 %v8660_v16  ;;  %v4672_v62 = vmul.f32 1.442695, %v8670_v31  ;;  %6216 = vpow2.f32 %v4670_v1 }
 0x5fe   : > { %6218 = vpow2.f32 %v4672_v62 }
 0x5ff   : > { %v4423_v53 = vpop.f32.mrb[124].mxu1  ;;  %v4483_v38 = vpop.xlane.xlu0 %4482 }
 0x600   : > { %v8674_v55 = vadd.f32 %v8318_v50, %v4423_v53  ;;  %v8677_v36 = vsub.f32 %v8427_v39, %v4483_v38  ;;  %v4425_v41 = vpop.f32.mrb[125].mxu1  ;;  %v6209_v39 = vpop.eup %6208 }
 0x601   : > { %v4426_v25 = vpop.f32.mrb[126].mxu1  ;;  %v4485_v8 = vpop.xlane.xlu1 %4484 }
 0x602   : > { %v8681_v61 = vadd.f32 %v8318_v50, %v4426_v25  ;;  %v8684_v2 = vsub.f32 %v8430_v52, %v4485_v8  ;;  %v4428_v4 = vpop.f32.mrb[127].mxu1  ;;  %4554 = vmax.xlane.f32.xlu0 %v8674_v55  ;;  %v4674_v53 = vmul.f32 1.442695, %v8677_v36  ;;  %v6211_v38 = vpop.eup %6210 }
 0x603   : > { %v6213_v52 = vpop.eup %6212 }
 0x604   : > { %4556 = vmax.xlane.f32.xlu1 %v8681_v61  ;;  %v4676_v17 = vmul.f32 1.442695, %v8684_v2  ;;  %6220 = vpow2.f32 %v4674_v53  ;;  %v6215_v62 = vpop.eup %6214 }
 0x606   : > { %4790 = vadd.xlane.f32.xlu0 %v6209_v39  ;;  %6222 = vpow2.f32 %v4676_v17  ;;  %v6217_v53 = vpop.eup %6216 }
 0x607   : > { %v4487_v50 = vpop.xlane.xlu0 %4486 }
 0x608   : > { %v8691_v41 = vsub.f32 %v8435_v42, %v4487_v50  ;;  %4792 = vadd.xlane.f32.xlu1 %v6211_v38  ;;  %v6219_v42 = vpop.eup %6218 }
 0x609   : > { %v4489_v8 = vpop.xlane.xlu1 %4488 }
 0x60a   : > { %v4678_v1 = vmul.f32 1.442695, %v8691_v41  ;;  %v8695_v25 = vsub.f32 %v8438_v59, %v4489_v8  ;;  %4794 = vadd.xlane.f32.xlu0 %v6213_v52 }
 0x60c   : > { %6224 = vpow2.f32 %v4678_v1  ;;  %v4680_v4 = vmul.f32 1.442695, %v8695_v25  ;;  %4796 = vadd.xlane.f32.xlu1 %v6215_v62 }
 0x60e   : > { %6226 = vpow2.f32 %v4680_v4  ;;  %4798 = vadd.xlane.f32.xlu0 %v6217_v53  ;;  %v6221_v17 = vpop.eup %6220 }
 0x60f   : > { %v4491_v39 = vpop.xlane.xlu0 %4490 }
 0x610   : > { %v8699_v38 = vsub.f32 %v8443_v23, %v4491_v39  ;;  %4800 = vadd.xlane.f32.xlu1 %v6219_v42  ;;  %v6223_v8 = vpop.eup %6222 }
 0x611   : > { %v4493_v50 = vpop.xlane.xlu1 %4492 }
 0x612   : > { %v4682_v59 = vmul.f32 1.442695, %v8699_v38  ;;  %v8703_v52 = vsub.f32 %v8446_v44, %v4493_v50  ;;  %4802 = vadd.xlane.f32.xlu0 %v6221_v17 }
 0x614   : > { %6228 = vpow2.f32 %v4682_v59  ;;  %v4684_v1 = vmul.f32 1.442695, %v8703_v52  ;;  %4804 = vadd.xlane.f32.xlu1 %v6223_v8 }
 0x616   : > { %v6225_v62 = vpop.eup %6224  ;;  %6230 = vpow2.f32 %v4684_v1 }
 0x617   : > { %4806 = vadd.xlane.f32.xlu0 %v6225_v62  ;;  %v4495_v4 = vpop.xlane.xlu0 %4494 }
 0x618   : > { %v6227_v23 = vpop.eup %6226  ;;  %v8707_v53 = vsub.f32 %v8451_v32, %v4495_v4 }
 0x619   : > { %v4497_v42 = vpop.xlane.xlu1 %4496  ;;  %4808 = vadd.xlane.f32.xlu1 %v6227_v23 }
 0x61a   : > { %v4686_v39 = vmul.f32 1.442695, %v8707_v53  ;;  %v8711_v44 = vsub.f32 %v8454_v56, %v4497_v42 }
 0x61c   : > { %6232 = vpow2.f32 %v4686_v39  ;;  %v4688_v17 = vmul.f32 1.442695, %v8711_v44 }
 0x61e   : > { %v6229_v50 = vpop.eup %6228  ;;  %6234 = vpow2.f32 %v4688_v17 }
 0x61f   : > { %4810 = vadd.xlane.f32.xlu0 %v6229_v50  ;;  %v4499_v59 = vpop.xlane.xlu0 %4498 }
 0x620   : > { %v6231_v8 = vpop.eup %6230  ;;  %v8715_v1 = vsub.f32 %v8459_v48, %v4499_v59 }
 0x621   : > { %v4501_v32 = vpop.xlane.xlu1 %4500  ;;  %4812 = vadd.xlane.f32.xlu1 %v6231_v8 }
 0x622   : > { %v4690_v62 = vmul.f32 1.442695, %v8715_v1  ;;  %v8719_v4 = vsub.f32 %v8462_v45, %v4501_v32 }
 0x624   : > { %6236 = vpow2.f32 %v4690_v62  ;;  %v4692_v56 = vmul.f32 1.442695, %v8719_v4 }
 0x626   : > { %v6233_v23 = vpop.eup %6232  ;;  %6238 = vpow2.f32 %v4692_v56 }
 0x627   : > { %4814 = vadd.xlane.f32.xlu0 %v6233_v23  ;;  %v4503_v42 = vpop.xlane.xlu0 %4502 }
 0x628   : > { %v6235_v39 = vpop.eup %6234  ;;  %v8723_v17 = vsub.f32 %v8467_v57, %v4503_v42 }
 0x629   : > { %v4505_v48 = vpop.xlane.xlu1 %4504  ;;  %4816 = vadd.xlane.f32.xlu1 %v6235_v39 }
 0x62a   : > { %v4694_v50 = vmul.f32 1.442695, %v8723_v17  ;;  %v8727_v59 = vsub.f32 %v8474_v35, %v4505_v48 }
 0x62c   : > { %6240 = vpow2.f32 %v4694_v50  ;;  %v4696_v45 = vmul.f32 1.442695, %v8727_v59 }
 0x62e   : > { %v6237_v8 = vpop.eup %6236  ;;  %6242 = vpow2.f32 %v4696_v45 }
 0x62f   : > { %4818 = vadd.xlane.f32.xlu0 %v6237_v8  ;;  %v4507_v32 = vpop.xlane.xlu0 %4506 }
 0x630   : > { %v6239_v62 = vpop.eup %6238  ;;  %v8731_v56 = vsub.f32 %v8483_v63, %v4507_v32 }
 0x631   : > { %v4509_v57 = vpop.xlane.xlu1 %4508  ;;  %4820 = vadd.xlane.f32.xlu1 %v6239_v62 }
 0x632   : > { %v4698_v23 = vmul.f32 1.442695, %v8731_v56  ;;  %v8735_v42 = vsub.f32 %v8490_v7, %v4509_v57 }
 0x634   : > { %6244 = vpow2.f32 %v4698_v23  ;;  %v4700_v35 = vmul.f32 1.442695, %v8735_v42  ;;  %v4751_v39 = vpop.xlane.xlu0 %4750 }
 0x635   : > { %6246 = vlog2.f32 %v4751_v39 }
 0x636   : > { %v6241_v48 = vpop.eup %6240  ;;  %6248 = vpow2.f32 %v4700_v35 }
 0x637   : > { %4822 = vadd.xlane.f32.xlu0 %v6241_v48 }
 0x638   : > { %v6243_v50 = vpop.eup %6242  ;;  %v4753_v63 = vpop.xlane.xlu1 %4752 }
 0x639   : > { %v4511_v45 = vpop.xlane.xlu0 %4510  ;;  %6250 = vlog2.f32 %v4753_v63  ;;  %4824 = vadd.xlane.f32.xlu1 %v6243_v50 }
 0x63a   : > { %v8739_v8 = vsub.f32 %v8499_v24, %v4511_v45 }
 0x63c   : > { %v4702_v7 = vmul.f32 1.442695, %v8739_v8  ;;  %v4513_v32 = vpop.xlane.xlu1 %4512 }
 0x63d   : > { %v4755_v62 = vpop.xlane.xlu0 %4754  ;;  %v8744_v57 = vsub.f32 %v8511_v10, %v4513_v32 }
 0x63e   : > { %6252 = vpow2.f32 %v4702_v7  ;;  %v6245_v23 = vpop.eup %6244 }
 0x63f   : > { %6254 = vlog2.f32 %v4755_v62  ;;  %v6247_v35 = vpop.eup %6246  ;;  %v4704_v39 = vmul.f32 1.442695, %v8744_v57  ;;  %4826 = vadd.xlane.f32.xlu0 %v6245_v23 }
 0x640   : > { %v6249_v24 = vpop.eup %6248  ;;  %v4879_v48 = vmul.f32 0.6931472, %v6247_v35  ;;  %v4757_v50 = vpop.xlane.xlu1 %4756 }
 0x641   : > { %v4515_v63 = vpop.xlane.xlu0 %4514  ;;  %6256 = vpow2.f32 %v4704_v39  ;;  %4828 = vadd.xlane.f32.xlu1 %v6249_v24 }
 0x642   : > { %v8750_v45 = vsub.f32 %v8515_v5, %v4515_v63  ;;  %v5006_v10 = vsub.f32 %v8470_v18, %v4879_v48  ;;  %6258 = vlog2.f32 %v4757_v50 }
 0x643   : > { %v6251_v7 = vpop.eup %6250 }
 0x644   : > { %v4706_v32 = vmul.f32 1.442695, %v8750_v45  ;;  %5070 = vst [vmem:[%s8754_s15] sm:$0xff] %v5006_v10  ;;  %v4881_v62 = vmul.f32 0.6931472, %v6251_v7  ;;  %v4517_v23 = vpop.xlane.xlu1 %4516 }
 0x645   : > { %v4759_v35 = vpop.xlane.xlu0 %4758  ;;  %v8758_v39 = vsub.f32 %v8527_v21, %v4517_v23 }
 0x646   : > { %6260 = vpow2.f32 %v4706_v32  ;;  %v5007_v5 = vsub.f32 %v8478_v37, %v4881_v62 }
 0x647   : > { %6262 = vlog2.f32 %v4759_v35  ;;  %v4708_v24 = vmul.f32 1.442695, %v8758_v39 }
 0x648   : > { %v6253_v18 = vpop.eup %6252  ;;  %5071 = vst [vmem:[%s8754_s15 + $0x8] sm:$0xff] %v5007_v5  ;;  %v4761_v50 = vpop.xlane.xlu1 %4760 }
 0x649   : > { %v6255_v48 = vpop.eup %6254  ;;  %4830 = vadd.xlane.f32.xlu0 %v6253_v18  ;;  %v4519_v63 = vpop.xlane.xlu0 %4518  ;;  %6264 = vpow2.f32 %v4708_v24 }
 0x64a   : > { %v4883_v10 = vmul.f32 0.6931472, %v6255_v48  ;;  %v8764_v7 = vsub.f32 %v8531_v19, %v4519_v63  ;;  %6266 = vlog2.f32 %v4761_v50 }
 0x64b   : > { %v6257_v21 = vpop.eup %6256 }
 0x64c   : > { %v5008_v32 = vsub.f32 %v8486_v33, %v4883_v10  ;;  %v4710_v37 = vmul.f32 1.442695, %v8764_v7  ;;  %v6259_v62 = vpop.eup %6258  ;;  %4832 = vadd.xlane.f32.xlu1 %v6257_v21  ;;  %v4521_v23 = vpop.xlane.xlu1 %4520 }
 0x64d   : > { %v4763_v35 = vpop.xlane.xlu0 %4762  ;;  %v4885_v5 = vmul.f32 0.6931472, %v6259_v62  ;;  %v8770_v18 = vsub.f32 %v8543_v58, %v4521_v23 }
 0x64e   : > { %5072 = vst [vmem:[%s8754_s15 + $0x10] sm:$0xff] %v5008_v32  ;;  %6268 = vpow2.f32 %v4710_v37 }
 0x64f   : > { %6270 = vlog2.f32 %v4763_v35  ;;  %v5009_v24 = vsub.f32 %v8494_v26, %v4885_v5  ;;  %v4712_v48 = vmul.f32 1.442695, %v8770_v18 }
 0x650   : > { %v6261_v19 = vpop.eup %6260  ;;  %v4765_v50 = vpop.xlane.xlu1 %4764 }
 0x651   : > { %v6263_v33 = vpop.eup %6262  ;;  %4834 = vadd.xlane.f32.xlu0 %v6261_v19  ;;  %v4523_v63 = vpop.xlane.xlu0 %4522  ;;  %5073 = vst [vmem:[%s8754_s15 + $0x18] sm:$0xff] %v5009_v24  ;;  %6272 = vpow2.f32 %v4712_v48 }
 0x652   : > { %v4887_v10 = vmul.f32 0.6931472, %v6263_v33  ;;  %v8776_v21 = vsub.f32 %v8547_v6, %v4523_v63  ;;  %6274 = vlog2.f32 %v4765_v50 }
 0x653   : > { %v6265_v58 = vpop.eup %6264 }
 0x654   : > { %v5010_v32 = vsub.f32 %v8502_v43, %v4887_v10  ;;  %v4714_v37 = vmul.f32 1.442695, %v8776_v21  ;;  %v6267_v26 = vpop.eup %6266  ;;  %4836 = vadd.xlane.f32.xlu1 %v6265_v58  ;;  %v4525_v62 = vpop.xlane.xlu1 %4524 }
 0x655   : > { %v4767_v23 = vpop.xlane.xlu0 %4766  ;;  %v4889_v35 = vmul.f32 0.6931472, %v6267_v26  ;;  %v8782_v5 = vsub.f32 %v8559_v29, %v4525_v62 }
 0x656   : > { %5074 = vst [vmem:[%s8754_s15 + $0x20] sm:$0xff] %v5010_v32  ;;  %6276 = vpow2.f32 %v4714_v37 }
 0x657   : > { %6278 = vlog2.f32 %v4767_v23  ;;  %v5011_v19 = vsub.f32 %v8506_v20, %v4889_v35  ;;  %v4716_v24 = vmul.f32 1.442695, %v8782_v5 }
 0x658   : > { %v6269_v6 = vpop.eup %6268  ;;  %v4769_v48 = vpop.xlane.xlu1 %4768 }
 0x659   : > { %v6271_v43 = vpop.eup %6270  ;;  %4838 = vadd.xlane.f32.xlu0 %v6269_v6  ;;  %v4527_v33 = vpop.xlane.xlu0 %4526  ;;  %5075 = vst [vmem:[%s8754_s15 + $0x28] sm:$0xff] %v5011_v19  ;;  %6280 = vpow2.f32 %v4716_v24 }
 0x65a   : > { %v4891_v50 = vmul.f32 0.6931472, %v6271_v43  ;;  %v8788_v63 = vsub.f32 %v8563_v51, %v4527_v33  ;;  %6282 = vlog2.f32 %v4769_v48 }
 0x65b   : > { %v6273_v29 = vpop.eup %6272 }
 0x65c   : > { %v5012_v10 = vsub.f32 %v8518_v49, %v4891_v50  ;;  %v4718_v58 = vmul.f32 1.442695, %v8788_v63  ;;  %v6275_v20 = vpop.eup %6274  ;;  %4840 = vadd.xlane.f32.xlu1 %v6273_v29  ;;  %v4529_v32 = vpop.xlane.xlu1 %4528 }
 0x65d   : > { %v4771_v37 = vpop.xlane.xlu0 %4770  ;;  %v4893_v26 = vmul.f32 0.6931472, %v6275_v20  ;;  %v8794_v62 = vsub.f32 %v8575_v28, %v4529_v32 }
 0x65e   : > { %5076 = vst [vmem:[%s8754_s15 + $0x30] sm:$0xff] %v5012_v10  ;;  %6284 = vpow2.f32 %v4718_v58 }
 0x65f   : > { %6286 = vlog2.f32 %v4771_v37  ;;  %v5013_v23 = vsub.f32 %v8522_v22, %v4893_v26  ;;  %v4720_v35 = vmul.f32 1.442695, %v8794_v62 }
 0x660   : > { %v6277_v51 = vpop.eup %6276  ;;  %v4773_v6 = vpop.xlane.xlu1 %4772 }
 0x661   : > { %v6279_v49 = vpop.eup %6278  ;;  %4842 = vadd.xlane.f32.xlu0 %v6277_v51  ;;  %v4531_v19 = vpop.xlane.xlu0 %4530  ;;  %5077 = vst [vmem:[%s8754_s15 + $0x38] sm:$0xff] %v5013_v23  ;;  %6288 = vpow2.f32 %v4720_v35 }
 0x662   : > { %v4895_v24 = vmul.f32 0.6931472, %v6279_v49  ;;  %v8800_v43 = vsub.f32 %v8579_v3, %v4531_v19  ;;  %6290 = vlog2.f32 %v4773_v6 }
 0x663   : > { %v6281_v28 = vpop.eup %6280 }
 0x664   : > { %v5014_v48 = vsub.f32 %v8534_v14, %v4895_v24  ;;  %v4722_v33 = vmul.f32 1.442695, %v8800_v43  ;;  %v6283_v22 = vpop.eup %6282  ;;  %4844 = vadd.xlane.f32.xlu1 %v6281_v28  ;;  %v4533_v50 = vpop.xlane.xlu1 %4532 }
 0x665   : > { %v4775_v29 = vpop.xlane.xlu0 %4774  ;;  %v4897_v10 = vmul.f32 0.6931472, %v6283_v22  ;;  %v8806_v58 = vsub.f32 %v8591_v40, %v4533_v50 }
 0x666   : > { %5078 = vst [vmem:[%s8754_s15 + $0x40] sm:$0xff] %v5014_v48  ;;  %6292 = vpow2.f32 %v4722_v33 }
 0x667   : > { %6294 = vlog2.f32 %v4775_v29  ;;  %v5015_v20 = vsub.f32 %v8538_v15, %v4897_v10  ;;  %v4724_v32 = vmul.f32 1.442695, %v8806_v58 }
 0x668   : > { %v6285_v3 = vpop.eup %6284  ;;  %v4777_v37 = vpop.xlane.xlu1 %4776 }
 0x669   : > { %v6287_v14 = vpop.eup %6286  ;;  %4846 = vadd.xlane.f32.xlu0 %v6285_v3  ;;  %v4535_v26 = vpop.xlane.xlu0 %4534  ;;  %5079 = vst [vmem:[%s8754_s15 + $0x48] sm:$0xff] %v5015_v20  ;;  %6296 = vpow2.f32 %v4724_v32 }
 0x66a   : > { %v4899_v51 = vmul.f32 0.6931472, %v6287_v14  ;;  %v8812_v23 = vsub.f32 %v8595_v54, %v4535_v26  ;;  %6298 = vlog2.f32 %v4777_v37 }
 0x66b   : > { %v6289_v40 = vpop.eup %6288 }
 0x66c   : > { %v5016_v35 = vsub.f32 %v8550_v60, %v4899_v51  ;;  %v4726_v49 = vmul.f32 1.442695, %v8812_v23  ;;  %v6291_v15 = vpop.eup %6290  ;;  %4848 = vadd.xlane.f32.xlu1 %v6289_v40  ;;  %v4537_v6 = vpop.xlane.xlu1 %4536 }
 0x66d   : > { %v4779_v19 = vpop.xlane.xlu0 %4778  ;;  %v4901_v24 = vmul.f32 0.6931472, %v6291_v15  ;;  %v8818_v28 = vsub.f32 %v8607_v0, %v4537_v6  ;;  %v9152_v6 = vld [vmem:[#allocation11_spill] sm:$0xff] }
 0x66e   : > { %5080 = vst [vmem:[%s8754_s15 + $0x50] sm:$0xff] %v5016_v35  ;;  %6300 = vpow2.f32 %v4726_v49 }
 0x66f   : > { %6302 = vlog2.f32 %v4779_v19  ;;  %v5017_v48 = vsub.f32 %v8554_v34, %v4901_v24  ;;  %v4728_v33 = vmul.f32 1.442695, %v8818_v28  ;;  %v9153_v24 = vld [vmem:[#allocation5_spill] sm:$0xff] }
 0x670   : > { %v6293_v54 = vpop.eup %6292  ;;  %v4781_v22 = vpop.xlane.xlu1 %4780 }
 0x671   : > { %v6295_v60 = vpop.eup %6294  ;;  %4850 = vadd.xlane.f32.xlu0 %v6293_v54  ;;  %v4539_v50 = vpop.xlane.xlu0 %4538  ;;  %5081 = vst [vmem:[%s8754_s15 + $0x58] sm:$0xff] %v5017_v48  ;;  %6304 = vpow2.f32 %v4728_v33 }
 0x672   : > { %v4903_v29 = vmul.f32 0.6931472, %v6295_v60  ;;  %v8824_v10 = vsub.f32 %v8611_v11, %v4539_v50  ;;  %6306 = vlog2.f32 %v4781_v22  ;;  %v9154_v50 = vld [vmem:[#allocation12_spill] sm:$0xff] }
 0x673   : > { %v6297_v0 = vpop.eup %6296 }
 0x674   : > { %v5018_v3 = vsub.f32 %v8566_v27, %v4903_v29  ;;  %v4730_v20 = vmul.f32 1.442695, %v8824_v10  ;;  %v6299_v34 = vpop.eup %6298  ;;  %4852 = vadd.xlane.f32.xlu1 %v6297_v0  ;;  %v4541_v32 = vpop.xlane.xlu1 %4540 }
 0x675   : > { %v4783_v14 = vpop.xlane.xlu0 %4782  ;;  %v4905_v37 = vmul.f32 0.6931472, %v6299_v34  ;;  %v8830_v26 = vsub.f32 %v8623_v9, %v4541_v32 }
 0x676   : > { %5082 = vst [vmem:[%s8754_s15 + $0x60] sm:$0xff] %v5018_v3  ;;  %6308 = vpow2.f32 %v4730_v20  ;;  %v9155_v3 = vld [vmem:[#allocation6_spill] sm:$0xff] }
 0x677   : > { %6310 = vlog2.f32 %v4783_v14  ;;  %v5019_v51 = vsub.f32 %v8570_v30, %v4905_v37  ;;  %v4732_v40 = vmul.f32 1.442695, %v8830_v26 }
 0x678   : > { %v6301_v11 = vpop.eup %6300  ;;  %v4785_v35 = vpop.xlane.xlu1 %4784 }
 0x679   : > { %v6303_v27 = vpop.eup %6302  ;;  %4854 = vadd.xlane.f32.xlu0 %v6301_v11  ;;  %v4543_v49 = vpop.xlane.xlu0 %4542  ;;  %5083 = vst [vmem:[%s8754_s15 + $0x68] sm:$0xff] %v5019_v51  ;;  %6312 = vpow2.f32 %v4732_v40  ;;  %v9156_v51 = vld [vmem:[#allocation13_spill] sm:$0xff] }
 0x67a   : > { %v4907_v15 = vmul.f32 0.6931472, %v6303_v27  ;;  %v8836_v19 = vsub.f32 %v9152_v6, %v4543_v49  ;;  %6314 = vlog2.f32 %v4785_v35  ;;  %v9157_v35 = vld [vmem:[#allocation7_spill] sm:$0xff] }
 0x67b   : > { %v6305_v9 = vpop.eup %6304 }
 0x67c   : > { %v5020_v54 = vsub.f32 %v9153_v24, %v4907_v15  ;;  %v4734_v48 = vmul.f32 1.442695, %v8836_v19  ;;  %v6307_v30 = vpop.eup %6306  ;;  %4856 = vadd.xlane.f32.xlu1 %v6305_v9  ;;  %v4545_v33 = vpop.xlane.xlu1 %4544 }
 0x67d   : > { %v4787_v60 = vpop.xlane.xlu0 %4786  ;;  %v4909_v22 = vmul.f32 0.6931472, %v6307_v30  ;;  %v8842_v29 = vsub.f32 %v9154_v50, %v4545_v33  ;;  %v9158_v30 = vld [vmem:[#allocation8_spill] sm:$0xff] }
 0x67e   : > { %5084 = vst [vmem:[%s8754_s15 + $0x70] sm:$0xff] %v5020_v54  ;;  %6316 = vpow2.f32 %v4734_v48 }
 0x67f   : > { %6318 = vlog2.f32 %v4787_v60  ;;  %v5021_v20 = vsub.f32 %v9155_v3, %v4909_v22  ;;  %v4736_v34 = vmul.f32 1.442695, %v8842_v29 }
 0x680   : > { %v6309_v0 = vpop.eup %6308  ;;  %v4789_v14 = vpop.xlane.xlu1 %4788 }
 0x681   : > { %v6311_v32 = vpop.eup %6310  ;;  %4858 = vadd.xlane.f32.xlu0 %v6309_v0  ;;  %v4547_v37 = vpop.xlane.xlu0 %4546  ;;  %5085 = vst [vmem:[%s8754_s15 + $0x78] sm:$0xff] %v5021_v20  ;;  %6320 = vpow2.f32 %v4736_v34 }
 0x682   : > { %v4911_v11 = vmul.f32 0.6931472, %v6311_v32  ;;  %v8848_v40 = vsub.f32 %v9156_v51, %v4547_v37  ;;  %6322 = vlog2.f32 %v4789_v14  ;;  %v9159_v14 = vld [vmem:[#allocation9_spill] sm:$0xff] }
 0x683   : > { %v6313_v27 = vpop.eup %6312 }
 0x684   : > { %v5022_v49 = vsub.f32 %v9157_v35, %v4911_v11  ;;  %v4738_v15 = vmul.f32 1.442695, %v8848_v40  ;;  %v6315_v6 = vpop.eup %6314  ;;  %4860 = vadd.xlane.f32.xlu1 %v6313_v27  ;;  %v4549_v9 = vpop.xlane.xlu1 %4548  ;;  %v9160_v35 = vld [vmem:[#allocation10_spill] sm:$0xff] }
 0x685   : > { %v4913_v24 = vmul.f32 0.6931472, %v6315_v6  ;;  %v8854_v54 = vsub.f32 %v8645_v46, %v4549_v9 }
 0x686   : > { %5086 = vst [vmem:[%s8754_s15 + $0x80] sm:$0xff] %v5022_v49  ;;  %6324 = vpow2.f32 %v4738_v15 }
 0x687   : > { %v5023_v33 = vsub.f32 %v9158_v30, %v4913_v24  ;;  %v4740_v60 = vmul.f32 1.442695, %v8854_v54  ;;  %v4551_v22 = vpop.xlane.xlu0 %4550 }
 0x688   : > { %v6317_v48 = vpop.eup %6316  ;;  %v8859_v0 = vsub.f32 %v8653_v13, %v4551_v22 }
 0x689   : > { %v6319_v50 = vpop.eup %6318  ;;  %4862 = vadd.xlane.f32.xlu0 %v6317_v48  ;;  %5087 = vst [vmem:[%s8754_s15 + $0x88] sm:$0xff] %v5023_v33  ;;  %6326 = vpow2.f32 %v4740_v60  ;;  %v4553_v20 = vpop.xlane.xlu1 %4552 }
 0x68a   : > { %v4915_v3 = vmul.f32 0.6931472, %v6319_v50  ;;  %v4742_v34 = vmul.f32 1.442695, %v8859_v0  ;;  %v8864_v46 = vsub.f32 %v8660_v16, %v4553_v20 }
 0x68b   : > { %v6321_v32 = vpop.eup %6320 }
 0x68c   : > { %v5024_v37 = vsub.f32 %v9159_v14, %v4915_v3  ;;  %v6323_v11 = vpop.eup %6322  ;;  %6328 = vpow2.f32 %v4742_v34  ;;  %v4744_v51 = vmul.f32 1.442695, %v8864_v46  ;;  %4864 = vadd.xlane.f32.xlu1 %v6321_v32 }
 0x68d   : > { %v4917_v13 = vmul.f32 0.6931472, %v6323_v11 }
 0x68e   : > { %5088 = vst [vmem:[%s8754_s15 + $0x90] sm:$0xff] %v5024_v37  ;;  %6330 = vpow2.f32 %v4744_v51 }
 0x68f   : > { %v5025_v49 = vsub.f32 %v9160_v35, %v4917_v13  ;;  %v4555_v15 = vpop.xlane.xlu0 %4554  ;;  %v9161_v35 = vld [vmem:[#allocation14_spill] sm:$0xff] }
 0x690   : > { %v6325_v27 = vpop.eup %6324  ;;  %v8871_v6 = vsub.f32 %v8674_v55, %v4555_v15 }
 0x691   : > { %4866 = vadd.xlane.f32.xlu0 %v6325_v27  ;;  %5089 = vst [vmem:[%s8754_s15 + $0x98] sm:$0xff] %v5025_v49  ;;  %v4557_v16 = vpop.xlane.xlu1 %4556 }
 0x692   : > { %v4746_v9 = vmul.f32 1.442695, %v8871_v6  ;;  %v8876_v24 = vsub.f32 %v8681_v61, %v4557_v16 }
 0x693   : > { %v6327_v48 = vpop.eup %6326  ;;  %v4791_v30 = vpop.xlane.xlu0 %4790 }
 0x694   : > { %6332 = vpow2.f32 %v4746_v9  ;;  %v4748_v33 = vmul.f32 1.442695, %v8876_v24  ;;  %4868 = vadd.xlane.f32.xlu1 %v6327_v48 }
 0x695   : > { %6334 = vlog2.f32 %v4791_v30  ;;  %v4793_v60 = vpop.xlane.xlu1 %4792 }
 0x696   : > { %v6329_v22 = vpop.eup %6328  ;;  %6336 = vpow2.f32 %v4748_v33  ;;  %v9162_v33 = vld [vmem:[#allocation15_spill] sm:$0xff] }
 0x697   : > { %6338 = vlog2.f32 %v4793_v60  ;;  %4870 = vadd.xlane.f32.xlu0 %v6329_v22  ;;  %v4795_v55 = vpop.xlane.xlu0 %4794 }
 0x698   : > { %v6331_v50 = vpop.eup %6330  ;;  %6340 = vlog2.f32 %v4795_v55 }
 0x699   : > { %4872 = vadd.xlane.f32.xlu1 %v6331_v50  ;;  %v4797_v3 = vpop.xlane.xlu1 %4796 }
 0x69a   : > { %6342 = vlog2.f32 %v4797_v3  ;;  %v9163_v3 = vld [vmem:[#allocation16_spill] sm:$0xff] }
 0x69b   : > { %v4799_v61 = vpop.xlane.xlu0 %4798 }
 0x69c   : > { %6344 = vlog2.f32 %v4799_v61 }
 0x69d   : > { %v4801_v20 = vpop.xlane.xlu1 %4800 }
 0x69e   : > { %v6333_v34 = vpop.eup %6332  ;;  %6346 = vlog2.f32 %v4801_v20 }
 0x69f   : > { %v6335_v32 = vpop.eup %6334  ;;  %4874 = vadd.xlane.f32.xlu0 %v6333_v34  ;;  %v4803_v14 = vpop.xlane.xlu0 %4802 }
 0x6a0   : > { %v6337_v37 = vpop.eup %6336  ;;  %v4919_v11 = vmul.f32 0.6931472, %v6335_v32  ;;  %6348 = vlog2.f32 %v4803_v14 }
 0x6a1   : > { %v6339_v51 = vpop.eup %6338  ;;  %4876 = vadd.xlane.f32.xlu1 %v6337_v37  ;;  %v4805_v13 = vpop.xlane.xlu1 %4804 }
 0x6a2   : > { %v6341_v27 = vpop.eup %6340  ;;  %v5026_v49 = vsub.f32 %v9161_v35, %v4919_v11  ;;  %v4921_v15 = vmul.f32 0.6931472, %v6339_v51  ;;  %6350 = vlog2.f32 %v4805_v13 }
 0x6a3   : > { %v4923_v16 = vmul.f32 0.6931472, %v6341_v27 }
 0x6a4   : > { %v6343_v9 = vpop.eup %6342  ;;  %5090 = vst [vmem:[%s8754_s15 + $0xa0] sm:$0xff] %v5026_v49  ;;  %v5027_v48 = vsub.f32 %v8642_v12, %v4921_v15  ;;  %v4807_v30 = vpop.xlane.xlu0 %4806 }
 0x6a5   : > { %v5028_v60 = vsub.f32 %v9162_v33, %v4923_v16  ;;  %v4925_v22 = vmul.f32 0.6931472, %v6343_v9  ;;  %6352 = vlog2.f32 %v4807_v30 }
 0x6a6   : > { %v6345_v55 = vpop.eup %6344  ;;  %5091 = vst [vmem:[%s8754_s15 + $0xa8] sm:$0xff] %v5027_v48  ;;  %v4809_v50 = vpop.xlane.xlu1 %4808 }
 0x6a7   : > { %5092 = vst [vmem:[%s8754_s15 + $0xb0] sm:$0xff] %v5028_v60  ;;  %v5029_v61 = vsub.f32 %v9163_v3, %v4925_v22  ;;  %v4927_v20 = vmul.f32 0.6931472, %v6345_v55  ;;  %6354 = vlog2.f32 %v4809_v50 }
 0x6a8   : > { %v6347_v34 = vpop.eup %6346 }
 0x6a9   : > { %5093 = vst [vmem:[%s8754_s15 + $0xb8] sm:$0xff] %v5029_v61  ;;  %v5030_v12 = vsub.f32 %v8665_v47, %v4927_v20  ;;  %v4929_v32 = vmul.f32 0.6931472, %v6347_v34 }
 0x6aa   : > { %v6349_v14 = vpop.eup %6348 }
 0x6ab   : > { %5094 = vst [vmem:[%s8754_s15 + $0xc0] sm:$0xff] %v5030_v12  ;;  %v5031_v37 = vsub.f32 %v8670_v31, %v4929_v32  ;;  %v4931_v11 = vmul.f32 0.6931472, %v6349_v14 }
 0x6ac   : > { %v6351_v51 = vpop.eup %6350  ;;  %v4811_v13 = vpop.xlane.xlu0 %4810 }
 0x6ad   : > { %5095 = vst [vmem:[%s8754_s15 + $0xc8] sm:$0xff] %v5031_v37  ;;  %v5032_v27 = vsub.f32 %v8677_v36, %v4931_v11  ;;  %v4933_v35 = vmul.f32 0.6931472, %v6351_v51  ;;  %6356 = vlog2.f32 %v4811_v13 }
 0x6ae   : > { %v4813_v49 = vpop.xlane.xlu1 %4812 }
 0x6af   : > { %v6353_v15 = vpop.eup %6352  ;;  %5096 = vst [vmem:[%s8754_s15 + $0xd0] sm:$0xff] %v5032_v27  ;;  %v5033_v47 = vsub.f32 %v8684_v2, %v4933_v35  ;;  %6358 = vlog2.f32 %v4813_v49 }
 0x6b0   : > { %v4935_v16 = vmul.f32 0.6931472, %v6353_v15 }
 0x6b1   : > { %v6355_v9 = vpop.eup %6354  ;;  %5097 = vst [vmem:[%s8754_s15 + $0xd8] sm:$0xff] %v5033_v47 }
 0x6b2   : > { %v5034_v31 = vsub.f32 %v8691_v41, %v4935_v16  ;;  %v4937_v48 = vmul.f32 0.6931472, %v6355_v9 }
 0x6b4   : > { %5098 = vst [vmem:[%s8754_s15 + $0xe0] sm:$0xff] %v5034_v31  ;;  %v5035_v36 = vsub.f32 %v8695_v25, %v4937_v48  ;;  %v4815_v30 = vpop.xlane.xlu0 %4814 }
 0x6b5   : > { %6360 = vlog2.f32 %v4815_v30 }
 0x6b6   : > { %5099 = vst [vmem:[%s8754_s15 + $0xe8] sm:$0xff] %v5035_v36  ;;  %v4817_v33 = vpop.xlane.xlu1 %4816 }
 0x6b7   : > { %v6357_v60 = vpop.eup %6356  ;;  %6362 = vlog2.f32 %v4817_v33 }
 0x6b8   : > { %v4939_v22 = vmul.f32 0.6931472, %v6357_v60 }
 0x6b9   : > { %v6359_v2 = vpop.eup %6358 }
 0x6ba   : > { %v5036_v55 = vsub.f32 %v8699_v38, %v4939_v22  ;;  %v4941_v50 = vmul.f32 0.6931472, %v6359_v2 }
 0x6bc   : > { %5100 = vst [vmem:[%s8754_s15 + $0xf0] sm:$0xff] %v5036_v55  ;;  %v5037_v41 = vsub.f32 %v8703_v52, %v4941_v50  ;;  %v4819_v3 = vpop.xlane.xlu0 %4818 }
 0x6bd   : > { %6364 = vlog2.f32 %v4819_v3 }
 0x6be   : > { %5101 = vst [vmem:[%s8754_s15 + $0xf8] sm:$0xff] %v5037_v41  ;;  %v4821_v25 = vpop.xlane.xlu1 %4820 }
 0x6bf   : > { %v6361_v61 = vpop.eup %6360  ;;  %6366 = vlog2.f32 %v4821_v25 }
 0x6c0   : > { %v4943_v20 = vmul.f32 0.6931472, %v6361_v61 }
 0x6c1   : > { %v6363_v34 = vpop.eup %6362 }
 0x6c2   : > { %v5038_v12 = vsub.f32 %v8707_v53, %v4943_v20  ;;  %v4945_v32 = vmul.f32 0.6931472, %v6363_v34 }
 0x6c4   : > { %5102 = vst [vmem:[%s8754_s15 + $0x100] sm:$0xff] %v5038_v12  ;;  %v5039_v38 = vsub.f32 %v8711_v44, %v4945_v32  ;;  %v4823_v14 = vpop.xlane.xlu0 %4822 }
 0x6c5   : > { %6368 = vlog2.f32 %v4823_v14 }
 0x6c6   : > { %5103 = vst [vmem:[%s8754_s15 + $0x108] sm:$0xff] %v5039_v38  ;;  %v4825_v52 = vpop.xlane.xlu1 %4824 }
 0x6c7   : > { %v6365_v37 = vpop.eup %6364  ;;  %6370 = vlog2.f32 %v4825_v52 }
 0x6c8   : > { %v4947_v11 = vmul.f32 0.6931472, %v6365_v37 }
 0x6c9   : > { %v6367_v51 = vpop.eup %6366 }
 0x6ca   : > { %v5040_v13 = vsub.f32 %v8715_v1, %v4947_v11  ;;  %v4949_v27 = vmul.f32 0.6931472, %v6367_v51 }
 0x6cc   : > { %5104 = vst [vmem:[%s8754_s15 + $0x110] sm:$0xff] %v5040_v13  ;;  %v5041_v53 = vsub.f32 %v8719_v4, %v4949_v27  ;;  %v4827_v35 = vpop.xlane.xlu0 %4826 }
 0x6cd   : > { %6372 = vlog2.f32 %v4827_v35 }
 0x6ce   : > { %5105 = vst [vmem:[%s8754_s15 + $0x118] sm:$0xff] %v5041_v53  ;;  %v4829_v44 = vpop.xlane.xlu1 %4828 }
 0x6cf   : > { %v6369_v49 = vpop.eup %6368  ;;  %6374 = vlog2.f32 %v4829_v44 }
 0x6d0   : > { %v4951_v15 = vmul.f32 0.6931472, %v6369_v49 }
 0x6d1   : > { %v6371_v47 = vpop.eup %6370 }
 0x6d2   : > { %v5042_v16 = vsub.f32 %v8723_v17, %v4951_v15  ;;  %v4953_v9 = vmul.f32 0.6931472, %v6371_v47 }
 0x6d4   : > { %5106 = vst [vmem:[%s8754_s15 + $0x120] sm:$0xff] %v5042_v16  ;;  %v5043_v1 = vsub.f32 %v8727_v59, %v4953_v9 }
 0x6d6   : > { %v4831_v31 = vpop.xlane.xlu0 %4830  ;;  %5107 = vst [vmem:[%s8754_s15 + $0x128] sm:$0xff] %v5043_v1 }
 0x6d7   : > { %6376 = vlog2.f32 %v4831_v31  ;;  %v6373_v4 = vpop.eup %6372 }
 0x6d8   : > { %v4955_v48 = vmul.f32 0.6931472, %v6373_v4 }
 0x6d9   : > { %v6375_v36 = vpop.eup %6374  ;;  %v4833_v30 = vpop.xlane.xlu1 %4832 }
 0x6da   : > { %v5044_v33 = vsub.f32 %v8731_v56, %v4955_v48  ;;  %v4957_v60 = vmul.f32 0.6931472, %v6375_v36  ;;  %6378 = vlog2.f32 %v4833_v30 }
 0x6dc   : > { %5108 = vst [vmem:[%s8754_s15 + $0x130] sm:$0xff] %v5044_v33  ;;  %v5045_v17 = vsub.f32 %v8735_v42, %v4957_v60 }
 0x6de   : > { %v4835_v22 = vpop.xlane.xlu0 %4834  ;;  %5109 = vst [vmem:[%s8754_s15 + $0x138] sm:$0xff] %v5045_v17 }
 0x6df   : > { %6380 = vlog2.f32 %v4835_v22 }
 0x6e1   : > { %v6377_v59 = vpop.eup %6376  ;;  %v4837_v55 = vpop.xlane.xlu1 %4836 }
 0x6e2   : > { %v4959_v2 = vmul.f32 0.6931472, %v6377_v59  ;;  %6382 = vlog2.f32 %v4837_v55 }
 0x6e4   : > { %v5046_v50 = vsub.f32 %v8739_v8, %v4959_v2  ;;  %v6379_v41 = vpop.eup %6378 }
 0x6e5   : > { %v4961_v3 = vmul.f32 0.6931472, %v6379_v41 }
 0x6e6   : > { %5110 = vst [vmem:[%s8754_s15 + $0x140] sm:$0xff] %v5046_v50  ;;  %v4839_v56 = vpop.xlane.xlu0 %4838 }
 0x6e7   : > { %6384 = vlog2.f32 %v4839_v56  ;;  %v5047_v25 = vsub.f32 %v8744_v57, %v4961_v3 }
 0x6e9   : > { %v6381_v42 = vpop.eup %6380  ;;  %5111 = vst [vmem:[%s8754_s15 + $0x148] sm:$0xff] %v5047_v25  ;;  %v4841_v20 = vpop.xlane.xlu1 %4840 }
 0x6ea   : > { %v4963_v61 = vmul.f32 0.6931472, %v6381_v42  ;;  %6386 = vlog2.f32 %v4841_v20 }
 0x6ec   : > { %v5048_v34 = vsub.f32 %v8750_v45, %v4963_v61  ;;  %v6383_v12 = vpop.eup %6382 }
 0x6ed   : > { %v4965_v32 = vmul.f32 0.6931472, %v6383_v12 }
 0x6ee   : > { %5112 = vst [vmem:[%s8754_s15 + $0x150] sm:$0xff] %v5048_v34  ;;  %v4843_v8 = vpop.xlane.xlu0 %4842 }
 0x6ef   : > { %6388 = vlog2.f32 %v4843_v8  ;;  %v5049_v38 = vsub.f32 %v8758_v39, %v4965_v32 }
 0x6f1   : > { %v6385_v14 = vpop.eup %6384  ;;  %5113 = vst [vmem:[%s8754_s15 + $0x158] sm:$0xff] %v5049_v38  ;;  %v4845_v57 = vpop.xlane.xlu1 %4844 }
 0x6f2   : > { %v4967_v52 = vmul.f32 0.6931472, %v6385_v14  ;;  %6390 = vlog2.f32 %v4845_v57 }
 0x6f4   : > { %v5050_v37 = vsub.f32 %v8764_v7, %v4967_v52  ;;  %v6387_v11 = vpop.eup %6386 }
 0x6f5   : > { %v4969_v51 = vmul.f32 0.6931472, %v6387_v11 }
 0x6f6   : > { %5114 = vst [vmem:[%s8754_s15 + $0x160] sm:$0xff] %v5050_v37  ;;  %v4847_v45 = vpop.xlane.xlu0 %4846 }
 0x6f7   : > { %6392 = vlog2.f32 %v4847_v45  ;;  %v5051_v13 = vsub.f32 %v8770_v18, %v4969_v51 }
 0x6f9   : > { %v6389_v27 = vpop.eup %6388  ;;  %5115 = vst [vmem:[%s8754_s15 + $0x168] sm:$0xff] %v5051_v13  ;;  %v4849_v39 = vpop.xlane.xlu1 %4848 }
 0x6fa   : > { %v4971_v53 = vmul.f32 0.6931472, %v6389_v27  ;;  %6394 = vlog2.f32 %v4849_v39 }
 0x6fc   : > { %v5052_v35 = vsub.f32 %v8776_v21, %v4971_v53  ;;  %v6391_v44 = vpop.eup %6390 }
 0x6fd   : > { %v4973_v49 = vmul.f32 0.6931472, %v6391_v44 }
 0x6fe   : > { %5116 = vst [vmem:[%s8754_s15 + $0x170] sm:$0xff] %v5052_v35  ;;  %v4851_v7 = vpop.xlane.xlu0 %4850 }
 0x6ff   : > { %6396 = vlog2.f32 %v4851_v7  ;;  %v5053_v15 = vsub.f32 %v8782_v5, %v4973_v49 }
 0x701   : > { %v6393_v47 = vpop.eup %6392  ;;  %5117 = vst [vmem:[%s8754_s15 + $0x178] sm:$0xff] %v5053_v15  ;;  %v4853_v18 = vpop.xlane.xlu1 %4852 }
 0x702   : > { %v4975_v16 = vmul.f32 0.6931472, %v6393_v47  ;;  %6398 = vlog2.f32 %v4853_v18 }
 0x704   : > { %v5054_v9 = vsub.f32 %v8788_v63, %v4975_v16  ;;  %v6395_v1 = vpop.eup %6394 }
 0x705   : > { %v4977_v31 = vmul.f32 0.6931472, %v6395_v1 }
 0x706   : > { %5118 = vst [vmem:[%s8754_s15 + $0x180] sm:$0xff] %v5054_v9  ;;  %v4855_v21 = vpop.xlane.xlu0 %4854 }
 0x707   : > { %6400 = vlog2.f32 %v4855_v21  ;;  %v5055_v4 = vsub.f32 %v8794_v62, %v4977_v31 }
 0x709   : > { %v6397_v48 = vpop.eup %6396  ;;  %5119 = vst [vmem:[%s8754_s15 + $0x188] sm:$0xff] %v5055_v4  ;;  %v4857_v5 = vpop.xlane.xlu1 %4856 }
 0x70a   : > { %v4979_v36 = vmul.f32 0.6931472, %v6397_v48  ;;  %6402 = vlog2.f32 %v4857_v5 }
 0x70c   : > { %v5056_v30 = vsub.f32 %v8800_v43, %v4979_v36  ;;  %v6399_v33 = vpop.eup %6398 }
 0x70d   : > { %v4981_v60 = vmul.f32 0.6931472, %v6399_v33 }
 0x70e   : > { %5120 = vst [vmem:[%s8754_s15 + $0x190] sm:$0xff] %v5056_v30  ;;  %v4859_v63 = vpop.xlane.xlu0 %4858 }
 0x70f   : > { %6404 = vlog2.f32 %v4859_v63  ;;  %v5057_v17 = vsub.f32 %v8806_v58, %v4981_v60 }
 0x711   : > { %v6401_v22 = vpop.eup %6400  ;;  %5121 = vst [vmem:[%s8754_s15 + $0x198] sm:$0xff] %v5057_v17  ;;  %v4861_v62 = vpop.xlane.xlu1 %4860 }
 0x712   : > { %v4983_v59 = vmul.f32 0.6931472, %v6401_v22  ;;  %6406 = vlog2.f32 %v4861_v62 }
 0x714   : > { %v5058_v2 = vsub.f32 %v8812_v23, %v4983_v59  ;;  %v6403_v55 = vpop.eup %6402 }
 0x715   : > { %v4985_v50 = vmul.f32 0.6931472, %v6403_v55 }
 0x716   : > { %5122 = vst [vmem:[%s8754_s15 + $0x1a0] sm:$0xff] %v5058_v2  ;;  %v4863_v43 = vpop.xlane.xlu0 %4862 }
 0x717   : > { %6408 = vlog2.f32 %v4863_v43  ;;  %v5059_v41 = vsub.f32 %v8818_v28, %v4985_v50 }
 0x719   : > { %v6405_v3 = vpop.eup %6404  ;;  %5123 = vst [vmem:[%s8754_s15 + $0x1a8] sm:$0xff] %v5059_v41  ;;  %v4865_v58 = vpop.xlane.xlu1 %4864 }
 0x71a   : > { %v4987_v56 = vmul.f32 0.6931472, %v6405_v3  ;;  %6410 = vlog2.f32 %v4865_v58 }
 0x71c   : > { %v5060_v25 = vsub.f32 %v8824_v10, %v4987_v56  ;;  %v6407_v42 = vpop.eup %6406 }
 0x71d   : > { %v4989_v61 = vmul.f32 0.6931472, %v6407_v42 }
 0x71e   : > { %5124 = vst [vmem:[%s8754_s15 + $0x1b0] sm:$0xff] %v5060_v25  ;;  %v4867_v23 = vpop.xlane.xlu0 %4866 }
 0x71f   : > { %6412 = vlog2.f32 %v4867_v23  ;;  %v5061_v20 = vsub.f32 %v8830_v26, %v4989_v61 }
 0x721   : > { %v6409_v34 = vpop.eup %6408  ;;  %5125 = vst [vmem:[%s8754_s15 + $0x1b8] sm:$0xff] %v5061_v20  ;;  %v4869_v28 = vpop.xlane.xlu1 %4868 }
 0x722   : > { %v4991_v12 = vmul.f32 0.6931472, %v6409_v34  ;;  %6414 = vlog2.f32 %v4869_v28 }
 0x724   : > { %v5062_v32 = vsub.f32 %v8836_v19, %v4991_v12  ;;  %v6411_v8 = vpop.eup %6410  ;;  %v4871_v38 = vpop.xlane.xlu0 %4870 }
 0x725   : > { %v4993_v10 = vmul.f32 0.6931472, %v6411_v8  ;;  %6416 = vlog2.f32 %v4871_v38 }
 0x726   : > { %5126 = vst [vmem:[%s8754_s15 + $0x1c0] sm:$0xff] %v5062_v32  ;;  %v4873_v14 = vpop.xlane.xlu1 %4872 }
 0x727   : > { %v5063_v52 = vsub.f32 %v8842_v29, %v4993_v10  ;;  %6418 = vlog2.f32 %v4873_v14 }
 0x729   : > { %v6413_v26 = vpop.eup %6412  ;;  %5127 = vst [vmem:[%s8754_s15 + $0x1c8] sm:$0xff] %v5063_v52 }
 0x72a   : > { %v4995_v57 = vmul.f32 0.6931472, %v6413_v26 }
 0x72c   : > { %v5064_v37 = vsub.f32 %v8848_v40, %v4995_v57  ;;  %v6415_v11 = vpop.eup %6414  ;;  %v4875_v51 = vpop.xlane.xlu0 %4874 }
 0x72d   : > { %v4997_v19 = vmul.f32 0.6931472, %v6415_v11  ;;  %6420 = vlog2.f32 %v4875_v51 }
 0x72e   : > { %5128 = vst [vmem:[%s8754_s15 + $0x1d0] sm:$0xff] %v5064_v37  ;;  %v4877_v45 = vpop.xlane.xlu1 %4876 }
 0x72f   : > { %v6417_v13 = vpop.eup %6416  ;;  %v5065_v29 = vsub.f32 %v8854_v54, %v4997_v19  ;;  %6422 = vlog2.f32 %v4877_v45 }
 0x730   : > { %v4999_v27 = vmul.f32 0.6931472, %v6417_v13 }
 0x731   : > { %v6419_v53 = vpop.eup %6418  ;;  %5129 = vst [vmem:[%s8754_s15 + $0x1d8] sm:$0xff] %v5065_v29 }
 0x732   : > { %v5066_v39 = vsub.f32 %v8859_v0, %v4999_v27  ;;  %v5001_v40 = vmul.f32 0.6931472, %v6419_v53 }
 0x734   : > { %5130 = vst [vmem:[%s8754_s15 + $0x1e0] sm:$0xff] %v5066_v39  ;;  %v5067_v35 = vsub.f32 %v8864_v46, %v5001_v40 }
 0x736   : > { %5131 = vst [vmem:[%s8754_s15 + $0x1e8] sm:$0xff] %v5067_v35 }
 0x737   : > { %v6421_v44 = vpop.eup %6420 }
 0x738   : > { %v5003_v49 = vmul.f32 0.6931472, %v6421_v44 }
 0x739   : > { %v6423_v54 = vpop.eup %6422 }
 0x73a   : > { %v5068_v7 = vsub.f32 %v8871_v6, %v5003_v49  ;;  %v5005_v15 = vmul.f32 0.6931472, %v6423_v54 }
 0x73c   : > { %5132 = vst [vmem:[%s8754_s15 + $0x1f0] sm:$0xff] %v5068_v7  ;;  %v5069_v0 = vsub.f32 %v8876_v24, %v5005_v15 }
 0x73e   : > { %5133 = vst [vmem:[%s8754_s15 + $0x1f8] sm:$0xff] %v5069_v0 }
 0x73f   : > { %6437 = shalt.err (!%p6434_p3)
}
 0x740   : > { %s6438_s8 = scalar_lea.hbm %s8969_s19, 8192  ;;  %s6442_s14 = scalar_lea.hbm %s9026_s7, 16384 }
 0x741   : > { %p6439_p4 = scmp.ne.s32.totalorder %s8969_s19, %s6438_s8  ;;  %p6443_p9 = scmp.lt.u32.totalorder %s8969_s19, %s9026_s7 }
 0x742   : > { %p6444_p10 = scmp.lt.u32.totalorder %s6442_s14, %s6438_s8  ;;  %p6446_p12 = scmp.lt.u32.totalorder %s6438_s8, %s8969_s19 }
 0x743   : > { %p6440_p7 = pnand %p6439_p4, %p6570_p5 }
 0x744   : > { %p6445_p11 = por %p6444_p10, %p6443_p9 }
 0x745   : > { %p6441_p8 = pneg %p6440_p7 }
 0x746   : > { %p6447_p13 = por %p6446_p12, %p6445_p11 }
 0x748   : > { %p6448_p0 = pnand %p6447_p13, %p6441_p8 }
 0x74a   : > { %6451 = shalt.err (!%p6448_p0)
}
 0x74b   : > { %s6490_s18 = smov 128   ;;  %s6491_s9 = smov 8  }
 0x74c   : > { %5915 = dma.vmem_to_hbm [thread:$0]  (%p6570_p5), %s8971_s17, 8192, %s8969_s19, %s8978_s28, %s6490_s18, %s6490_s18, %s6491_s9  }
 0x74d PF: > { %p5921_p1 = scmp.ge.s32.totalorder %s6486_s27, 2  ;;  %s5163_s20 = sand.u32 1, %s6474_s24  }
 0x74e   : > { %s5164_s22 = scalar_lea.sflag [#allocation3], %s5163_s20 }
 0x74f   : > { %p5918_p2 = pnand %p5921_p1, %p6574_p6 }
 0x751   : > { %6469 = dma.done.wait (!%p5918_p2), %s5164_s22, 8192  }
 0x752   : > { %6471 = vsyncadd (!%p5918_p2), %s5164_s22, 4294959104  ;;  %p17_p3 = scmp.ge.s32.totalorder %s6557_s30, 4   ;;  %s9164_s24 = smov %s6478_s25 }
 0x753   : > { %s9165_s25 = smov %s6482_s26  ;;  %s9166_s26 = smov %s6568_s10 }
 0x754   : > { %s9167_s27 = smov %s6557_s30  ;;  %19 = sbr.rel (!%p17_p3) target bundleno = 3 (0x3), region = 83 }
 0x75b   :  { %5169 = vsyncpa [#allocation3], 1 }
 0x75c   :  { %5171 = vsyncpa [#allocation3 + $0x1], 1 }

</bundles_post_ra>
